<compile_context>
chip_gen: v6e
topology: v6e:2x2x1
jax: 0.10.0
libtpu: 0.0.40
codegen_flags: <defaults>
</compile_context>

<pallas_src>
import functools

import jax
import jax.numpy as jnp
import numpy as np
from jax.experimental import pallas as pl
from jax.experimental.pallas import tpu as pltpu


# ----------------------------- Pallas kernel -------------------------------


def _bottleneck_kernel(x_ref, w1_ref, b1_ref, w2_ref, b2_ref, w3_ref, b3_ref,
                       out_ref, *, L, K1, K2, K3, P1, P2, P3, cdt):
  NB = x_ref.shape[0]                       # batches in this grid step
  NL = NB * L

  # NCL -> channels-last (NB*L, C0) slab, entirely in VMEM: per-batch 2-D
  # transpose (XLU, otherwise idle) + sublane-aligned concat.  No HBM
  # transpose / padded activation slab is ever materialized in the wrapper.
  xs = jnp.concatenate([x_ref[n].T for n in range(NB)], axis=0)
  xs = xs.astype(jnp.float32)               # residual stays full precision

  # Local position of every stacked row inside its own batch (tap masking).
  pos_l = jax.lax.broadcasted_iota(jnp.int32, (L, 1), 0)
  pos = jnp.concatenate([pos_l] * NB, axis=0)          # (NL, 1)

  def conv_stage(h, w_ref, b_ref, K, pad, relu, residual=None):
    """conv1d(stride=1, 'same') + folded-BN bias (+residual) (+ReLU).

    h     : (NL, Cin) f32 activations (all batches stacked on sublanes)
    w_ref : (K, Cin, Cout) weights, BN scale pre-folded, dtype = cdt
    b_ref : (1, Cout) folded BN bias, f32
    """
    cout = w_ref.shape[2]
    acc = jnp.zeros((NL, cout), jnp.float32)
    for k in range(K):
      s = k - pad                           # y[l] consumes h[l + s]
      if s == 0:
        tap = h
      else:
        # Sublane rotation (XLU slot) instead of lane-axis im2col concat;
        # rows that crossed a batch / sequence boundary are masked to zero.
        rolled = pltpu.roll(h, shift=(-s) % NL, axis=0)
        valid = jnp.logical_and(pos + s >= 0, pos + s < L)
        tap = jnp.where(valid, rolled, 0.0)
      # bf16 (v6e/v7x) touches only the MXU operands; accumulation is f32.
      acc = acc + jnp.dot(tap.astype(cdt), w_ref[k],
                          preferred_element_type=jnp.float32)
    y = acc + b_ref[...]                    # BN scale already folded into w
    if residual is not None:
      y = y + residual
    if relu:
      y = jnp.maximum(y, 0.0)
    return y

  h = conv_stage(xs, w1_ref, b1_ref, K1, P1, relu=True)
  h = conv_stage(h, w2_ref, b2_ref, K2, P2, relu=True)
  # Dropout(p=0.2) is identity in eval mode.
  h = conv_stage(h, w3_ref, b3_ref, K3, P3, relu=True, residual=xs)

  # Write back in the module's native NCL layout (in-kernel transpose); this
  # is the only HBM write of the whole block.
  for n in range(NB):
    out_ref[n] = h[n * L:(n + 1) * L, :].T.astype(out_ref.dtype)


# ------------------------------ host wrapper --------------------------------


def _fold_stage(w_oik, bn, compute_dtype, eps=1e-5):
  """Fold eval-mode BN into the conv weight; reshape for the kernel."""
  gamma, beta, mean, var = bn
  scale = gamma / jnp.sqrt(var + eps)                     # (Cout,)
  bias = beta - mean * scale                              # (Cout,)
  # PyTorch (Cout, Cin, K) -> (K, Cin, Cout); fold scale in f32, cast once.
  w = jnp.transpose(w_oik, (2, 1, 0)) * scale[None, None, :]
  return w.astype(compute_dtype), bias.reshape(1, -1).astype(jnp.float32)


def bottleneck_forward(x_ncl, params, *, compute_dtype=jnp.float32,
                       batch_block=None):
  """Forward of Bottleneck (stride=1, downsample=None), eval-mode BN/dropout.

  x_ncl: (N, inplanes, L) PyTorch NCL layout; output has the same layout.
  compute_dtype: MXU-operand dtype.  float32 (default; use on v5e) or
    bfloat16 (v6e/v7x) — only the matmul operands are cast, everything else
    (residual, biases, inter-stage activations) stays f32.
  batch_block: batches per grid step.  Default = N (single grid step, best on
    single-TC v5e/v6e).  Set N//2 on v7x so both TensorCores get a step.
  """
  N, C0, L = x_ncl.shape
  K1, K2, K3 = (params["w1"].shape[2], params["w2"].shape[2],
                params["w3"].shape[2])
  C1 = params["w1"].shape[0]
  C2 = params["w3"].shape[0]
  assert C2 == C0, "identity residual requires inplanes == planes * expansion"
  P1, P2, P3 = K1 // 2, K2 // 2, K3 // 2

  w1, b1 = _fold_stage(params["w1"], params["bn1"], compute_dtype)
  w2, b2 = _fold_stage(params["w2"], params["bn2"], compute_dtype)
  w3, b3 = _fold_stage(params["w3"], params["bn3"], compute_dtype)

  if batch_block is None:
    batch_block = N
  assert N % batch_block == 0
  grid = (N // batch_block,)

  kernel = functools.partial(_bottleneck_kernel, L=L, K1=K1, K2=K2, K3=K3,
                             P1=P1, P2=P2, P3=P3, cdt=compute_dtype)

  itemsize = jnp.dtype(x_ncl.dtype).itemsize
  flops = 2 * N * L * (K1 * C0 * C1 + K2 * C1 * C1 + K3 * C1 * C2)
  bytes_accessed = int(
      2 * N * C0 * L * itemsize
      + sum(int(a.size) * a.dtype.itemsize for a in (w1, b1, w2, b2, w3, b3)))

  const3 = lambda b: (0, 0, 0)   # weights / biases stay resident across steps
  const2 = lambda b: (0, 0)

  out = pl.pallas_call(
      kernel,
      grid=grid,
      in_specs=[
          pl.BlockSpec((batch_block, C0, L), lambda b: (b, 0, 0)),  # x (NCL)
          pl.BlockSpec((K1, C0, C1), const3),   # w1 (BN scale folded)
          pl.BlockSpec((1, C1), const2),        # bn1 bias
          pl.BlockSpec((K2, C1, C1), const3),   # w2
          pl.BlockSpec((1, C1), const2),        # bn2 bias
          pl.BlockSpec((K3, C1, C2), const3),   # w3
          pl.BlockSpec((1, C2), const2),        # bn3 bias
      ],
      out_specs=pl.BlockSpec((batch_block, C2, L), lambda b: (b, 0, 0)),
      out_shape=jax.ShapeDtypeStruct((N, C2, L), x_ncl.dtype),
      compiler_params=pltpu.CompilerParams(
          dimension_semantics=("parallel",)),
      cost_estimate=pl.CostEstimate(flops=flops, transcendentals=0,
                                    bytes_accessed=bytes_accessed),
  )(x_ncl, w1, b1, w2, b2, w3, b3)
  return out


# ------------------------------- reference ----------------------------------


def _ref_bottleneck(x_ncl, params, eps=1e-5):
  def conv(x, w):
    pad = w.shape[2] // 2
    return jax.lax.conv_general_dilated(
        x, w, window_strides=(1,), padding=[(pad, pad)],
        dimension_numbers=("NCH", "OIH", "NCH"),
        precision=jax.lax.Precision.HIGHEST)

  def bn(y, p):
    gamma, beta, mean, var = p
    s = gamma / jnp.sqrt(var + eps)
    return y * s[None, :, None] + (beta - mean * s)[None, :, None]

  out = jnp.maximum(bn(conv(x_ncl, params["w1"]), params["bn1"]), 0.0)
  out = jnp.maximum(bn(conv(out, params["w2"]), params["bn2"]), 0.0)
  out = bn(conv(out, params["w3"]), params["bn3"]) + x_ncl
  return jnp.maximum(out, 0.0)


# --------------------------------- main --------------------------------------


def _init_params(key, inplanes, planes):
  expansion = 4
  ks = jax.random.split(key, 12)

  def conv_w(k, cout, cin, ksz):
    fan_in = cin * ksz
    return jax.random.normal(k, (cout, cin, ksz), jnp.float32) * np.sqrt(
        2.0 / fan_in)

  def bn_p(k0, k1, k2, k3, c):
    gamma = 0.5 + jax.random.uniform(k0, (c,), jnp.float32)
    beta = 0.1 * jax.random.normal(k1, (c,), jnp.float32)
    mean = 0.1 * jax.random.normal(k2, (c,), jnp.float32)
    var = 0.5 + jax.random.uniform(k3, (c,), jnp.float32)
    return (gamma, beta, mean, var)

  return {
      "w1": conv_w(ks[0], planes, inplanes, 7),
      "bn1": bn_p(ks[1], ks[2], ks[3], ks[4], planes),
      "w2": conv_w(ks[5], planes, planes, 11),
      "bn2": bn_p(ks[6], ks[7], ks[8], ks[9], planes),
      "w3": conv_w(ks[10], planes * expansion, planes, 7),
      "bn3": bn_p(ks[11], ks[1], ks[5], ks[9], planes * expansion),
  }


if __name__ == "__main__":
  key = jax.random.PRNGKey(0)
  k_x, k_p = jax.random.split(key)

  N, planes, L = 2, 8, 32
  inplanes = planes * 4  # required for identity residual (downsample=None)

  x = jax.random.normal(k_x, (N, inplanes, L), jnp.float32)
  params = _init_params(k_p, inplanes, planes)

  fwd = jax.jit(bottleneck_forward,
                static_argnames=("compute_dtype", "batch_block"))
  ref = _ref_bottleneck(x, params)

  # f32 path (v5e default): tight correctness check.
  out = jax.block_until_ready(fwd(x, params))
  assert out.shape == (N, inplanes, L)
  np.testing.assert_allclose(np.asarray(out), np.asarray(ref),
                             rtol=1e-4, atol=1e-4)

  # bf16 matmul-operand path (v6e/v7x): f32 residual / intermediates / accum.
  out_bf16 = jax.block_until_ready(fwd(x, params, compute_dtype=jnp.bfloat16))
  np.testing.assert_allclose(np.asarray(out_bf16), np.asarray(ref),
                             rtol=5e-2, atol=1.5e-1)

  print("KERNEL_OK")
</pallas_src>

<mosaic_0001>
module attributes {stable_mosaic.version = 11 : i64} {
  func.func @_bottleneck_kernel(%arg0: i32, %arg1: memref<2x32x32xf32, #tpu.memory_space<vmem>>, %arg2: memref<7x32x8xf32, #tpu.memory_space<vmem>>, %arg3: memref<1x8xf32, #tpu.memory_space<vmem>>, %arg4: memref<11x8x8xf32, #tpu.memory_space<vmem>>, %arg5: memref<1x8xf32, #tpu.memory_space<vmem>>, %arg6: memref<7x8x32xf32, #tpu.memory_space<vmem>>, %arg7: memref<1x32xf32, #tpu.memory_space<vmem>>, %arg8: memref<2x32x32xf32, #tpu.memory_space<vmem>>) attributes {dimension_semantics = [#tpu.dimension_semantics<parallel>], iteration_bounds = array<i64: 1>, scalar_prefetch = 0 : i64, scratch_operands = 0 : i64, tpu.core_type = #tpu.core_type<tc>, window_params = [{transform_indices = @transform_0, window_bounds = array<i64: 2, 32, 32>}, {pipeline_mode = #tpu.pipeline_mode<synchronous>, transform_indices = @transform_1, window_bounds = array<i64: 7, 32, 8>}, {pipeline_mode = #tpu.pipeline_mode<synchronous>, transform_indices = @transform_2, window_bounds = array<i64: 1, 8>}, {pipeline_mode = #tpu.pipeline_mode<synchronous>, transform_indices = @transform_3, window_bounds = array<i64: 11, 8, 8>}, {pipeline_mode = #tpu.pipeline_mode<synchronous>, transform_indices = @transform_4, window_bounds = array<i64: 1, 8>}, {pipeline_mode = #tpu.pipeline_mode<synchronous>, transform_indices = @transform_5, window_bounds = array<i64: 7, 8, 32>}, {pipeline_mode = #tpu.pipeline_mode<synchronous>, transform_indices = @transform_6, window_bounds = array<i64: 1, 32>}, {transform_indices = @transform_7, window_bounds = array<i64: 2, 32, 32>}]} {
    %c0 = arith.constant 0 : index
    %c0_0 = arith.constant 0 : index
    %c0_1 = arith.constant 0 : index
    %0 = vector.load %arg1[%c0, %c0_0, %c0_1] : memref<2x32x32xf32, #tpu.memory_space<vmem>>, vector<1x32x32xf32>
    %1 = vector.shape_cast %0 : vector<1x32x32xf32> to vector<32x32xf32>
    %2 = tpu.transpose %1, [1, 0] : vector<32x32xf32> -> vector<32x32xf32>
    %c1 = arith.constant 1 : index
    %c0_2 = arith.constant 0 : index
    %c0_3 = arith.constant 0 : index
    %3 = vector.load %arg1[%c1, %c0_2, %c0_3] : memref<2x32x32xf32, #tpu.memory_space<vmem>>, vector<1x32x32xf32>
    %4 = vector.shape_cast %3 : vector<1x32x32xf32> to vector<32x32xf32>
    %5 = tpu.transpose %4, [1, 0] : vector<32x32xf32> -> vector<32x32xf32>
    %6 = tpu.concatenate %2, %5 in 0 : vector<32x32xf32>, vector<32x32xf32> -> vector<64x32xf32>
    %7 = tpu.iota {dimensions = array<i32: 0>} : vector<32x1xi32>
    %8 = tpu.concatenate %7, %7 in 0 : vector<32x1xi32>, vector<32x1xi32> -> vector<64x1xi32>
    %cst = arith.constant 0.000000e+00 : f32
    %9 = vector.broadcast %cst : f32 to vector<64x8xf32>
    %c3_i32 = arith.constant 3 : i32
    %10 = tpu.dynamic_rotate %6 by %c3_i32 dim 0 : vector<64x32xf32>, i32 -> vector<64x32xf32>
    %c-3_i32 = arith.constant -3 : i32
    %11 = vector.broadcast %c-3_i32 : i32 to vector<64x1xi32>
    %12 = arith.addi %8, %11 : vector<64x1xi32>
    %c0_i32 = arith.constant 0 : i32
    %13 = vector.broadcast %c0_i32 : i32 to vector<64x1xi32>
    %14 = arith.cmpi sge, %12, %13 : vector<64x1xi32>
    %c-3_i32_4 = arith.constant -3 : i32
    %15 = vector.broadcast %c-3_i32_4 : i32 to vector<64x1xi32>
    %16 = arith.addi %8, %15 : vector<64x1xi32>
    %c32_i32 = arith.constant 32 : i32
    %17 = vector.broadcast %c32_i32 : i32 to vector<64x1xi32>
    %18 = arith.cmpi slt, %16, %17 : vector<64x1xi32>
    %19 = arith.andi %14, %18 : vector<64x1xi1>
    %cst_5 = arith.constant 0.000000e+00 : f32
    %20 = vector.shape_cast %19 : vector<64x1xi1> to vector<64x1xi1>
    %21 = vector.broadcast %20 : vector<64x1xi1> to vector<64x32xi1>
    %22 = vector.broadcast %cst_5 : f32 to vector<64x32xf32>
    %23 = arith.select %21, %10, %22 : vector<64x32xi1>, vector<64x32xf32>
    %c0_6 = arith.constant 0 : index
    %c0_7 = arith.constant 0 : index
    %c0_8 = arith.constant 0 : index
    %24 = vector.load %arg2[%c0_6, %c0_7, %c0_8] : memref<7x32x8xf32, #tpu.memory_space<vmem>>, vector<1x32x8xf32>
    %25 = vector.shape_cast %24 : vector<1x32x8xf32> to vector<32x8xf32>
    %cst_9 = arith.constant dense<0.000000e+00> : vector<64x8xf32>
    %26 = tpu.matmul %23, %25, %cst_9 {dimension_numbers = #tpu.dot_dimension_numbers<[1], [0], [0], [1], [0, 0, 1, 1], [], []>} : vector<64x32xf32>, vector<32x8xf32>, vector<64x8xf32> -> vector<64x8xf32>
    %27 = arith.addf %9, %26 : vector<64x8xf32>
    %c2_i32 = arith.constant 2 : i32
    %28 = tpu.dynamic_rotate %6 by %c2_i32 dim 0 : vector<64x32xf32>, i32 -> vector<64x32xf32>
    %c-2_i32 = arith.constant -2 : i32
    %29 = vector.broadcast %c-2_i32 : i32 to vector<64x1xi32>
    %30 = arith.addi %8, %29 : vector<64x1xi32>
    %c0_i32_10 = arith.constant 0 : i32
    %31 = vector.broadcast %c0_i32_10 : i32 to vector<64x1xi32>
    %32 = arith.cmpi sge, %30, %31 : vector<64x1xi32>
    %c-2_i32_11 = arith.constant -2 : i32
    %33 = vector.broadcast %c-2_i32_11 : i32 to vector<64x1xi32>
    %34 = arith.addi %8, %33 : vector<64x1xi32>
    %c32_i32_12 = arith.constant 32 : i32
    %35 = vector.broadcast %c32_i32_12 : i32 to vector<64x1xi32>
    %36 = arith.cmpi slt, %34, %35 : vector<64x1xi32>
    %37 = arith.andi %32, %36 : vector<64x1xi1>
    %cst_13 = arith.constant 0.000000e+00 : f32
    %38 = vector.shape_cast %37 : vector<64x1xi1> to vector<64x1xi1>
    %39 = vector.broadcast %38 : vector<64x1xi1> to vector<64x32xi1>
    %40 = vector.broadcast %cst_13 : f32 to vector<64x32xf32>
    %41 = arith.select %39, %28, %40 : vector<64x32xi1>, vector<64x32xf32>
    %c1_14 = arith.constant 1 : index
    %c0_15 = arith.constant 0 : index
    %c0_16 = arith.constant 0 : index
    %42 = vector.load %arg2[%c1_14, %c0_15, %c0_16] : memref<7x32x8xf32, #tpu.memory_space<vmem>>, vector<1x32x8xf32>
    %43 = vector.shape_cast %42 : vector<1x32x8xf32> to vector<32x8xf32>
    %cst_17 = arith.constant dense<0.000000e+00> : vector<64x8xf32>
    %44 = tpu.matmul %41, %43, %cst_17 {dimension_numbers = #tpu.dot_dimension_numbers<[1], [0], [0], [1], [0, 0, 1, 1], [], []>} : vector<64x32xf32>, vector<32x8xf32>, vector<64x8xf32> -> vector<64x8xf32>
    %45 = arith.addf %27, %44 : vector<64x8xf32>
    %c1_i32 = arith.constant 1 : i32
    %46 = tpu.dynamic_rotate %6 by %c1_i32 dim 0 : vector<64x32xf32>, i32 -> vector<64x32xf32>
    %c-1_i32 = arith.constant -1 : i32
    %47 = vector.broadcast %c-1_i32 : i32 to vector<64x1xi32>
    %48 = arith.addi %8, %47 : vector<64x1xi32>
    %c0_i32_18 = arith.constant 0 : i32
    %49 = vector.broadcast %c0_i32_18 : i32 to vector<64x1xi32>
    %50 = arith.cmpi sge, %48, %49 : vector<64x1xi32>
    %c-1_i32_19 = arith.constant -1 : i32
    %51 = vector.broadcast %c-1_i32_19 : i32 to vector<64x1xi32>
    %52 = arith.addi %8, %51 : vector<64x1xi32>
    %c32_i32_20 = arith.constant 32 : i32
    %53 = vector.broadcast %c32_i32_20 : i32 to vector<64x1xi32>
    %54 = arith.cmpi slt, %52, %53 : vector<64x1xi32>
    %55 = arith.andi %50, %54 : vector<64x1xi1>
    %cst_21 = arith.constant 0.000000e+00 : f32
    %56 = vector.shape_cast %55 : vector<64x1xi1> to vector<64x1xi1>
    %57 = vector.broadcast %56 : vector<64x1xi1> to vector<64x32xi1>
    %58 = vector.broadcast %cst_21 : f32 to vector<64x32xf32>
    %59 = arith.select %57, %46, %58 : vector<64x32xi1>, vector<64x32xf32>
    %c2 = arith.constant 2 : index
    %c0_22 = arith.constant 0 : index
    %c0_23 = arith.constant 0 : index
    %60 = vector.load %arg2[%c2, %c0_22, %c0_23] : memref<7x32x8xf32, #tpu.memory_space<vmem>>, vector<1x32x8xf32>
    %61 = vector.shape_cast %60 : vector<1x32x8xf32> to vector<32x8xf32>
    %cst_24 = arith.constant dense<0.000000e+00> : vector<64x8xf32>
    %62 = tpu.matmul %59, %61, %cst_24 {dimension_numbers = #tpu.dot_dimension_numbers<[1], [0], [0], [1], [0, 0, 1, 1], [], []>} : vector<64x32xf32>, vector<32x8xf32>, vector<64x8xf32> -> vector<64x8xf32>
    %63 = arith.addf %45, %62 : vector<64x8xf32>
    %c3 = arith.constant 3 : index
    %c0_25 = arith.constant 0 : index
    %c0_26 = arith.constant 0 : index
    %64 = vector.load %arg2[%c3, %c0_25, %c0_26] : memref<7x32x8xf32, #tpu.memory_space<vmem>>, vector<1x32x8xf32>
    %65 = vector.shape_cast %64 : vector<1x32x8xf32> to vector<32x8xf32>
    %cst_27 = arith.constant dense<0.000000e+00> : vector<64x8xf32>
    %66 = tpu.matmul %6, %65, %cst_27 {dimension_numbers = #tpu.dot_dimension_numbers<[1], [0], [0], [1], [0, 0, 1, 1], [], []>} : vector<64x32xf32>, vector<32x8xf32>, vector<64x8xf32> -> vector<64x8xf32>
    %67 = arith.addf %63, %66 : vector<64x8xf32>
    %c63_i32 = arith.constant 63 : i32
    %68 = tpu.dynamic_rotate %6 by %c63_i32 dim 0 : vector<64x32xf32>, i32 -> vector<64x32xf32>
    %c1_i32_28 = arith.constant 1 : i32
    %69 = vector.broadcast %c1_i32_28 : i32 to vector<64x1xi32>
    %70 = arith.addi %8, %69 : vector<64x1xi32>
    %c0_i32_29 = arith.constant 0 : i32
    %71 = vector.broadcast %c0_i32_29 : i32 to vector<64x1xi32>
    %72 = arith.cmpi sge, %70, %71 : vector<64x1xi32>
    %c1_i32_30 = arith.constant 1 : i32
    %73 = vector.broadcast %c1_i32_30 : i32 to vector<64x1xi32>
    %74 = arith.addi %8, %73 : vector<64x1xi32>
    %c32_i32_31 = arith.constant 32 : i32
    %75 = vector.broadcast %c32_i32_31 : i32 to vector<64x1xi32>
    %76 = arith.cmpi slt, %74, %75 : vector<64x1xi32>
    %77 = arith.andi %72, %76 : vector<64x1xi1>
    %cst_32 = arith.constant 0.000000e+00 : f32
    %78 = vector.shape_cast %77 : vector<64x1xi1> to vector<64x1xi1>
    %79 = vector.broadcast %78 : vector<64x1xi1> to vector<64x32xi1>
    %80 = vector.broadcast %cst_32 : f32 to vector<64x32xf32>
    %81 = arith.select %79, %68, %80 : vector<64x32xi1>, vector<64x32xf32>
    %c4 = arith.constant 4 : index
    %c0_33 = arith.constant 0 : index
    %c0_34 = arith.constant 0 : index
    %82 = vector.load %arg2[%c4, %c0_33, %c0_34] : memref<7x32x8xf32, #tpu.memory_space<vmem>>, vector<1x32x8xf32>
    %83 = vector.shape_cast %82 : vector<1x32x8xf32> to vector<32x8xf32>
    %cst_35 = arith.constant dense<0.000000e+00> : vector<64x8xf32>
    %84 = tpu.matmul %81, %83, %cst_35 {dimension_numbers = #tpu.dot_dimension_numbers<[1], [0], [0], [1], [0, 0, 1, 1], [], []>} : vector<64x32xf32>, vector<32x8xf32>, vector<64x8xf32> -> vector<64x8xf32>
    %85 = arith.addf %67, %84 : vector<64x8xf32>
    %c62_i32 = arith.constant 62 : i32
    %86 = tpu.dynamic_rotate %6 by %c62_i32 dim 0 : vector<64x32xf32>, i32 -> vector<64x32xf32>
    %c2_i32_36 = arith.constant 2 : i32
    %87 = vector.broadcast %c2_i32_36 : i32 to vector<64x1xi32>
    %88 = arith.addi %8, %87 : vector<64x1xi32>
    %c0_i32_37 = arith.constant 0 : i32
    %89 = vector.broadcast %c0_i32_37 : i32 to vector<64x1xi32>
    %90 = arith.cmpi sge, %88, %89 : vector<64x1xi32>
    %c2_i32_38 = arith.constant 2 : i32
    %91 = vector.broadcast %c2_i32_38 : i32 to vector<64x1xi32>
    %92 = arith.addi %8, %91 : vector<64x1xi32>
    %c32_i32_39 = arith.constant 32 : i32
    %93 = vector.broadcast %c32_i32_39 : i32 to vector<64x1xi32>
    %94 = arith.cmpi slt, %92, %93 : vector<64x1xi32>
    %95 = arith.andi %90, %94 : vector<64x1xi1>
    %cst_40 = arith.constant 0.000000e+00 : f32
    %96 = vector.shape_cast %95 : vector<64x1xi1> to vector<64x1xi1>
    %97 = vector.broadcast %96 : vector<64x1xi1> to vector<64x32xi1>
    %98 = vector.broadcast %cst_40 : f32 to vector<64x32xf32>
    %99 = arith.select %97, %86, %98 : vector<64x32xi1>, vector<64x32xf32>
    %c5 = arith.constant 5 : index
    %c0_41 = arith.constant 0 : index
    %c0_42 = arith.constant 0 : index
    %100 = vector.load %arg2[%c5, %c0_41, %c0_42] : memref<7x32x8xf32, #tpu.memory_space<vmem>>, vector<1x32x8xf32>
    %101 = vector.shape_cast %100 : vector<1x32x8xf32> to vector<32x8xf32>
    %cst_43 = arith.constant dense<0.000000e+00> : vector<64x8xf32>
    %102 = tpu.matmul %99, %101, %cst_43 {dimension_numbers = #tpu.dot_dimension_numbers<[1], [0], [0], [1], [0, 0, 1, 1], [], []>} : vector<64x32xf32>, vector<32x8xf32>, vector<64x8xf32> -> vector<64x8xf32>
    %103 = arith.addf %85, %102 : vector<64x8xf32>
    %c61_i32 = arith.constant 61 : i32
    %104 = tpu.dynamic_rotate %6 by %c61_i32 dim 0 : vector<64x32xf32>, i32 -> vector<64x32xf32>
    %c3_i32_44 = arith.constant 3 : i32
    %105 = vector.broadcast %c3_i32_44 : i32 to vector<64x1xi32>
    %106 = arith.addi %8, %105 : vector<64x1xi32>
    %c0_i32_45 = arith.constant 0 : i32
    %107 = vector.broadcast %c0_i32_45 : i32 to vector<64x1xi32>
    %108 = arith.cmpi sge, %106, %107 : vector<64x1xi32>
    %c3_i32_46 = arith.constant 3 : i32
    %109 = vector.broadcast %c3_i32_46 : i32 to vector<64x1xi32>
    %110 = arith.addi %8, %109 : vector<64x1xi32>
    %c32_i32_47 = arith.constant 32 : i32
    %111 = vector.broadcast %c32_i32_47 : i32 to vector<64x1xi32>
    %112 = arith.cmpi slt, %110, %111 : vector<64x1xi32>
    %113 = arith.andi %108, %112 : vector<64x1xi1>
    %cst_48 = arith.constant 0.000000e+00 : f32
    %114 = vector.shape_cast %113 : vector<64x1xi1> to vector<64x1xi1>
    %115 = vector.broadcast %114 : vector<64x1xi1> to vector<64x32xi1>
    %116 = vector.broadcast %cst_48 : f32 to vector<64x32xf32>
    %117 = arith.select %115, %104, %116 : vector<64x32xi1>, vector<64x32xf32>
    %c6 = arith.constant 6 : index
    %c0_49 = arith.constant 0 : index
    %c0_50 = arith.constant 0 : index
    %118 = vector.load %arg2[%c6, %c0_49, %c0_50] : memref<7x32x8xf32, #tpu.memory_space<vmem>>, vector<1x32x8xf32>
    %119 = vector.shape_cast %118 : vector<1x32x8xf32> to vector<32x8xf32>
    %cst_51 = arith.constant dense<0.000000e+00> : vector<64x8xf32>
    %120 = tpu.matmul %117, %119, %cst_51 {dimension_numbers = #tpu.dot_dimension_numbers<[1], [0], [0], [1], [0, 0, 1, 1], [], []>} : vector<64x32xf32>, vector<32x8xf32>, vector<64x8xf32> -> vector<64x8xf32>
    %121 = arith.addf %103, %120 : vector<64x8xf32>
    %c0_52 = arith.constant 0 : index
    %c0_53 = arith.constant 0 : index
    %122 = vector.load %arg3[%c0_52, %c0_53] : memref<1x8xf32, #tpu.memory_space<vmem>>, vector<1x8xf32>
    %123 = vector.broadcast %122 : vector<1x8xf32> to vector<64x8xf32>
    %124 = arith.addf %121, %123 : vector<64x8xf32>
    %cst_54 = arith.constant 0.000000e+00 : f32
    %125 = vector.broadcast %cst_54 : f32 to vector<64x8xf32>
    %126 = arith.maximumf %124, %125 : vector<64x8xf32>
    %cst_55 = arith.constant 0.000000e+00 : f32
    %127 = vector.broadcast %cst_55 : f32 to vector<64x8xf32>
    %c5_i32 = arith.constant 5 : i32
    %128 = tpu.dynamic_rotate %126 by %c5_i32 dim 0 : vector<64x8xf32>, i32 -> vector<64x8xf32>
    %c-5_i32 = arith.constant -5 : i32
    %129 = vector.broadcast %c-5_i32 : i32 to vector<64x1xi32>
    %130 = arith.addi %8, %129 : vector<64x1xi32>
    %c0_i32_56 = arith.constant 0 : i32
    %131 = vector.broadcast %c0_i32_56 : i32 to vector<64x1xi32>
    %132 = arith.cmpi sge, %130, %131 : vector<64x1xi32>
    %c-5_i32_57 = arith.constant -5 : i32
    %133 = vector.broadcast %c-5_i32_57 : i32 to vector<64x1xi32>
    %134 = arith.addi %8, %133 : vector<64x1xi32>
    %c32_i32_58 = arith.constant 32 : i32
    %135 = vector.broadcast %c32_i32_58 : i32 to vector<64x1xi32>
    %136 = arith.cmpi slt, %134, %135 : vector<64x1xi32>
    %137 = arith.andi %132, %136 : vector<64x1xi1>
    %cst_59 = arith.constant 0.000000e+00 : f32
    %138 = vector.shape_cast %137 : vector<64x1xi1> to vector<64x1xi1>
    %139 = vector.broadcast %138 : vector<64x1xi1> to vector<64x8xi1>
    %140 = vector.broadcast %cst_59 : f32 to vector<64x8xf32>
    %141 = arith.select %139, %128, %140 : vector<64x8xi1>, vector<64x8xf32>
    %c0_60 = arith.constant 0 : index
    %c0_61 = arith.constant 0 : index
    %c0_62 = arith.constant 0 : index
    %142 = vector.load %arg4[%c0_60, %c0_61, %c0_62] : memref<11x8x8xf32, #tpu.memory_space<vmem>>, vector<1x8x8xf32>
    %143 = vector.shape_cast %142 : vector<1x8x8xf32> to vector<8x8xf32>
    %cst_63 = arith.constant dense<0.000000e+00> : vector<64x8xf32>
    %144 = tpu.matmul %141, %143, %cst_63 {dimension_numbers = #tpu.dot_dimension_numbers<[1], [0], [0], [1], [0, 0, 1, 1], [], []>} : vector<64x8xf32>, vector<8x8xf32>, vector<64x8xf32> -> vector<64x8xf32>
    %145 = arith.addf %127, %144 : vector<64x8xf32>
    %c4_i32 = arith.constant 4 : i32
    %146 = tpu.dynamic_rotate %126 by %c4_i32 dim 0 : vector<64x8xf32>, i32 -> vector<64x8xf32>
    %c-4_i32 = arith.constant -4 : i32
    %147 = vector.broadcast %c-4_i32 : i32 to vector<64x1xi32>
    %148 = arith.addi %8, %147 : vector<64x1xi32>
    %c0_i32_64 = arith.constant 0 : i32
    %149 = vector.broadcast %c0_i32_64 : i32 to vector<64x1xi32>
    %150 = arith.cmpi sge, %148, %149 : vector<64x1xi32>
    %c-4_i32_65 = arith.constant -4 : i32
    %151 = vector.broadcast %c-4_i32_65 : i32 to vector<64x1xi32>
    %152 = arith.addi %8, %151 : vector<64x1xi32>
    %c32_i32_66 = arith.constant 32 : i32
    %153 = vector.broadcast %c32_i32_66 : i32 to vector<64x1xi32>
    %154 = arith.cmpi slt, %152, %153 : vector<64x1xi32>
    %155 = arith.andi %150, %154 : vector<64x1xi1>
    %cst_67 = arith.constant 0.000000e+00 : f32
    %156 = vector.shape_cast %155 : vector<64x1xi1> to vector<64x1xi1>
    %157 = vector.broadcast %156 : vector<64x1xi1> to vector<64x8xi1>
    %158 = vector.broadcast %cst_67 : f32 to vector<64x8xf32>
    %159 = arith.select %157, %146, %158 : vector<64x8xi1>, vector<64x8xf32>
    %c1_68 = arith.constant 1 : index
    %c0_69 = arith.constant 0 : index
    %c0_70 = arith.constant 0 : index
    %160 = vector.load %arg4[%c1_68, %c0_69, %c0_70] : memref<11x8x8xf32, #tpu.memory_space<vmem>>, vector<1x8x8xf32>
    %161 = vector.shape_cast %160 : vector<1x8x8xf32> to vector<8x8xf32>
    %cst_71 = arith.constant dense<0.000000e+00> : vector<64x8xf32>
    %162 = tpu.matmul %159, %161, %cst_71 {dimension_numbers = #tpu.dot_dimension_numbers<[1], [0], [0], [1], [0, 0, 1, 1], [], []>} : vector<64x8xf32>, vector<8x8xf32>, vector<64x8xf32> -> vector<64x8xf32>
    %163 = arith.addf %145, %162 : vector<64x8xf32>
    %c3_i32_72 = arith.constant 3 : i32
    %164 = tpu.dynamic_rotate %126 by %c3_i32_72 dim 0 : vector<64x8xf32>, i32 -> vector<64x8xf32>
    %c-3_i32_73 = arith.constant -3 : i32
    %165 = vector.broadcast %c-3_i32_73 : i32 to vector<64x1xi32>
    %166 = arith.addi %8, %165 : vector<64x1xi32>
    %c0_i32_74 = arith.constant 0 : i32
    %167 = vector.broadcast %c0_i32_74 : i32 to vector<64x1xi32>
    %168 = arith.cmpi sge, %166, %167 : vector<64x1xi32>
    %c-3_i32_75 = arith.constant -3 : i32
    %169 = vector.broadcast %c-3_i32_75 : i32 to vector<64x1xi32>
    %170 = arith.addi %8, %169 : vector<64x1xi32>
    %c32_i32_76 = arith.constant 32 : i32
    %171 = vector.broadcast %c32_i32_76 : i32 to vector<64x1xi32>
    %172 = arith.cmpi slt, %170, %171 : vector<64x1xi32>
    %173 = arith.andi %168, %172 : vector<64x1xi1>
    %cst_77 = arith.constant 0.000000e+00 : f32
    %174 = vector.shape_cast %173 : vector<64x1xi1> to vector<64x1xi1>
    %175 = vector.broadcast %174 : vector<64x1xi1> to vector<64x8xi1>
    %176 = vector.broadcast %cst_77 : f32 to vector<64x8xf32>
    %177 = arith.select %175, %164, %176 : vector<64x8xi1>, vector<64x8xf32>
    %c2_78 = arith.constant 2 : index
    %c0_79 = arith.constant 0 : index
    %c0_80 = arith.constant 0 : index
    %178 = vector.load %arg4[%c2_78, %c0_79, %c0_80] : memref<11x8x8xf32, #tpu.memory_space<vmem>>, vector<1x8x8xf32>
    %179 = vector.shape_cast %178 : vector<1x8x8xf32> to vector<8x8xf32>
    %cst_81 = arith.constant dense<0.000000e+00> : vector<64x8xf32>
    %180 = tpu.matmul %177, %179, %cst_81 {dimension_numbers = #tpu.dot_dimension_numbers<[1], [0], [0], [1], [0, 0, 1, 1], [], []>} : vector<64x8xf32>, vector<8x8xf32>, vector<64x8xf32> -> vector<64x8xf32>
    %181 = arith.addf %163, %180 : vector<64x8xf32>
    %c2_i32_82 = arith.constant 2 : i32
    %182 = tpu.dynamic_rotate %126 by %c2_i32_82 dim 0 : vector<64x8xf32>, i32 -> vector<64x8xf32>
    %c-2_i32_83 = arith.constant -2 : i32
    %183 = vector.broadcast %c-2_i32_83 : i32 to vector<64x1xi32>
    %184 = arith.addi %8, %183 : vector<64x1xi32>
    %c0_i32_84 = arith.constant 0 : i32
    %185 = vector.broadcast %c0_i32_84 : i32 to vector<64x1xi32>
    %186 = arith.cmpi sge, %184, %185 : vector<64x1xi32>
    %c-2_i32_85 = arith.constant -2 : i32
    %187 = vector.broadcast %c-2_i32_85 : i32 to vector<64x1xi32>
    %188 = arith.addi %8, %187 : vector<64x1xi32>
    %c32_i32_86 = arith.constant 32 : i32
    %189 = vector.broadcast %c32_i32_86 : i32 to vector<64x1xi32>
    %190 = arith.cmpi slt, %188, %189 : vector<64x1xi32>
    %191 = arith.andi %186, %190 : vector<64x1xi1>
    %cst_87 = arith.constant 0.000000e+00 : f32
    %192 = vector.shape_cast %191 : vector<64x1xi1> to vector<64x1xi1>
    %193 = vector.broadcast %192 : vector<64x1xi1> to vector<64x8xi1>
    %194 = vector.broadcast %cst_87 : f32 to vector<64x8xf32>
    %195 = arith.select %193, %182, %194 : vector<64x8xi1>, vector<64x8xf32>
    %c3_88 = arith.constant 3 : index
    %c0_89 = arith.constant 0 : index
    %c0_90 = arith.constant 0 : index
    %196 = vector.load %arg4[%c3_88, %c0_89, %c0_90] : memref<11x8x8xf32, #tpu.memory_space<vmem>>, vector<1x8x8xf32>
    %197 = vector.shape_cast %196 : vector<1x8x8xf32> to vector<8x8xf32>
    %cst_91 = arith.constant dense<0.000000e+00> : vector<64x8xf32>
    %198 = tpu.matmul %195, %197, %cst_91 {dimension_numbers = #tpu.dot_dimension_numbers<[1], [0], [0], [1], [0, 0, 1, 1], [], []>} : vector<64x8xf32>, vector<8x8xf32>, vector<64x8xf32> -> vector<64x8xf32>
    %199 = arith.addf %181, %198 : vector<64x8xf32>
    %c1_i32_92 = arith.constant 1 : i32
    %200 = tpu.dynamic_rotate %126 by %c1_i32_92 dim 0 : vector<64x8xf32>, i32 -> vector<64x8xf32>
    %c-1_i32_93 = arith.constant -1 : i32
    %201 = vector.broadcast %c-1_i32_93 : i32 to vector<64x1xi32>
    %202 = arith.addi %8, %201 : vector<64x1xi32>
    %c0_i32_94 = arith.constant 0 : i32
    %203 = vector.broadcast %c0_i32_94 : i32 to vector<64x1xi32>
    %204 = arith.cmpi sge, %202, %203 : vector<64x1xi32>
    %c-1_i32_95 = arith.constant -1 : i32
    %205 = vector.broadcast %c-1_i32_95 : i32 to vector<64x1xi32>
    %206 = arith.addi %8, %205 : vector<64x1xi32>
    %c32_i32_96 = arith.constant 32 : i32
    %207 = vector.broadcast %c32_i32_96 : i32 to vector<64x1xi32>
    %208 = arith.cmpi slt, %206, %207 : vector<64x1xi32>
    %209 = arith.andi %204, %208 : vector<64x1xi1>
    %cst_97 = arith.constant 0.000000e+00 : f32
    %210 = vector.shape_cast %209 : vector<64x1xi1> to vector<64x1xi1>
    %211 = vector.broadcast %210 : vector<64x1xi1> to vector<64x8xi1>
    %212 = vector.broadcast %cst_97 : f32 to vector<64x8xf32>
    %213 = arith.select %211, %200, %212 : vector<64x8xi1>, vector<64x8xf32>
    %c4_98 = arith.constant 4 : index
    %c0_99 = arith.constant 0 : index
    %c0_100 = arith.constant 0 : index
    %214 = vector.load %arg4[%c4_98, %c0_99, %c0_100] : memref<11x8x8xf32, #tpu.memory_space<vmem>>, vector<1x8x8xf32>
    %215 = vector.shape_cast %214 : vector<1x8x8xf32> to vector<8x8xf32>
    %cst_101 = arith.constant dense<0.000000e+00> : vector<64x8xf32>
    %216 = tpu.matmul %213, %215, %cst_101 {dimension_numbers = #tpu.dot_dimension_numbers<[1], [0], [0], [1], [0, 0, 1, 1], [], []>} : vector<64x8xf32>, vector<8x8xf32>, vector<64x8xf32> -> vector<64x8xf32>
    %217 = arith.addf %199, %216 : vector<64x8xf32>
    %c5_102 = arith.constant 5 : index
    %c0_103 = arith.constant 0 : index
    %c0_104 = arith.constant 0 : index
    %218 = vector.load %arg4[%c5_102, %c0_103, %c0_104] : memref<11x8x8xf32, #tpu.memory_space<vmem>>, vector<1x8x8xf32>
    %219 = vector.shape_cast %218 : vector<1x8x8xf32> to vector<8x8xf32>
    %cst_105 = arith.constant dense<0.000000e+00> : vector<64x8xf32>
    %220 = tpu.matmul %126, %219, %cst_105 {dimension_numbers = #tpu.dot_dimension_numbers<[1], [0], [0], [1], [0, 0, 1, 1], [], []>} : vector<64x8xf32>, vector<8x8xf32>, vector<64x8xf32> -> vector<64x8xf32>
    %221 = arith.addf %217, %220 : vector<64x8xf32>
    %c63_i32_106 = arith.constant 63 : i32
    %222 = tpu.dynamic_rotate %126 by %c63_i32_106 dim 0 : vector<64x8xf32>, i32 -> vector<64x8xf32>
    %c1_i32_107 = arith.constant 1 : i32
    %223 = vector.broadcast %c1_i32_107 : i32 to vector<64x1xi32>
    %224 = arith.addi %8, %223 : vector<64x1xi32>
    %c0_i32_108 = arith.constant 0 : i32
    %225 = vector.broadcast %c0_i32_108 : i32 to vector<64x1xi32>
    %226 = arith.cmpi sge, %224, %225 : vector<64x1xi32>
    %c1_i32_109 = arith.constant 1 : i32
    %227 = vector.broadcast %c1_i32_109 : i32 to vector<64x1xi32>
    %228 = arith.addi %8, %227 : vector<64x1xi32>
    %c32_i32_110 = arith.constant 32 : i32
    %229 = vector.broadcast %c32_i32_110 : i32 to vector<64x1xi32>
    %230 = arith.cmpi slt, %228, %229 : vector<64x1xi32>
    %231 = arith.andi %226, %230 : vector<64x1xi1>
    %cst_111 = arith.constant 0.000000e+00 : f32
    %232 = vector.shape_cast %231 : vector<64x1xi1> to vector<64x1xi1>
    %233 = vector.broadcast %232 : vector<64x1xi1> to vector<64x8xi1>
    %234 = vector.broadcast %cst_111 : f32 to vector<64x8xf32>
    %235 = arith.select %233, %222, %234 : vector<64x8xi1>, vector<64x8xf32>
    %c6_112 = arith.constant 6 : index
    %c0_113 = arith.constant 0 : index
    %c0_114 = arith.constant 0 : index
    %236 = vector.load %arg4[%c6_112, %c0_113, %c0_114] : memref<11x8x8xf32, #tpu.memory_space<vmem>>, vector<1x8x8xf32>
    %237 = vector.shape_cast %236 : vector<1x8x8xf32> to vector<8x8xf32>
    %cst_115 = arith.constant dense<0.000000e+00> : vector<64x8xf32>
    %238 = tpu.matmul %235, %237, %cst_115 {dimension_numbers = #tpu.dot_dimension_numbers<[1], [0], [0], [1], [0, 0, 1, 1], [], []>} : vector<64x8xf32>, vector<8x8xf32>, vector<64x8xf32> -> vector<64x8xf32>
    %239 = arith.addf %221, %238 : vector<64x8xf32>
    %c62_i32_116 = arith.constant 62 : i32
    %240 = tpu.dynamic_rotate %126 by %c62_i32_116 dim 0 : vector<64x8xf32>, i32 -> vector<64x8xf32>
    %c2_i32_117 = arith.constant 2 : i32
    %241 = vector.broadcast %c2_i32_117 : i32 to vector<64x1xi32>
    %242 = arith.addi %8, %241 : vector<64x1xi32>
    %c0_i32_118 = arith.constant 0 : i32
    %243 = vector.broadcast %c0_i32_118 : i32 to vector<64x1xi32>
    %244 = arith.cmpi sge, %242, %243 : vector<64x1xi32>
    %c2_i32_119 = arith.constant 2 : i32
    %245 = vector.broadcast %c2_i32_119 : i32 to vector<64x1xi32>
    %246 = arith.addi %8, %245 : vector<64x1xi32>
    %c32_i32_120 = arith.constant 32 : i32
    %247 = vector.broadcast %c32_i32_120 : i32 to vector<64x1xi32>
    %248 = arith.cmpi slt, %246, %247 : vector<64x1xi32>
    %249 = arith.andi %244, %248 : vector<64x1xi1>
    %cst_121 = arith.constant 0.000000e+00 : f32
    %250 = vector.shape_cast %249 : vector<64x1xi1> to vector<64x1xi1>
    %251 = vector.broadcast %250 : vector<64x1xi1> to vector<64x8xi1>
    %252 = vector.broadcast %cst_121 : f32 to vector<64x8xf32>
    %253 = arith.select %251, %240, %252 : vector<64x8xi1>, vector<64x8xf32>
    %c7 = arith.constant 7 : index
    %c0_122 = arith.constant 0 : index
    %c0_123 = arith.constant 0 : index
    %254 = vector.load %arg4[%c7, %c0_122, %c0_123] : memref<11x8x8xf32, #tpu.memory_space<vmem>>, vector<1x8x8xf32>
    %255 = vector.shape_cast %254 : vector<1x8x8xf32> to vector<8x8xf32>
    %cst_124 = arith.constant dense<0.000000e+00> : vector<64x8xf32>
    %256 = tpu.matmul %253, %255, %cst_124 {dimension_numbers = #tpu.dot_dimension_numbers<[1], [0], [0], [1], [0, 0, 1, 1], [], []>} : vector<64x8xf32>, vector<8x8xf32>, vector<64x8xf32> -> vector<64x8xf32>
    %257 = arith.addf %239, %256 : vector<64x8xf32>
    %c61_i32_125 = arith.constant 61 : i32
    %258 = tpu.dynamic_rotate %126 by %c61_i32_125 dim 0 : vector<64x8xf32>, i32 -> vector<64x8xf32>
    %c3_i32_126 = arith.constant 3 : i32
    %259 = vector.broadcast %c3_i32_126 : i32 to vector<64x1xi32>
    %260 = arith.addi %8, %259 : vector<64x1xi32>
    %c0_i32_127 = arith.constant 0 : i32
    %261 = vector.broadcast %c0_i32_127 : i32 to vector<64x1xi32>
    %262 = arith.cmpi sge, %260, %261 : vector<64x1xi32>
    %c3_i32_128 = arith.constant 3 : i32
    %263 = vector.broadcast %c3_i32_128 : i32 to vector<64x1xi32>
    %264 = arith.addi %8, %263 : vector<64x1xi32>
    %c32_i32_129 = arith.constant 32 : i32
    %265 = vector.broadcast %c32_i32_129 : i32 to vector<64x1xi32>
    %266 = arith.cmpi slt, %264, %265 : vector<64x1xi32>
    %267 = arith.andi %262, %266 : vector<64x1xi1>
    %cst_130 = arith.constant 0.000000e+00 : f32
    %268 = vector.shape_cast %267 : vector<64x1xi1> to vector<64x1xi1>
    %269 = vector.broadcast %268 : vector<64x1xi1> to vector<64x8xi1>
    %270 = vector.broadcast %cst_130 : f32 to vector<64x8xf32>
    %271 = arith.select %269, %258, %270 : vector<64x8xi1>, vector<64x8xf32>
    %c8 = arith.constant 8 : index
    %c0_131 = arith.constant 0 : index
    %c0_132 = arith.constant 0 : index
    %272 = vector.load %arg4[%c8, %c0_131, %c0_132] : memref<11x8x8xf32, #tpu.memory_space<vmem>>, vector<1x8x8xf32>
    %273 = vector.shape_cast %272 : vector<1x8x8xf32> to vector<8x8xf32>
    %cst_133 = arith.constant dense<0.000000e+00> : vector<64x8xf32>
    %274 = tpu.matmul %271, %273, %cst_133 {dimension_numbers = #tpu.dot_dimension_numbers<[1], [0], [0], [1], [0, 0, 1, 1], [], []>} : vector<64x8xf32>, vector<8x8xf32>, vector<64x8xf32> -> vector<64x8xf32>
    %275 = arith.addf %257, %274 : vector<64x8xf32>
    %c60_i32 = arith.constant 60 : i32
    %276 = tpu.dynamic_rotate %126 by %c60_i32 dim 0 : vector<64x8xf32>, i32 -> vector<64x8xf32>
    %c4_i32_134 = arith.constant 4 : i32
    %277 = vector.broadcast %c4_i32_134 : i32 to vector<64x1xi32>
    %278 = arith.addi %8, %277 : vector<64x1xi32>
    %c0_i32_135 = arith.constant 0 : i32
    %279 = vector.broadcast %c0_i32_135 : i32 to vector<64x1xi32>
    %280 = arith.cmpi sge, %278, %279 : vector<64x1xi32>
    %c4_i32_136 = arith.constant 4 : i32
    %281 = vector.broadcast %c4_i32_136 : i32 to vector<64x1xi32>
    %282 = arith.addi %8, %281 : vector<64x1xi32>
    %c32_i32_137 = arith.constant 32 : i32
    %283 = vector.broadcast %c32_i32_137 : i32 to vector<64x1xi32>
    %284 = arith.cmpi slt, %282, %283 : vector<64x1xi32>
    %285 = arith.andi %280, %284 : vector<64x1xi1>
    %cst_138 = arith.constant 0.000000e+00 : f32
    %286 = vector.shape_cast %285 : vector<64x1xi1> to vector<64x1xi1>
    %287 = vector.broadcast %286 : vector<64x1xi1> to vector<64x8xi1>
    %288 = vector.broadcast %cst_138 : f32 to vector<64x8xf32>
    %289 = arith.select %287, %276, %288 : vector<64x8xi1>, vector<64x8xf32>
    %c9 = arith.constant 9 : index
    %c0_139 = arith.constant 0 : index
    %c0_140 = arith.constant 0 : index
    %290 = vector.load %arg4[%c9, %c0_139, %c0_140] : memref<11x8x8xf32, #tpu.memory_space<vmem>>, vector<1x8x8xf32>
    %291 = vector.shape_cast %290 : vector<1x8x8xf32> to vector<8x8xf32>
    %cst_141 = arith.constant dense<0.000000e+00> : vector<64x8xf32>
    %292 = tpu.matmul %289, %291, %cst_141 {dimension_numbers = #tpu.dot_dimension_numbers<[1], [0], [0], [1], [0, 0, 1, 1], [], []>} : vector<64x8xf32>, vector<8x8xf32>, vector<64x8xf32> -> vector<64x8xf32>
    %293 = arith.addf %275, %292 : vector<64x8xf32>
    %c59_i32 = arith.constant 59 : i32
    %294 = tpu.dynamic_rotate %126 by %c59_i32 dim 0 : vector<64x8xf32>, i32 -> vector<64x8xf32>
    %c5_i32_142 = arith.constant 5 : i32
    %295 = vector.broadcast %c5_i32_142 : i32 to vector<64x1xi32>
    %296 = arith.addi %8, %295 : vector<64x1xi32>
    %c0_i32_143 = arith.constant 0 : i32
    %297 = vector.broadcast %c0_i32_143 : i32 to vector<64x1xi32>
    %298 = arith.cmpi sge, %296, %297 : vector<64x1xi32>
    %c5_i32_144 = arith.constant 5 : i32
    %299 = vector.broadcast %c5_i32_144 : i32 to vector<64x1xi32>
    %300 = arith.addi %8, %299 : vector<64x1xi32>
    %c32_i32_145 = arith.constant 32 : i32
    %301 = vector.broadcast %c32_i32_145 : i32 to vector<64x1xi32>
    %302 = arith.cmpi slt, %300, %301 : vector<64x1xi32>
    %303 = arith.andi %298, %302 : vector<64x1xi1>
    %cst_146 = arith.constant 0.000000e+00 : f32
    %304 = vector.shape_cast %303 : vector<64x1xi1> to vector<64x1xi1>
    %305 = vector.broadcast %304 : vector<64x1xi1> to vector<64x8xi1>
    %306 = vector.broadcast %cst_146 : f32 to vector<64x8xf32>
    %307 = arith.select %305, %294, %306 : vector<64x8xi1>, vector<64x8xf32>
    %c10 = arith.constant 10 : index
    %c0_147 = arith.constant 0 : index
    %c0_148 = arith.constant 0 : index
    %308 = vector.load %arg4[%c10, %c0_147, %c0_148] : memref<11x8x8xf32, #tpu.memory_space<vmem>>, vector<1x8x8xf32>
    %309 = vector.shape_cast %308 : vector<1x8x8xf32> to vector<8x8xf32>
    %cst_149 = arith.constant dense<0.000000e+00> : vector<64x8xf32>
    %310 = tpu.matmul %307, %309, %cst_149 {dimension_numbers = #tpu.dot_dimension_numbers<[1], [0], [0], [1], [0, 0, 1, 1], [], []>} : vector<64x8xf32>, vector<8x8xf32>, vector<64x8xf32> -> vector<64x8xf32>
    %311 = arith.addf %293, %310 : vector<64x8xf32>
    %c0_150 = arith.constant 0 : index
    %c0_151 = arith.constant 0 : index
    %312 = vector.load %arg5[%c0_150, %c0_151] : memref<1x8xf32, #tpu.memory_space<vmem>>, vector<1x8xf32>
    %313 = vector.broadcast %312 : vector<1x8xf32> to vector<64x8xf32>
    %314 = arith.addf %311, %313 : vector<64x8xf32>
    %cst_152 = arith.constant 0.000000e+00 : f32
    %315 = vector.broadcast %cst_152 : f32 to vector<64x8xf32>
    %316 = arith.maximumf %314, %315 : vector<64x8xf32>
    %cst_153 = arith.constant 0.000000e+00 : f32
    %317 = vector.broadcast %cst_153 : f32 to vector<64x32xf32>
    %c3_i32_154 = arith.constant 3 : i32
    %318 = tpu.dynamic_rotate %316 by %c3_i32_154 dim 0 : vector<64x8xf32>, i32 -> vector<64x8xf32>
    %c-3_i32_155 = arith.constant -3 : i32
    %319 = vector.broadcast %c-3_i32_155 : i32 to vector<64x1xi32>
    %320 = arith.addi %8, %319 : vector<64x1xi32>
    %c0_i32_156 = arith.constant 0 : i32
    %321 = vector.broadcast %c0_i32_156 : i32 to vector<64x1xi32>
    %322 = arith.cmpi sge, %320, %321 : vector<64x1xi32>
    %c-3_i32_157 = arith.constant -3 : i32
    %323 = vector.broadcast %c-3_i32_157 : i32 to vector<64x1xi32>
    %324 = arith.addi %8, %323 : vector<64x1xi32>
    %c32_i32_158 = arith.constant 32 : i32
    %325 = vector.broadcast %c32_i32_158 : i32 to vector<64x1xi32>
    %326 = arith.cmpi slt, %324, %325 : vector<64x1xi32>
    %327 = arith.andi %322, %326 : vector<64x1xi1>
    %cst_159 = arith.constant 0.000000e+00 : f32
    %328 = vector.shape_cast %327 : vector<64x1xi1> to vector<64x1xi1>
    %329 = vector.broadcast %328 : vector<64x1xi1> to vector<64x8xi1>
    %330 = vector.broadcast %cst_159 : f32 to vector<64x8xf32>
    %331 = arith.select %329, %318, %330 : vector<64x8xi1>, vector<64x8xf32>
    %c0_160 = arith.constant 0 : index
    %c0_161 = arith.constant 0 : index
    %c0_162 = arith.constant 0 : index
    %332 = vector.load %arg6[%c0_160, %c0_161, %c0_162] : memref<7x8x32xf32, #tpu.memory_space<vmem>>, vector<1x8x32xf32>
    %333 = vector.shape_cast %332 : vector<1x8x32xf32> to vector<8x32xf32>
    %cst_163 = arith.constant dense<0.000000e+00> : vector<64x32xf32>
    %334 = tpu.matmul %331, %333, %cst_163 {dimension_numbers = #tpu.dot_dimension_numbers<[1], [0], [0], [1], [0, 0, 1, 1], [], []>} : vector<64x8xf32>, vector<8x32xf32>, vector<64x32xf32> -> vector<64x32xf32>
    %335 = arith.addf %317, %334 : vector<64x32xf32>
    %c2_i32_164 = arith.constant 2 : i32
    %336 = tpu.dynamic_rotate %316 by %c2_i32_164 dim 0 : vector<64x8xf32>, i32 -> vector<64x8xf32>
    %c-2_i32_165 = arith.constant -2 : i32
    %337 = vector.broadcast %c-2_i32_165 : i32 to vector<64x1xi32>
    %338 = arith.addi %8, %337 : vector<64x1xi32>
    %c0_i32_166 = arith.constant 0 : i32
    %339 = vector.broadcast %c0_i32_166 : i32 to vector<64x1xi32>
    %340 = arith.cmpi sge, %338, %339 : vector<64x1xi32>
    %c-2_i32_167 = arith.constant -2 : i32
    %341 = vector.broadcast %c-2_i32_167 : i32 to vector<64x1xi32>
    %342 = arith.addi %8, %341 : vector<64x1xi32>
    %c32_i32_168 = arith.constant 32 : i32
    %343 = vector.broadcast %c32_i32_168 : i32 to vector<64x1xi32>
    %344 = arith.cmpi slt, %342, %343 : vector<64x1xi32>
    %345 = arith.andi %340, %344 : vector<64x1xi1>
    %cst_169 = arith.constant 0.000000e+00 : f32
    %346 = vector.shape_cast %345 : vector<64x1xi1> to vector<64x1xi1>
    %347 = vector.broadcast %346 : vector<64x1xi1> to vector<64x8xi1>
    %348 = vector.broadcast %cst_169 : f32 to vector<64x8xf32>
    %349 = arith.select %347, %336, %348 : vector<64x8xi1>, vector<64x8xf32>
    %c1_170 = arith.constant 1 : index
    %c0_171 = arith.constant 0 : index
    %c0_172 = arith.constant 0 : index
    %350 = vector.load %arg6[%c1_170, %c0_171, %c0_172] : memref<7x8x32xf32, #tpu.memory_space<vmem>>, vector<1x8x32xf32>
    %351 = vector.shape_cast %350 : vector<1x8x32xf32> to vector<8x32xf32>
    %cst_173 = arith.constant dense<0.000000e+00> : vector<64x32xf32>
    %352 = tpu.matmul %349, %351, %cst_173 {dimension_numbers = #tpu.dot_dimension_numbers<[1], [0], [0], [1], [0, 0, 1, 1], [], []>} : vector<64x8xf32>, vector<8x32xf32>, vector<64x32xf32> -> vector<64x32xf32>
    %353 = arith.addf %335, %352 : vector<64x32xf32>
    %c1_i32_174 = arith.constant 1 : i32
    %354 = tpu.dynamic_rotate %316 by %c1_i32_174 dim 0 : vector<64x8xf32>, i32 -> vector<64x8xf32>
    %c-1_i32_175 = arith.constant -1 : i32
    %355 = vector.broadcast %c-1_i32_175 : i32 to vector<64x1xi32>
    %356 = arith.addi %8, %355 : vector<64x1xi32>
    %c0_i32_176 = arith.constant 0 : i32
    %357 = vector.broadcast %c0_i32_176 : i32 to vector<64x1xi32>
    %358 = arith.cmpi sge, %356, %357 : vector<64x1xi32>
    %c-1_i32_177 = arith.constant -1 : i32
    %359 = vector.broadcast %c-1_i32_177 : i32 to vector<64x1xi32>
    %360 = arith.addi %8, %359 : vector<64x1xi32>
    %c32_i32_178 = arith.constant 32 : i32
    %361 = vector.broadcast %c32_i32_178 : i32 to vector<64x1xi32>
    %362 = arith.cmpi slt, %360, %361 : vector<64x1xi32>
    %363 = arith.andi %358, %362 : vector<64x1xi1>
    %cst_179 = arith.constant 0.000000e+00 : f32
    %364 = vector.shape_cast %363 : vector<64x1xi1> to vector<64x1xi1>
    %365 = vector.broadcast %364 : vector<64x1xi1> to vector<64x8xi1>
    %366 = vector.broadcast %cst_179 : f32 to vector<64x8xf32>
    %367 = arith.select %365, %354, %366 : vector<64x8xi1>, vector<64x8xf32>
    %c2_180 = arith.constant 2 : index
    %c0_181 = arith.constant 0 : index
    %c0_182 = arith.constant 0 : index
    %368 = vector.load %arg6[%c2_180, %c0_181, %c0_182] : memref<7x8x32xf32, #tpu.memory_space<vmem>>, vector<1x8x32xf32>
    %369 = vector.shape_cast %368 : vector<1x8x32xf32> to vector<8x32xf32>
    %cst_183 = arith.constant dense<0.000000e+00> : vector<64x32xf32>
    %370 = tpu.matmul %367, %369, %cst_183 {dimension_numbers = #tpu.dot_dimension_numbers<[1], [0], [0], [1], [0, 0, 1, 1], [], []>} : vector<64x8xf32>, vector<8x32xf32>, vector<64x32xf32> -> vector<64x32xf32>
    %371 = arith.addf %353, %370 : vector<64x32xf32>
    %c3_184 = arith.constant 3 : index
    %c0_185 = arith.constant 0 : index
    %c0_186 = arith.constant 0 : index
    %372 = vector.load %arg6[%c3_184, %c0_185, %c0_186] : memref<7x8x32xf32, #tpu.memory_space<vmem>>, vector<1x8x32xf32>
    %373 = vector.shape_cast %372 : vector<1x8x32xf32> to vector<8x32xf32>
    %cst_187 = arith.constant dense<0.000000e+00> : vector<64x32xf32>
    %374 = tpu.matmul %316, %373, %cst_187 {dimension_numbers = #tpu.dot_dimension_numbers<[1], [0], [0], [1], [0, 0, 1, 1], [], []>} : vector<64x8xf32>, vector<8x32xf32>, vector<64x32xf32> -> vector<64x32xf32>
    %375 = arith.addf %371, %374 : vector<64x32xf32>
    %c63_i32_188 = arith.constant 63 : i32
    %376 = tpu.dynamic_rotate %316 by %c63_i32_188 dim 0 : vector<64x8xf32>, i32 -> vector<64x8xf32>
    %c1_i32_189 = arith.constant 1 : i32
    %377 = vector.broadcast %c1_i32_189 : i32 to vector<64x1xi32>
    %378 = arith.addi %8, %377 : vector<64x1xi32>
    %c0_i32_190 = arith.constant 0 : i32
    %379 = vector.broadcast %c0_i32_190 : i32 to vector<64x1xi32>
    %380 = arith.cmpi sge, %378, %379 : vector<64x1xi32>
    %c1_i32_191 = arith.constant 1 : i32
    %381 = vector.broadcast %c1_i32_191 : i32 to vector<64x1xi32>
    %382 = arith.addi %8, %381 : vector<64x1xi32>
    %c32_i32_192 = arith.constant 32 : i32
    %383 = vector.broadcast %c32_i32_192 : i32 to vector<64x1xi32>
    %384 = arith.cmpi slt, %382, %383 : vector<64x1xi32>
    %385 = arith.andi %380, %384 : vector<64x1xi1>
    %cst_193 = arith.constant 0.000000e+00 : f32
    %386 = vector.shape_cast %385 : vector<64x1xi1> to vector<64x1xi1>
    %387 = vector.broadcast %386 : vector<64x1xi1> to vector<64x8xi1>
    %388 = vector.broadcast %cst_193 : f32 to vector<64x8xf32>
    %389 = arith.select %387, %376, %388 : vector<64x8xi1>, vector<64x8xf32>
    %c4_194 = arith.constant 4 : index
    %c0_195 = arith.constant 0 : index
    %c0_196 = arith.constant 0 : index
    %390 = vector.load %arg6[%c4_194, %c0_195, %c0_196] : memref<7x8x32xf32, #tpu.memory_space<vmem>>, vector<1x8x32xf32>
    %391 = vector.shape_cast %390 : vector<1x8x32xf32> to vector<8x32xf32>
    %cst_197 = arith.constant dense<0.000000e+00> : vector<64x32xf32>
    %392 = tpu.matmul %389, %391, %cst_197 {dimension_numbers = #tpu.dot_dimension_numbers<[1], [0], [0], [1], [0, 0, 1, 1], [], []>} : vector<64x8xf32>, vector<8x32xf32>, vector<64x32xf32> -> vector<64x32xf32>
    %393 = arith.addf %375, %392 : vector<64x32xf32>
    %c62_i32_198 = arith.constant 62 : i32
    %394 = tpu.dynamic_rotate %316 by %c62_i32_198 dim 0 : vector<64x8xf32>, i32 -> vector<64x8xf32>
    %c2_i32_199 = arith.constant 2 : i32
    %395 = vector.broadcast %c2_i32_199 : i32 to vector<64x1xi32>
    %396 = arith.addi %8, %395 : vector<64x1xi32>
    %c0_i32_200 = arith.constant 0 : i32
    %397 = vector.broadcast %c0_i32_200 : i32 to vector<64x1xi32>
    %398 = arith.cmpi sge, %396, %397 : vector<64x1xi32>
    %c2_i32_201 = arith.constant 2 : i32
    %399 = vector.broadcast %c2_i32_201 : i32 to vector<64x1xi32>
    %400 = arith.addi %8, %399 : vector<64x1xi32>
    %c32_i32_202 = arith.constant 32 : i32
    %401 = vector.broadcast %c32_i32_202 : i32 to vector<64x1xi32>
    %402 = arith.cmpi slt, %400, %401 : vector<64x1xi32>
    %403 = arith.andi %398, %402 : vector<64x1xi1>
    %cst_203 = arith.constant 0.000000e+00 : f32
    %404 = vector.shape_cast %403 : vector<64x1xi1> to vector<64x1xi1>
    %405 = vector.broadcast %404 : vector<64x1xi1> to vector<64x8xi1>
    %406 = vector.broadcast %cst_203 : f32 to vector<64x8xf32>
    %407 = arith.select %405, %394, %406 : vector<64x8xi1>, vector<64x8xf32>
    %c5_204 = arith.constant 5 : index
    %c0_205 = arith.constant 0 : index
    %c0_206 = arith.constant 0 : index
    %408 = vector.load %arg6[%c5_204, %c0_205, %c0_206] : memref<7x8x32xf32, #tpu.memory_space<vmem>>, vector<1x8x32xf32>
    %409 = vector.shape_cast %408 : vector<1x8x32xf32> to vector<8x32xf32>
    %cst_207 = arith.constant dense<0.000000e+00> : vector<64x32xf32>
    %410 = tpu.matmul %407, %409, %cst_207 {dimension_numbers = #tpu.dot_dimension_numbers<[1], [0], [0], [1], [0, 0, 1, 1], [], []>} : vector<64x8xf32>, vector<8x32xf32>, vector<64x32xf32> -> vector<64x32xf32>
    %411 = arith.addf %393, %410 : vector<64x32xf32>
    %c61_i32_208 = arith.constant 61 : i32
    %412 = tpu.dynamic_rotate %316 by %c61_i32_208 dim 0 : vector<64x8xf32>, i32 -> vector<64x8xf32>
    %c3_i32_209 = arith.constant 3 : i32
    %413 = vector.broadcast %c3_i32_209 : i32 to vector<64x1xi32>
    %414 = arith.addi %8, %413 : vector<64x1xi32>
    %c0_i32_210 = arith.constant 0 : i32
    %415 = vector.broadcast %c0_i32_210 : i32 to vector<64x1xi32>
    %416 = arith.cmpi sge, %414, %415 : vector<64x1xi32>
    %c3_i32_211 = arith.constant 3 : i32
    %417 = vector.broadcast %c3_i32_211 : i32 to vector<64x1xi32>
    %418 = arith.addi %8, %417 : vector<64x1xi32>
    %c32_i32_212 = arith.constant 32 : i32
    %419 = vector.broadcast %c32_i32_212 : i32 to vector<64x1xi32>
    %420 = arith.cmpi slt, %418, %419 : vector<64x1xi32>
    %421 = arith.andi %416, %420 : vector<64x1xi1>
    %cst_213 = arith.constant 0.000000e+00 : f32
    %422 = vector.shape_cast %421 : vector<64x1xi1> to vector<64x1xi1>
    %423 = vector.broadcast %422 : vector<64x1xi1> to vector<64x8xi1>
    %424 = vector.broadcast %cst_213 : f32 to vector<64x8xf32>
    %425 = arith.select %423, %412, %424 : vector<64x8xi1>, vector<64x8xf32>
    %c6_214 = arith.constant 6 : index
    %c0_215 = arith.constant 0 : index
    %c0_216 = arith.constant 0 : index
    %426 = vector.load %arg6[%c6_214, %c0_215, %c0_216] : memref<7x8x32xf32, #tpu.memory_space<vmem>>, vector<1x8x32xf32>
    %427 = vector.shape_cast %426 : vector<1x8x32xf32> to vector<8x32xf32>
    %cst_217 = arith.constant dense<0.000000e+00> : vector<64x32xf32>
    %428 = tpu.matmul %425, %427, %cst_217 {dimension_numbers = #tpu.dot_dimension_numbers<[1], [0], [0], [1], [0, 0, 1, 1], [], []>} : vector<64x8xf32>, vector<8x32xf32>, vector<64x32xf32> -> vector<64x32xf32>
    %429 = arith.addf %411, %428 : vector<64x32xf32>
    %c0_218 = arith.constant 0 : index
    %c0_219 = arith.constant 0 : index
    %430 = vector.load %arg7[%c0_218, %c0_219] : memref<1x32xf32, #tpu.memory_space<vmem>>, vector<1x32xf32>
    %431 = vector.broadcast %430 : vector<1x32xf32> to vector<64x32xf32>
    %432 = arith.addf %429, %431 : vector<64x32xf32>
    %433 = arith.addf %432, %6 : vector<64x32xf32>
    %cst_220 = arith.constant 0.000000e+00 : f32
    %434 = vector.broadcast %cst_220 : f32 to vector<64x32xf32>
    %435 = arith.maximumf %433, %434 : vector<64x32xf32>
    %436 = vector.extract_strided_slice %435 {offsets = [0, 0], sizes = [32, 32], strides = [1, 1]} : vector<64x32xf32> to vector<32x32xf32>
    %437 = tpu.transpose %436, [1, 0] : vector<32x32xf32> -> vector<32x32xf32>
    %c0_221 = arith.constant 0 : index
    %c0_222 = arith.constant 0 : index
    %c0_223 = arith.constant 0 : index
    %438 = vector.load %arg8[%c0_221, %c0_222, %c0_223] : memref<2x32x32xf32, #tpu.memory_space<vmem>>, vector<1x32x32xf32>
    %439 = vector.shape_cast %438 : vector<1x32x32xf32> to vector<32x32xf32>
    %440 = vector.shape_cast %437 : vector<32x32xf32> to vector<1x32x32xf32>
    tpu.vector_store %arg8[%c0_221, %c0_222, %c0_223], %440 {strides = array<i32>} : memref<2x32x32xf32, #tpu.memory_space<vmem>>, vector<1x32x32xf32>,
    %441 = vector.extract_strided_slice %435 {offsets = [32, 0], sizes = [32, 32], strides = [1, 1]} : vector<64x32xf32> to vector<32x32xf32>
    %442 = tpu.transpose %441, [1, 0] : vector<32x32xf32> -> vector<32x32xf32>
    %c1_224 = arith.constant 1 : index
    %c0_225 = arith.constant 0 : index
    %c0_226 = arith.constant 0 : index
    %443 = vector.load %arg8[%c1_224, %c0_225, %c0_226] : memref<2x32x32xf32, #tpu.memory_space<vmem>>, vector<1x32x32xf32>
    %444 = vector.shape_cast %443 : vector<1x32x32xf32> to vector<32x32xf32>
    %445 = vector.shape_cast %442 : vector<32x32xf32> to vector<1x32x32xf32>
    tpu.vector_store %arg8[%c1_224, %c0_225, %c0_226], %445 {strides = array<i32>} : memref<2x32x32xf32, #tpu.memory_space<vmem>>, vector<1x32x32xf32>,
    return
  }
  func.func @transform_0(%arg0: i32) -> (i32, i32, i32) {
    %c0_i32 = arith.constant 0 : i32
    %c0_i32_0 = arith.constant 0 : i32
    %c0_i32_1 = arith.constant 0 : i32
    return %arg0, %c0_i32, %c0_i32_0 : i32, i32, i32
  }
  func.func @transform_1(%arg0: i32) -> (i32, i32, i32) {
    %c0_i32 = arith.constant 0 : i32
    %c0_i32_0 = arith.constant 0 : i32
    %c0_i32_1 = arith.constant 0 : i32
    %c0_i32_2 = arith.constant 0 : i32
    return %c0_i32, %c0_i32_0, %c0_i32_1 : i32, i32, i32
  }
  func.func @transform_2(%arg0: i32) -> (i32, i32) {
    %c0_i32 = arith.constant 0 : i32
    %c0_i32_0 = arith.constant 0 : i32
    %c0_i32_1 = arith.constant 0 : i32
    return %c0_i32, %c0_i32_0 : i32, i32
  }
  func.func @transform_3(%arg0: i32) -> (i32, i32, i32) {
    %c0_i32 = arith.constant 0 : i32
    %c0_i32_0 = arith.constant 0 : i32
    %c0_i32_1 = arith.constant 0 : i32
    %c0_i32_2 = arith.constant 0 : i32
    return %c0_i32, %c0_i32_0, %c0_i32_1 : i32, i32, i32
  }
  func.func @transform_4(%arg0: i32) -> (i32, i32) {
    %c0_i32 = arith.constant 0 : i32
    %c0_i32_0 = arith.constant 0 : i32
    %c0_i32_1 = arith.constant 0 : i32
    return %c0_i32, %c0_i32_0 : i32, i32
  }
  func.func @transform_5(%arg0: i32) -> (i32, i32, i32) {
    %c0_i32 = arith.constant 0 : i32
    %c0_i32_0 = arith.constant 0 : i32
    %c0_i32_1 = arith.constant 0 : i32
    %c0_i32_2 = arith.constant 0 : i32
    return %c0_i32, %c0_i32_0, %c0_i32_1 : i32, i32, i32
  }
  func.func @transform_6(%arg0: i32) -> (i32, i32) {
    %c0_i32 = arith.constant 0 : i32
    %c0_i32_0 = arith.constant 0 : i32
    %c0_i32_1 = arith.constant 0 : i32
    return %c0_i32, %c0_i32_0 : i32, i32
  }
  func.func @transform_7(%arg0: i32) -> (i32, i32, i32) {
    %c0_i32 = arith.constant 0 : i32
    %c0_i32_0 = arith.constant 0 : i32
    %c0_i32_1 = arith.constant 0 : i32
    return %arg0, %c0_i32, %c0_i32_0 : i32, i32, i32
  }
}

</mosaic_0001>

<bundles_post_ra>
// kernel: bottleneck_forward.1
= control target key start
LH: loop header
LB: loop body
LE: loop exit
PB: predicated region body
PF: predicated region fallthrough
CT: control target
= control target key end

     0   :  { %v100_v0 = vlaneseq  ;;  %v5488_v1 = vmov 0   ;;  %v5489_v2 = vmov 1   ;;  %s7341_s0 = inlined_call_operand.vmem [shape: f32[2,32,32], index: 0, kind: input, shape index: {}]   ;;  %s7342_s1 = inlined_call_operand.vmem [shape: f32[7,32,8], index: 1, kind: input, shape index: {}]   ;;  %s7343_s2 = inlined_call_operand.vmem [shape: f32[1,8], index: 2, kind: input, shape index: {}]   ;;  %s7344_s3 = inlined_call_operand.vmem [shape: f32[11,8,8], index: 3, kind: input, shape index: {}]   ;;  %s7345_s4 = inlined_call_operand.vmem [shape: f32[1,8], index: 4, kind: input, shape index: {}]   ;;  %s7346_s5 = inlined_call_operand.vmem [shape: f32[7,8,32], index: 5, kind: input, shape index: {}]   ;;  %s7347_s6 = inlined_call_operand.vmem [shape: f32[1,32], index: 6, kind: input, shape index: {}]   ;;  %s7348_s7 = inlined_call_operand.hbm [shape: f32[2,32,32], index: 7, kind: output, shape index: {}]  }
   0x1   :  { %5465 = vset.pattern.permute.xlu1 %v5488_v1  ;;  %5464 = vset.pattern.permute.xlu0 %v5488_v1 }
   0x2   :  { %214 = vperm.xlu1 %5465, %v5489_v2   ;;  %211 = vperm.xlu0 %5464, %v5489_v2   ;;  %v5537_v3 = vshrl.u32 %v100_v0, 7 }
   0x4   :  { %7456 = vst [vmem:[#allocation5_spill] sm:$0xff] %v5537_v3 }
   0x5   :  { %12 = vsyncpa [#allocation3], 0  ;;  %v187_v4 = vadd.s32 4294967294, %v5537_v3  ;;  %v122_v5 = vadd.s32 4294967293, %v5537_v3  ;;  %v512_v6 = vadd.s32 4294967295, %v5537_v3  ;;  %v27_v10 = vld [vmem:[%s7341_s0] sm:$0xff] }
   0x6   :  { %217 = vperm.xlu1 %5465, %v5489_v2   ;;  %v28_v11 = vld [vmem:[%s7341_s0 + $0x8] sm:$0xff]  ;;  %v29_v12 = vld [vmem:[%s7341_s0 + $0x10] sm:$0xff]  ;;  %v4572_v13 = vld [vmem:[%s7342_s1 + $0x38] sm:$0xff]  ;;  %v104_v24 = vadd.s32 24, %v5537_v3  ;;  %v1550_v30 = vadd.s32 4294967292, %v5537_v3  ;;  %v1488_v33 = vadd.s32 4294967291, %v5537_v3 }
   0x7   :  { %vm191_vm0 = vcmp.ge.s32.totalorder %v187_v4, 0  ;;  %vm126_vm1 = vcmp.ge.s32.totalorder %v122_v5, 0  ;;  %vm516_vm2 = vcmp.ge.s32.totalorder %v512_v6, 0  ;;  %v4571_v14 = vld [vmem:[%s7342_s1 + $0x30] sm:$0xff]  ;;  %v4565_v15 = vld [vmem:[%s7341_s0 + $0x20] sm:$0xff]  ;;  %5450 = vmatprep.subr.mxu1 %v4572_v13  ;;  %5058 = vmatprep.subr.mxu0 %v4572_v13  ;;  %v30_v16 = vld [vmem:[%s7341_s0 + $0x18] sm:$0xff] }
   0x8   :  { %v203_v7 = vsel %vm191_vm0, 1, %v5488_v1  ;;  %v138_v8 = vsel %vm126_vm1, 1, %v5488_v1  ;;  %v528_v9 = vsel %vm516_vm2, 1, %v5488_v1  ;;  %5454 = vmatpush3.msra.mxu1 %v4572_v13  ;;  %5059 = vmatpush3.msra.mxu0 %v4572_v13  ;;  %v4570_v17 = vld [vmem:[%s7342_s1 + $0x28] sm:$0xff]  ;;  %v4569_v18 = vld [vmem:[%s7342_s1 + $0x20] sm:$0xff]  ;;  %v4567_v20 = vld [vmem:[%s7341_s0 + $0x30] sm:$0xff] }
   0x9   :  { %208 = vperm.xlu0 %5464, %v203_v7   ;;  %5451 = vmatprep.subr.mxu1 %v4571_v14  ;;  %v4566_v19 = vld [vmem:[%s7341_s0 + $0x28] sm:$0xff]  ;;  %v5588_v21 = vld [vmem:[%s7342_s1 + $0x18] sm:$0xff]  ;;  %v860_v25 = vadd.s32 1, %v104_v24  ;;  %v1063_v27 = vadd.s32 2, %v104_v24  ;;  %v1266_v28 = vadd.s32 3, %v104_v24  ;;  %vm1554_vm6 = vcmp.ge.s32.totalorder %v1550_v30, 0 }
   0xa   :  { %146 = vperm.xlu1 %5465, %v5489_v2   ;;  %5455 = vmatpush3.msra.mxu1 %v4571_v14  ;;  %v4568_v22 = vld [vmem:[%s7341_s0 + $0x38] sm:$0xff]  ;;  %v1566_v32 = vsel %vm1554_vm6, 1, %v5488_v1  ;;  %vm1492_vm7 = vcmp.ge.s32.totalorder %v1488_v33, 0  ;;  %v2959_v35 = vadd.s32 4, %v104_v24  ;;  %v3142_v37 = vadd.s32 5, %v104_v24  ;;  %v167_v5 = vld [vmem:[%s7342_s1 + $0x8] sm:$0xff] }
   0xb   :  { %5452 = vmatprep.subr.mxu1 %v4570_v17  ;;  %5060 = vmatprep.subr.mxu0 %v4571_v14  ;;  %v5597_v23 = vld [vmem:[%s7342_s1 + $0x58] sm:$0xff]  ;;  %vm868_vm3 = vcmp.lt.s32.totalorder %v860_v25, 32  ;;  %vm1071_vm4 = vcmp.lt.s32.totalorder %v1063_v27, 32  ;;  %vm1274_vm5 = vcmp.lt.s32.totalorder %v1266_v28, 32  ;;  %v1504_v34 = vsel %vm1492_vm7, 1, %v5488_v1  ;;  %v4591_v28 = vld [vmem:[%s7342_s1 + $0x50] sm:$0xff] }
   0xc   :  { %5456 = vmatpush3.msra.mxu1 %v4570_v17  ;;  %5061 = vmatpush3.msra.mxu0 %v4571_v14  ;;  %v876_v26 = vsel %vm868_vm3, 1, %v5488_v1  ;;  %v1079_v29 = vsel %vm1071_vm4, 1, %v5488_v1  ;;  %v1282_v31 = vsel %vm1274_vm5, 1, %v5488_v1  ;;  %vm2967_vm8 = vcmp.lt.s32.totalorder %v2959_v35, 32 }
   0xd   :  { %143 = vperm.xlu0 %5464, %v138_v8   ;;  %5453 = vmatprep.subr.mxu1 %v4569_v18  ;;  %v2975_v39 = vsel %vm2967_vm8, 1, %v5488_v1  ;;  %vm3150_vm9 = vcmp.lt.s32.totalorder %v3142_v37, 32  ;;  %vm178_vm10 = vcmp.lt.s32.totalorder %v5537_v3, 2  ;;  %vm7412_vm11 = vcmask 261120  }
   0xe   :  { %536 = vperm.xlu1 %5465, %v5489_v2   ;;  %5457 = vmatpush3.msra.mxu1 %v4569_v18  ;;  %v3158_v41 = vsel %vm3150_vm9, 1, %v5488_v1  ;;  %v168_v1 = vld [vmem:[%s7342_s1 + $0x10] sm:$0xff]  ;;  %vm113_vm0 = vcmp.lt.s32.totalorder %v5537_v3, 3  ;;  %vm7353_vm2 = vcmp.lt.s32.totalorder %v5537_v3, 1 }
   0xf   :  { %5062 = vmatprep.subr.mxu0 %v4570_v17  ;;  %5078 = vmatprep.subr.mxu1 %v5588_v21 }
  0x10   :  { %5063 = vmatpush3.msra.mxu0 %v4570_v17 }
  0x11   :  { %533 = vperm.xlu0 %5464, %v528_v9   ;;  %5064 = vmatprep.subr.mxu0 %v4569_v18 }
  0x12   :  { %152 = vperm.xlu1 %5465, %v5489_v2   ;;  %5065 = vmatpush3.msra.mxu0 %v4569_v18 }
  0x13   :  { %5098 = vmatprep.subr.mxu0 %v5597_v23 }
  0x15   :  { %149 = vperm.xlu0 %5464, %v5489_v2  }
  0x16   :  { %542 = vperm.xlu1 %5465, %v5489_v2  }
  0x19   :  { %539 = vperm.xlu0 %5464, %v5489_v2  }
  0x37   :  { %31 = vxpose.xlu0.b32.start [1/4] (short) (narrow) %v27_v10, 32 }
  0x3b   :  { %32 = vxpose.xlu0.b32.cont [2/4] (short) (narrow) %v28_v11, 32  ;;  %v166_v11 = vld [vmem:[%s7342_s1] sm:$0xff] }
  0x3f   :  { %33 = vxpose.xlu0.b32.cont [3/4] (short) (narrow) %v29_v12, 32  ;;  %68 = vxpose.xlu1.b32.start [1/4] (short) (narrow) %v4565_v15, 32 }
  0x43   :  { %34 = vxpose.xlu0.b32.end [4/4] (short) (narrow) %v30_v16, 32  ;;  %69 = vxpose.xlu1.b32.cont [2/4] (short) (narrow) %v4566_v19, 32 }
  0x47   :  { %70 = vxpose.xlu1.b32.cont [3/4] (short) (narrow) %v4567_v20, 32 }
  0x4b   :  { %71 = vxpose.xlu1.b32.end [4/4] (short) (narrow) %v4568_v22, 32 }
  0x69   :  { %881 = vperm.xlu1 %5465, %v5489_v2  }
  0x6c   :  { %878 = vperm.xlu0 %5464, %v5489_v2  }
  0x6d   :  { %887 = vperm.xlu1 %5465, %v876_v26  }
  0x70   :  { %884 = vperm.xlu0 %5464, %v5489_v2  }
  0x71   :  { %1084 = vperm.xlu1 %5465, %v5489_v2  }
  0x74   :  { %1081 = vperm.xlu0 %5464, %v5489_v2  }
  0x75   :  { %1287 = vperm.xlu1 %5465, %v5489_v2  }
  0x78   :  { %1284 = vperm.xlu0 %5464, %v5489_v2  }
  0x79   :  { %1090 = vperm.xlu1 %5465, %v1079_v29  }
  0x7c   :  { %1087 = vperm.xlu0 %5464, %v5489_v2  }
  0x7d   :  { %1293 = vperm.xlu1 %5465, %v1282_v31   ;;  %v5623_v36 = vpop.permute.xlu0 %211  ;;  %v5632_v40 = vpop.permute.xlu1 %214 }
  0x7e   :  { %7457 = vst [vmem:[#allocation6_spill] sm:$0xff] %v5623_v36  ;;  %7459 = vst [vmem:[#allocation8_spill] sm:$0xff] %v5632_v40  ;;  %vm7363_vm13 = vcmp.eq.s32.totalorder %v5623_v36, 1  ;;  %vm7356_vm14 = vcmp.eq.s32.totalorder %v5632_v40, 1 }
  0x80   :  { %1290 = vperm.xlu0 %5464, %v5489_v2  }
  0x81   :  { %1574 = vperm.xlu1 %5465, %v5489_v2   ;;  %v5638_v43 = vpop.permute.xlu1 %217 }
  0x82   :  { %7461 = vst [vmem:[#allocation10_spill] sm:$0xff] %v5638_v43  ;;  %vm7354_vm15 = vcmp.eq.s32.totalorder %v5638_v43, 1 }
  0x84   :  { %1571 = vperm.xlu0 %5464, %v1566_v32   ;;  %v5628_v38 = vpop.permute.xlu0 %208  ;;  %v4604_v32 = vld [vmem:[%s7342_s1 + $0x78] sm:$0xff] }
  0x85   :  { %1580 = vperm.xlu1 %5465, %v5489_v2   ;;  %7458 = vst [vmem:[#allocation7_spill] sm:$0xff] %v5628_v38  ;;  %v5643_v45 = vpop.permute.xlu1 %146  ;;  %vm219_vm12 = vcmp.eq.s32.totalorder %v5628_v38, 1 }
  0x86   :  { %7463 = vst [vmem:[#allocation12_spill] sm:$0xff] %v5643_v45  ;;  %vm155_vm3 = vcmp.eq.s32.totalorder %v5643_v45, 1 }
  0x88   :  { %1577 = vperm.xlu0 %5464, %v5489_v2   ;;  %v5636_v42 = vpop.permute.xlu0 %143 }
  0x89   :  { %1512 = vperm.xlu1 %5465, %v5489_v2   ;;  %7460 = vst [vmem:[#allocation9_spill] sm:$0xff] %v5636_v42  ;;  %v5647_v47 = vpop.permute.xlu1 %536  ;;  %vm154_vm1 = vcmp.eq.s32.totalorder %v5636_v42, 1 }
  0x8a   :  { %7465 = vst [vmem:[#allocation14_spill] sm:$0xff] %v5647_v47  ;;  %vm7351_vm7 = vcmp.eq.s32.totalorder %v5647_v47, 1 }
  0x8c   :  { %1509 = vperm.xlu0 %5464, %v1504_v34   ;;  %v5641_v44 = vpop.permute.xlu0 %533 }
  0x8d   :  { %1518 = vperm.xlu1 %5465, %v5489_v2   ;;  %7462 = vst [vmem:[#allocation11_spill] sm:$0xff] %v5641_v44  ;;  %v5651_v49 = vpop.permute.xlu1 %152  ;;  %vm7352_vm4 = vcmp.eq.s32.totalorder %v5641_v44, 1 }
  0x8e   :  { %7467 = vst [vmem:[#allocation16_spill] sm:$0xff] %v5651_v49  ;;  %vm7355_vm6 = vcmp.eq.s32.totalorder %v5651_v49, 1 }
  0x90   :  { %1515 = vperm.xlu0 %5464, %v5489_v2   ;;  %v5645_v46 = vpop.permute.xlu0 %149 }
  0x91   :  { %2980 = vperm.xlu1 %5465, %v5489_v2   ;;  %7464 = vst [vmem:[#allocation13_spill] sm:$0xff] %v5645_v46  ;;  %v5657_v52 = vpop.permute.xlu1 %542  ;;  %vm7362_vm5 = vcmp.eq.s32.totalorder %v5645_v46, 1 }
  0x92   :  { %7470 = vst [vmem:[#allocation19_spill] sm:$0xff] %v5657_v52  ;;  %vm7349_vm9 = vcmp.eq.s32.totalorder %v5657_v52, 1 }
  0x94   :  { %2977 = vperm.xlu0 %5464, %v5489_v2   ;;  %v5649_v48 = vpop.permute.xlu0 %539 }
  0x95   :  { %3163 = vperm.xlu1 %5465, %v5489_v2   ;;  %7466 = vst [vmem:[#allocation15_spill] sm:$0xff] %v5649_v48  ;;  %vm7350_vm8 = vcmp.eq.s32.totalorder %v5649_v48, 1 }
  0x98   :  { %3160 = vperm.xlu0 %5464, %v5489_v2  }
  0x99   :  { %2986 = vperm.xlu1 %5465, %v2975_v39  }
  0x9c   :  { %2983 = vperm.xlu0 %5464, %v5489_v2  }
  0x9d   :  { %3169 = vperm.xlu1 %5465, %v3158_v41  }
  0xa0   :  { %3166 = vperm.xlu0 %5464, %v5489_v2  }
  0xb3   :  { %v5653_v50 = vpop.trf.xlu0 }
  0xb4   :  { %7468 = vst [vmem:[#allocation17_spill] sm:$0xff] %v5653_v50  ;;  %v170_v4 = vrot.slane %v5653_v50, 6  ;;  %v105_v13 = vrot.slane %v5653_v50, 5  ;;  %v495_v30 = vrot.slane %v5653_v50, 7 }
  0xb7   :  { %v5655_v51 = vpop.trf.xlu0 }
  0xb8   :  { %7469 = vst [vmem:[#allocation18_spill] sm:$0xff] %v5655_v51  ;;  %v171_v6 = vrot.slane %v5655_v51, 6  ;;  %v106_v15 = vrot.slane %v5655_v51, 5  ;;  %v496_v41 = vrot.slane %v5655_v51, 7 }
  0xba   :  { %v185_v16 = vsel %vm178_vm10, %v170_v4, %v171_v6  ;;  %v120_v29 = vsel %vm113_vm0, %v105_v13, %v106_v15 }
  0xbb   :  { %v5659_v53 = vpop.trf.xlu0  ;;  %v5661_v54 = vpop.trf.xlu1  ;;  %v224_v27 = vsel %vm7363_vm13, %v185_v16, 0.0 }
  0xbc   :  { %7471 = vst [vmem:[#allocation20_spill] sm:$0xff] %v5659_v53  ;;  %7472 = vst [vmem:[#allocation21_spill] sm:$0xff] %v5661_v54  ;;  %v174_v55 = vrot.slane %v5661_v54, 6  ;;  %v172_v7 = vrot.slane %v5659_v53, 6  ;;  %v107_v18 = vrot.slane %v5659_v53, 5  ;;  %v109_v37 = vrot.slane %v5661_v54, 5 }
  0xbe   :  { %v184_v17 = vsel %vm178_vm10, %v171_v6, %v172_v7  ;;  %v119_v35 = vsel %vm113_vm0, %v106_v15, %v107_v18  ;;  %v4603_v15 = vld [vmem:[%s7342_s1 + $0x70] sm:$0xff] }
  0xbf   :  { %v5664_v56 = vpop.trf.xlu0  ;;  %v5666_v57 = vpop.trf.xlu1  ;;  %v225_v33 = vsel %vm7356_vm14, %v184_v17, 0.0 }
  0xc0   :  { %7473 = vst [vmem:[#allocation22_spill] sm:$0xff] %v5664_v56  ;;  %7474 = vst [vmem:[#allocation23_spill] sm:$0xff] %v5666_v57  ;;  %v173_v58 = vrot.slane %v5664_v56, 6  ;;  %v175_v59 = vrot.slane %v5666_v57, 6  ;;  %v108_v31 = vrot.slane %v5664_v56, 5  ;;  %v498_v6 = vrot.slane %v5664_v56, 7 }
  0xc2   :  { %v182_v60 = vsel %vm178_vm10, %v173_v58, %v174_v55  ;;  %v181_v62 = vsel %vm178_vm10, %v174_v55, %v175_v59  ;;  %v183_v34 = vsel %vm178_vm10, %v172_v7, %v173_v58  ;;  %v159_v55 = vsel %vm155_vm3, %v120_v29, 0.0  ;;  %v4590_v58 = vld [vmem:[%s7342_s1 + $0x48] sm:$0xff] }
  0xc3   :  { %v227_v61 = vsel %vm219_vm12, %v182_v60, 0.0  ;;  %v5679_v63 = vpop.trf.xlu1  ;;  %v228_v0 = vsel %vm7363_vm13, %v181_v62, 0.0  ;;  %v160_v60 = vsel %vm7362_vm5, %v119_v35, 0.0  ;;  %v110_v62 = vrot.slane %v5666_v57, 5 }
  0xc4   :  { %7475 = vst [vmem:[#allocation24_spill] sm:$0xff] %v5679_v63  ;;  %5072 = vmatprep.mubr.msk.f32.mxu1 %vm7412_vm11, %v227_v61  ;;  %v176_v2 = vrot.slane %v5679_v63, 6  ;;  %v118_v61 = vsel %vm113_vm0, %v107_v18, %v108_v31 }
  0xc5   :  { %5073 = vmatmul.mubr.msk.f32.vlgmr.msra.gmra.mxu1 %vm7412_vm11, %v228_v0  ;;  %v161_v7 = vsel %vm7355_vm6, %v118_v61, 0.0  ;;  %v4627_v61 = vld [vmem:[%s7342_s1 + $0xb0] sm:$0xff] }
  0xc6   :  { %5079 = vmatpush3.msra.mxu1 %v5588_v21  ;;  %v180_v8 = vsel %vm178_vm10, %v175_v59, %v176_v2  ;;  %v226_v59 = vsel %vm7354_vm15, %v183_v34, 0.0 }
  0xc7   :  { %5080 = vmatprep.subr.mxu1 %v168_v1  ;;  %v5700_v9 = vpop.trf.xlu1  ;;  %v229_v10 = vsel %vm7356_vm14, %v180_v8, 0.0 }
  0xc8   :  { %7476 = vst [vmem:[#allocation25_spill] sm:$0xff] %v5700_v9  ;;  %5081 = vmatpush3.msra.mxu1 %v168_v1  ;;  %5075 = vmatprep.mubr.msk.f32.mxu1 %vm7412_vm11, %v229_v10  ;;  %v177_v12 = vrot.slane %v5700_v9, 6  ;;  %v112_v14 = vrot.slane %v5700_v9, 5  ;;  %v502_v22 = vrot.slane %v5700_v9, 7  ;;  %v4589_v1 = vld [vmem:[%s7342_s1 + $0x40] sm:$0xff]  ;;  %v4616_v10 = vld [vmem:[%s7342_s1 + $0x98] sm:$0xff] }
  0xc9   :  { %5082 = vmatprep.subr.mxu1 %v167_v5 }
  0xca   :  { %5083 = vmatpush3.msra.mxu1 %v167_v5  ;;  %v186_v19 = vsel %vm178_vm10, %v177_v12, %v170_v4  ;;  %v179_v20 = vsel %vm178_vm10, %v176_v2, %v177_v12  ;;  %v121_v21 = vsel %vm113_vm0, %v112_v14, %v105_v13  ;;  %v511_v39 = vsel %vm7353_vm2, %v502_v22, %v495_v30 }
  0xcb   :  { %5084 = vmatprep.subr.mxu1 %v166_v11  ;;  %v223_v24 = vsel %vm219_vm12, %v186_v19, 0.0  ;;  %v230_v25 = vsel %vm7354_vm15, %v179_v20, 0.0  ;;  %v158_v26 = vsel %vm154_vm1, %v121_v21, 0.0  ;;  %v548_v0 = vsel %vm7352_vm4, %v511_v39, 0.0 }
  0xcc   :  { %5085 = vmatpush3.msra.mxu1 %v166_v11  ;;  %5066 = vmatprep.mubr.msk.f32.mxu0 %vm7412_vm11, %v223_v24  ;;  %v117_v2 = vsel %vm113_vm0, %v108_v31, %v109_v37  ;;  %v111_v4 = vrot.slane %v5679_v63, 5  ;;  %v510_v5 = vsel %vm7353_vm2, %v495_v30, %v496_v41  ;;  %v499_v11 = vrot.slane %v5661_v54, 7  ;;  %v4615_v30 = vld [vmem:[%s7342_s1 + $0x90] sm:$0xff] }
  0xcd   :  { %5076 = vmatmul.mubr.msk.f32.gmra.mxu1 %vm7412_vm11, %v230_v25  ;;  %5067 = vmatmul.mubr.msk.f32.vlgmr.msra.gmra.mxu0 %vm7412_vm11, %v224_v27  ;;  %v162_v12 = vsel %vm154_vm1, %v117_v2, 0.0  ;;  %v116_v13 = vsel %vm113_vm0, %v109_v37, %v110_v62  ;;  %v549_v16 = vsel %vm7351_vm7, %v510_v5, 0.0  ;;  %v500_v20 = vrot.slane %v5666_v57, 7  ;;  %v4602_v25 = vld [vmem:[%s7342_s1 + $0x68] sm:$0xff] }
  0xce   :  { %5086 = vmatprep.mubr.msk.f32.mxu1 %vm7412_vm11, %v158_v26  ;;  %5069 = vmatprep.mubr.msk.f32.mxu0 %vm7412_vm11, %v225_v33  ;;  %v115_v17 = vsel %vm113_vm0, %v110_v62, %v111_v4  ;;  %v163_v21 = vsel %vm155_vm3, %v116_v13, 0.0  ;;  %v507_v24 = vsel %vm7353_vm2, %v498_v6, %v499_v11  ;;  %v501_v26 = vrot.slane %v5679_v63, 7  ;;  %v4614_v37 = vld [vmem:[%s7342_s1 + $0x88] sm:$0xff]  ;;  %v4639_v13 = vld [vmem:[%s7342_s1 + $0xd0] sm:$0xff] }
  0xcf   :  { %5099 = vmatpush3.msra.mxu0 %v5597_v23  ;;  %v497_v23 = vrot.slane %v5659_v53, 7  ;;  %5118 = vmatprep.subr.mxu1 %v4604_v32  ;;  %v164_v27 = vsel %vm7362_vm5, %v115_v17, 0.0  ;;  %v552_v31 = vsel %vm7352_vm4, %v507_v24, 0.0 }
  0xd0   :  { %5100 = vmatprep.subr.mxu0 %v4591_v28  ;;  %v505_v34 = vsel %vm7353_vm2, %v500_v20, %v501_v26 }
  0xd1   :  { %5087 = vmatmul.mubr.msk.f32.vlgmr.msra.gmra.mxu1 %vm7412_vm11, %v159_v55  ;;  %5101 = vmatpush3.msra.mxu0 %v4591_v28  ;;  %v509_v8 = vsel %vm7353_vm2, %v496_v41, %v497_v23  ;;  %v508_v19 = vsel %vm7353_vm2, %v497_v23, %v498_v6  ;;  %v114_v28 = vsel %vm113_vm0, %v111_v4, %v112_v14  ;;  %v4601_v14 = vld [vmem:[%s7342_s1 + $0x60] sm:$0xff]  ;;  %v554_v39 = vsel %vm7350_vm8, %v505_v34, 0.0 }
  0xd2   :  { %5070 = vmatmul.mubr.msk.f32.gmra.mxu0 %vm7412_vm11, %v226_v59  ;;  %5089 = vmatprep.mubr.msk.f32.mxu1 %vm7412_vm11, %v160_v60  ;;  %v550_v18 = vsel %vm7350_vm8, %v509_v8, 0.0  ;;  %v551_v29 = vsel %vm7349_vm9, %v508_v19, 0.0  ;;  %v165_v33 = vsel %vm7355_vm6, %v114_v28, 0.0  ;;  %v504_v41 = vsel %vm7353_vm2, %v501_v26, %v502_v22  ;;  %v4613_v55 = vld [vmem:[%s7342_s1 + $0x80] sm:$0xff]  ;;  %v4640_v22 = vld [vmem:[%s7342_s1 + $0xd8] sm:$0xff] }
  0xd3   :  { %5102 = vmatprep.subr.mxu0 %v4590_v58  ;;  %5106 = vmatprep.mubr.msk.f32.mxu0 %vm7412_vm11, %v548_v0  ;;  %v555_v23 = vsel %vm7349_vm9, %v504_v41, 0.0  ;;  %v840_v59 = vrot.slane %v5653_v50, 1  ;;  %v841_v60 = vrot.slane %v5655_v51, 1  ;;  %vm7360_vm9 = vcmp.lt.s32.totalorder %v5537_v3, 7 }
  0xd4   :  { %5103 = vmatpush3.msra.mxu0 %v4590_v58  ;;  %5119 = vmatpush3.msra.mxu1 %v4604_v32  ;;  %v506_v32 = vsel %vm7353_vm2, %v499_v11, %v500_v20  ;;  %v4628_v58 = vld [vmem:[%s7342_s1 + $0xb8] sm:$0xff]  ;;  %v842_v0 = vrot.slane %v5659_v53, 1  ;;  %v843_v8 = vrot.slane %v5664_v56, 1  ;;  %v4625_v11 = vld [vmem:[%s7342_s1 + $0xa0] sm:$0xff]  ;;  %vm7421_vm2 = vcmp.lt.s32.totalorder %v5537_v3, 6 }
  0xd5   :  { %5104 = vmatprep.subr.mxu0 %v4589_v1  ;;  %5090 = vmatmul.mubr.msk.f32.gmra.mxu1 %vm7412_vm11, %v161_v7  ;;  %v553_v35 = vsel %vm7351_vm7, %v506_v32, 0.0  ;;  %v855_v4 = vsel %vm7360_vm9, %v840_v59, %v841_v60  ;;  %v1044_v19 = vrot.slane %v5655_v51, 2  ;;  %v846_v26 = vrot.slane %v5679_v63, 1 }
  0xd6   :  { %5105 = vmatpush3.msra.mxu0 %v4589_v1  ;;  %5092 = vmatprep.mubr.msk.f32.mxu1 %vm7412_vm11, %v162_v12  ;;  %v4626_v1 = vld [vmem:[%s7342_s1 + $0xa8] sm:$0xff]  ;;  %v854_v7 = vsel %vm7360_vm9, %v841_v60, %v842_v0  ;;  %v853_v17 = vsel %vm7360_vm9, %v842_v0, %v843_v8  ;;  %v1246_v41 = vrot.slane %v5653_v50, 3 }
  0xd7   :  { %5107 = vmatmul.mubr.msk.f32.vlgmr.msra.gmra.mxu0 %vm7412_vm11, %v549_v16  ;;  %5138 = vmatprep.subr.mxu0 %v4616_v10 }
  0xd8   :  { %5109 = vmatprep.mubr.msk.f32.mxu0 %vm7412_vm11, %v550_v18  ;;  %5120 = vmatprep.subr.mxu1 %v4603_v15  ;;  %v1043_v18 = vrot.slane %v5653_v50, 2 }
  0xd9   :  { %5093 = vmatmul.mubr.msk.f32.gmra.mxu1 %vm7412_vm11, %v163_v21  ;;  %5139 = vmatpush3.msra.mxu0 %v4616_v10  ;;  %v844_v10 = vrot.slane %v5661_v54, 1 }
  0xda   :  { %5095 = vmatprep.mubr.msk.f32.mxu1 %vm7412_vm11, %v164_v27  ;;  %5121 = vmatpush3.msra.mxu1 %v4603_v15  ;;  %v845_v15 = vrot.slane %v5666_v57, 1  ;;  %v1045_v27 = vrot.slane %v5659_v53, 2 }
  0xdb   :  { %5110 = vmatmul.mubr.msk.f32.gmra.mxu0 %vm7412_vm11, %v551_v29  ;;  %5122 = vmatprep.subr.mxu1 %v4602_v25  ;;  %v852_v24 = vsel %vm7360_vm9, %v843_v8, %v844_v10 }
  0xdc   :  { %5112 = vmatprep.mubr.msk.f32.mxu0 %vm7412_vm11, %v552_v31  ;;  %5123 = vmatpush3.msra.mxu1 %v4602_v25  ;;  %v4638_v25 = vld [vmem:[%s7342_s1 + $0xc8] sm:$0xff]  ;;  %v851_v29 = vsel %vm7360_vm9, %v844_v10, %v845_v15 }
  0xdd   :  { %5096 = vmatmul.mubr.msk.f32.gmra.mxu1 %vm7412_vm11, %v165_v33  ;;  %5140 = vmatprep.subr.mxu0 %v4615_v30  ;;  %v1058_v33 = vsel %vm7421_vm2, %v1043_v18, %v1044_v19 }
  0xde   :  { %5126 = vmatprep.mubr.msk.f32.mxu1 %vm7412_vm11, %v5653_v50  ;;  %5124 = vmatprep.subr.mxu1 %v4601_v14 }
  0xdf   :  { %5113 = vmatmul.mubr.msk.f32.gmra.mxu0 %vm7412_vm11, %v553_v35  ;;  %5125 = vmatpush3.msra.mxu1 %v4601_v14  ;;  %v4637_v14 = vld [vmem:[%s7342_s1 + $0xc0] sm:$0xff] }
  0xe0   :  { %5115 = vmatprep.mubr.msk.f32.mxu0 %vm7412_vm11, %v554_v39  ;;  %5141 = vmatpush3.msra.mxu0 %v4615_v30  ;;  %v847_v30 = vrot.slane %v5700_v9, 1  ;;  %v1057_v39 = vsel %vm7421_vm2, %v1044_v19, %v1045_v27  ;;  %v1250_v19 = vrot.slane %v5661_v54, 3 }
  0xe1   :  { %5127 = vmatmul.mubr.msk.f32.vlgmr.msra.gmra.mxu1 %vm7412_vm11, %v5655_v51  ;;  %5142 = vmatprep.subr.mxu0 %v4614_v37 }
  0xe2   :  { %5129 = vmatprep.mubr.msk.f32.mxu1 %vm7412_vm11, %v5659_v53  ;;  %5143 = vmatpush3.msra.mxu0 %v4614_v37  ;;  %v850_v37 = vsel %vm7360_vm9, %v845_v15, %v846_v26  ;;  %v1249_v15 = vrot.slane %v5664_v56, 3 }
  0xe3   :  { %5116 = vmatmul.mubr.msk.f32.gmra.mxu0 %vm7412_vm11, %v555_v23  ;;  %5144 = vmatprep.subr.mxu0 %v4613_v55  ;;  %v849_v23 = vsel %vm7360_vm9, %v846_v26, %v847_v30 }
  0xe4   :  { %5145 = vmatpush3.msra.mxu0 %v4613_v55  ;;  %5158 = vmatprep.subr.mxu1 %v4628_v58  ;;  %v5899_v62 = vpop.permute.xlu1 %881 }
  0xe5   :  { %7477 = vst [vmem:[#allocation26_spill] sm:$0xff] %v5899_v62  ;;  %5130 = vmatmul.mubr.msk.f32.gmra.mxu1 %vm7412_vm11, %v5664_v56  ;;  %5178 = vmatprep.subr.mxu0 %v4640_v22  ;;  %vm7357_vm8 = vcmp.eq.s32.totalorder %v5899_v62, 1 }
  0xe6   :  { %5132 = vmatprep.mubr.msk.f32.mxu1 %vm7412_vm11, %v5661_v54  ;;  %5159 = vmatpush3.msra.mxu1 %v4628_v58  ;;  %v894_v12 = vsel %vm7357_vm8, %v854_v7, 0.0  ;;  %v898_v55 = vsel %vm7357_vm8, %v850_v37, 0.0  ;;  %vm1254_vm8 = vcmp.lt.s32.totalorder %v5537_v3, 5  ;;  %v1248_v7 = vrot.slane %v5659_v53, 3 }
  0xe7   :  { %v5911_v2 = vpop.permute.xlu0 %878  ;;  %5160 = vmatprep.subr.mxu1 %v4627_v61 }
  0xe8   :  { %7478 = vst [vmem:[#allocation27_spill] sm:$0xff] %v5911_v2  ;;  %vm7358_vm7 = vcmp.eq.s32.totalorder %v5911_v2, 1  ;;  %5161 = vmatpush3.msra.mxu1 %v4627_v61  ;;  %v5918_v5 = vpop.permute.xlu1 %887 }
  0xe9   :  { %7479 = vst [vmem:[#allocation28_spill] sm:$0xff] %v5918_v5  ;;  %5133 = vmatmul.mubr.msk.f32.gmra.mxu1 %vm7412_vm11, %v5666_v57  ;;  %v893_v6 = vsel %vm7358_vm7, %v855_v4, 0.0  ;;  %5162 = vmatprep.subr.mxu1 %v4626_v1  ;;  %vm7361_vm4 = vcmp.eq.s32.totalorder %v5918_v5, 1  ;;  %v897_v32 = vsel %vm7358_vm7, %v851_v29, 0.0  ;;  %v1046_v4 = vrot.slane %v5664_v56, 2 }
  0xea   :  { %5135 = vmatprep.mubr.msk.f32.mxu1 %vm7412_vm11, %v5679_v63  ;;  %5146 = vmatprep.mubr.msk.f32.mxu0 %vm7412_vm11, %v893_v6  ;;  %v896_v28 = vsel %vm7361_vm4, %v852_v24, 0.0  ;;  %v1047_v6 = vrot.slane %v5661_v54, 2 }
  0xeb   :  { %5147 = vmatmul.mubr.msk.f32.vlgmr.msra.gmra.mxu0 %vm7412_vm11, %v894_v12  ;;  %v5942_v16 = vpop.permute.xlu0 %884  ;;  %5163 = vmatpush3.msra.mxu1 %v4626_v1  ;;  %v856_v1 = vsel %vm7360_vm9, %v847_v30, %v840_v59 }
  0xec   :  { %7480 = vst [vmem:[#allocation29_spill] sm:$0xff] %v5942_v16  ;;  %5179 = vmatpush3.msra.mxu0 %v4640_v22  ;;  %vm7359_vm15 = vcmp.eq.s32.totalorder %v5942_v16, 1  ;;  %5164 = vmatprep.subr.mxu1 %v4625_v11  ;;  %v5950_v20 = vpop.permute.xlu1 %1084  ;;  %v1247_v22 = vrot.slane %v5655_v51, 3  ;;  %v900_v8 = vsel %vm7361_vm4, %v856_v1, 0.0 }
  0xed   :  { %7481 = vst [vmem:[#allocation30_spill] sm:$0xff] %v5950_v20  ;;  %5136 = vmatmul.mubr.msk.f32.gmra.mxu1 %vm7412_vm11, %v5700_v9  ;;  %v895_v21 = vsel %vm7359_vm15, %v853_v17, 0.0  ;;  %5180 = vmatprep.subr.mxu0 %v4639_v13  ;;  %vm7419_vm6 = vcmp.eq.s32.totalorder %v5950_v20, 1  ;;  %v899_v61 = vsel %vm7359_vm15, %v849_v23, 0.0  ;;  %v1049_v17 = vrot.slane %v5679_v63, 2 }
  0xee   :  { %5149 = vmatprep.mubr.msk.f32.mxu0 %vm7412_vm11, %v895_v21  ;;  %5181 = vmatpush3.msra.mxu0 %v4639_v13  ;;  %v1097_v58 = vsel %vm7419_vm6, %v1057_v39, 0.0  ;;  %v1261_v10 = vsel %vm1254_vm8, %v1246_v41, %v1247_v22  ;;  %v1056_v13 = vsel %vm7421_vm2, %v1045_v27, %v1046_v4  ;;  %v1260_v26 = vsel %vm1254_vm8, %v1247_v22, %v1248_v7 }
  0xef   :  { %5150 = vmatmul.mubr.msk.f32.gmra.mxu0 %vm7412_vm11, %v896_v28  ;;  %v5971_v31 = vpop.permute.xlu0 %1081  ;;  %5165 = vmatpush3.msra.mxu1 %v4625_v11  ;;  %v1048_v11 = vrot.slane %v5666_v57, 2  ;;  %v1050_v27 = vrot.slane %v5700_v9, 2  ;;  %v1252_v23 = vrot.slane %v5679_v63, 3 }
  0xf0   :  { %7482 = vst [vmem:[#allocation31_spill] sm:$0xff] %v5971_v31  ;;  %vm7420_vm14 = vcmp.eq.s32.totalorder %v5971_v31, 1  ;;  %5152 = vmatprep.mubr.msk.f32.mxu0 %vm7412_vm11, %v897_v32  ;;  %5182 = vmatprep.subr.mxu0 %v4638_v25  ;;  %v5984_v34 = vpop.permute.xlu1 %1287  ;;  %v1251_v32 = vrot.slane %v5666_v57, 3 }
  0xf1   :  { %7483 = vst [vmem:[#allocation32_spill] sm:$0xff] %v5984_v34  ;;  %v1096_v35 = vsel %vm7420_vm14, %v1058_v33, 0.0  ;;  %5183 = vmatpush3.msra.mxu0 %v4638_v25  ;;  %vm7415_vm15 = vcmp.eq.s32.totalorder %v5984_v34, 1  ;;  %v1055_v25 = vsel %vm7421_vm2, %v1046_v4, %v1047_v6  ;;  %v1054_v30 = vsel %vm7421_vm2, %v1047_v6, %v1048_v11 }
  0xf2   :  { %5166 = vmatprep.mubr.msk.f32.mxu1 %vm7412_vm11, %v1096_v35  ;;  %5184 = vmatprep.subr.mxu0 %v4637_v14  ;;  %v1300_v29 = vsel %vm7415_vm15, %v1260_v26, 0.0  ;;  %v1100_v33 = vsel %vm7420_vm14, %v1054_v30, 0.0  ;;  %v1259_v35 = vsel %vm1254_vm8, %v1248_v7, %v1249_v15  ;;  %v1053_v37 = vsel %vm7421_vm2, %v1048_v11, %v1049_v17 }
  0xf3   :  { %5153 = vmatmul.mubr.msk.f32.gmra.mxu0 %vm7412_vm11, %v898_v55  ;;  %5167 = vmatmul.mubr.msk.f32.vlgmr.msra.gmra.mxu1 %vm7412_vm11, %v1097_v58  ;;  %v6003_v60 = vpop.permute.xlu0 %1284  ;;  %v1258_v55 = vsel %vm1254_vm8, %v1249_v15, %v1250_v19  ;;  %v1052_v58 = vsel %vm7421_vm2, %v1049_v17, %v1050_v27  ;;  %v1101_v22 = vsel %vm7419_vm6, %v1053_v37, 0.0  ;;  %v1257_v1 = vsel %vm1254_vm8, %v1250_v19, %v1251_v32  ;;  %v4650_v19 = vld [vmem:[%s7344_s3 + $0x8] sm:$0xff] }
  0xf4   :  { %7484 = vst [vmem:[#allocation33_spill] sm:$0xff] %v6003_v60  ;;  %vm7416_vm7 = vcmp.eq.s32.totalorder %v6003_v60, 1  ;;  %5155 = vmatprep.mubr.msk.f32.mxu0 %vm7412_vm11, %v899_v61  ;;  %5185 = vmatpush3.msra.mxu0 %v4637_v14  ;;  %v6010_v0 = vpop.permute.xlu1 %1090  ;;  %v1253_v4 = vrot.slane %v5700_v9, 3 }
  0xf5   :  { %7485 = vst [vmem:[#allocation34_spill] sm:$0xff] %v6010_v0  ;;  %vm7417_vm9 = vcmp.eq.s32.totalorder %v6010_v0, 1  ;;  %v1299_v12 = vsel %vm7416_vm7, %v1261_v10, 0.0  ;;  %v1303_v7 = vsel %vm7416_vm7, %v1257_v1, 0.0  ;;  %v1256_v10 = vsel %vm1254_vm8, %v1251_v32, %v1252_v23  ;;  %5198 = vmatprep.subr.mxu1 %v4650_v19 }
  0xf6   :  { %v1099_v28 = vsel %vm7417_vm9, %v1055_v25, 0.0  ;;  %5199 = vmatpush3.msra.mxu1 %v4650_v19  ;;  %v6132_v25 = vld [vmem:[%s7344_s3 + $0x18] sm:$0xff] }
  0xf7   :  { %5156 = vmatmul.mubr.msk.f32.gmra.mxu0 %vm7412_vm11, %v900_v8  ;;  %v6029_v59 = vpop.permute.xlu0 %1087  ;;  %v1059_v8 = vsel %vm7421_vm2, %v1050_v27, %v1043_v18  ;;  %v1262_v18 = vsel %vm1254_vm8, %v1253_v4, %v1246_v41  ;;  %v6126_v41 = vld [vmem:[%s7344_s3 + $0x10] sm:$0xff] }
  0xf8   :  { %7486 = vst [vmem:[#allocation35_spill] sm:$0xff] %v6029_v59  ;;  %vm7418_vm4 = vcmp.eq.s32.totalorder %v6029_v59, 1  ;;  %5186 = vmatprep.mubr.msk.f32.mxu0 %vm7412_vm11, %v1299_v12  ;;  %v6040_v21 = vpop.permute.xlu1 %1293  ;;  %v1103_v11 = vsel %vm7417_vm9, %v1059_v8, 0.0  ;;  %v1304_v12 = vsel %vm7415_vm15, %v1256_v10, 0.0  ;;  %5226 = vmatprep.subr.mxu1 %v6126_v41  ;;  %vm1596_vm9 = vcmask 64512  }
  0xf9   :  { %7487 = vst [vmem:[#allocation36_spill] sm:$0xff] %v6040_v21  ;;  %v1098_v24 = vsel %vm7418_vm4, %v1056_v13, 0.0  ;;  %vm7413_vm5 = vcmp.eq.s32.totalorder %v6040_v21, 1  ;;  %v1102_v6 = vsel %vm7418_vm4, %v1052_v58, 0.0  ;;  %v1255_v13 = vsel %vm1254_vm8, %v1252_v23, %v1253_v4 }
  0xfa   :  { %5169 = vmatprep.mubr.msk.f32.mxu1 %vm7412_vm11, %v1098_v24  ;;  %v1302_v61 = vsel %vm7413_vm5, %v1258_v55, 0.0  ;;  %v1306_v17 = vsel %vm7413_vm5, %v1262_v18, 0.0  ;;  %v1532_v24 = vld [vmem:[%s7344_s3] sm:$0xff] }
  0xfb   :  { %5170 = vmatmul.mubr.msk.f32.gmra.mxu1 %vm7412_vm11, %v1099_v28  ;;  %5187 = vmatmul.mubr.msk.f32.vlgmr.msra.gmra.mxu0 %vm7412_vm11, %v1300_v29  ;;  %v6060_v14 = vpop.permute.xlu0 %1290 }
  0xfc   :  { %7488 = vst [vmem:[#allocation37_spill] sm:$0xff] %v6060_v14  ;;  %vm7414_vm13 = vcmp.eq.s32.totalorder %v6060_v14, 1  ;;  %5172 = vmatprep.mubr.msk.f32.mxu1 %vm7412_vm11, %v1100_v33  ;;  %5212 = vmatprep.subr.mxu0 %v1532_v24 }
  0xfd   :  { %v1301_v39 = vsel %vm7414_vm13, %v1259_v35, 0.0  ;;  %v1305_v15 = vsel %vm7414_vm13, %v1255_v13, 0.0  ;;  %5213 = vmatpush3.msra.mxu0 %v1532_v24  ;;  %vm1541_vm13 = vcmp.lt.s32.totalorder %v5537_v3, 4 }
  0xfe   :  { %5189 = vmatprep.mubr.msk.f32.mxu0 %vm7412_vm11, %v1301_v39  ;;  %5240 = vmatprep.subr.mxu0 %v6132_v25 }
  0xff   :  { %5173 = vmatmul.mubr.msk.f32.gmra.mxu1 %vm7412_vm11, %v1101_v22  ;;  %5190 = vmatmul.mubr.msk.f32.gmra.mxu0 %vm7412_vm11, %v1302_v61  ;;  %v6143_v46 = vpop.permute.xlu0 %1571 }
 0x100   :  { %5175 = vmatprep.mubr.msk.f32.mxu1 %vm7412_vm11, %v1102_v6  ;;  %5192 = vmatprep.mubr.msk.f32.mxu0 %vm7412_vm11, %v1303_v7  ;;  %vm1582_vm5 = vcmp.eq.s32.totalorder %v6143_v46, 1 }
 0x103   :  { %5176 = vmatmul.mubr.msk.f32.gmra.mxu1 %vm7412_vm11, %v1103_v11  ;;  %5193 = vmatmul.mubr.msk.f32.gmra.mxu0 %vm7412_vm11, %v1304_v12 }
 0x104   :  { %5195 = vmatprep.mubr.msk.f32.mxu0 %vm7412_vm11, %v1305_v15 }
 0x107   :  { %5196 = vmatmul.mubr.msk.f32.gmra.mxu0 %vm7412_vm11, %v1306_v17 }
 0x185   :  { %v6135_v26 = vpop.f32.mrf.mxu1 }
 0x187   :  { %v347_v27 = vpop.f32.mrf.mxu1 }
 0x18d   :  { %v6137_v28 = vpop.f32.mrf.mxu1  ;;  %v5068_v29 = vpop.f32.mrf.mxu0 }
 0x18f   :  { %v6139_v30 = vpop.f32.mrf.mxu1  ;;  %v327_v32 = vpop.f32.mrf.mxu0 }
 0x191   :  { %v5088_v33 = vpop.f32.mrf.mxu1 }
 0x192   :  { %v5071_v35 = vpop.f32.mrf.mxu0  ;;  %v462_v14 = vadd.f32 %v5088_v33, %v5068_v29 }
 0x193   :  { %v456_v37 = vpop.f32.mrf.mxu1 }
 0x194   :  { %v337_v39 = vpop.f32.mrf.mxu0  ;;  %v457_v21 = vadd.f32 %v456_v37, %v327_v32 }
 0x195   :  { %v5091_v55 = vpop.f32.mrf.mxu1 }
 0x196   :  { %v472_v62 = vadd.f32 %v5091_v55, %v5071_v35 }
 0x197   :  { %v5108_v58 = vpop.f32.mrf.mxu0  ;;  %v466_v23 = vpop.f32.mrf.mxu1 }
 0x198   :  { %v691_v5 = vadd.f32 %v5108_v58, %v462_v14  ;;  %v467_v16 = vadd.f32 %v466_v23, %v337_v39  ;;  %v6153_v23 = vpop.permute.xlu0 %1577 }
 0x199   :  { %v651_v22 = vpop.f32.mrf.mxu0  ;;  %v5094_v61 = vpop.f32.mrf.mxu1  ;;  %vm1584_vm4 = vcmp.eq.s32.totalorder %v6153_v23, 1 }
 0x19a   :  { %v690_v0 = vadd.f32 %v651_v22, %v457_v21 }
 0x19b   :  { %v5111_v1 = vpop.f32.mrf.mxu0  ;;  %v476_v4 = vpop.f32.mrf.mxu1 }
 0x19c   :  { %v693_v44 = vadd.f32 %v5111_v1, %v472_v62  ;;  %v477_v29 = vadd.f32 %v476_v4, %v347_v27 }
 0x19d   :  { %v661_v6 = vpop.f32.mrf.mxu0  ;;  %v5097_v7 = vpop.f32.mrf.mxu1 }
 0x19e   :  { %v692_v48 = vadd.f32 %v661_v6, %v467_v16 }
 0x19f   :  { %v5114_v8 = vpop.f32.mrf.mxu0  ;;  %v486_v10 = vpop.f32.mrf.mxu1 }
 0x1a0   :  { %v487_v62 = vadd.f32 %v486_v10, %v6139_v30 }
 0x1a1   :  { %v671_v11 = vpop.f32.mrf.mxu0  ;;  %v5128_v12 = vpop.f32.mrf.mxu1 }
 0x1a2   :  { %v833_v31 = vadd.f32 %v5128_v12, %v691_v5  ;;  %v492_v5 = vadd.f32 %v5097_v7, %v6137_v28  ;;  %v694_v35 = vadd.f32 %v671_v11, %v477_v29 }
 0x1a3   :  { %v793_v13 = vpop.f32.mrf.mxu1  ;;  %v5117_v15 = vpop.f32.mrf.mxu0 }
 0x1a4   :  { %v832_v20 = vadd.f32 %v793_v13, %v690_v0  ;;  %v6145_v0 = vpop.permute.xlu1 %1574 }
 0x1a5   :  { %v5131_v18 = vpop.f32.mrf.mxu1  ;;  %v681_v19 = vpop.f32.mrf.mxu0  ;;  %vm1583_vm11 = vcmp.eq.s32.totalorder %v6145_v0, 1 }
 0x1a6   :  { %v835_v21 = vadd.f32 %v5131_v18, %v693_v44  ;;  %v696_v28 = vadd.f32 %v681_v19, %v487_v62 }
 0x1a7   :  { %v803_v17 = vpop.f32.mrf.mxu1 }
 0x1a8   :  { %v834_v32 = vadd.f32 %v803_v17, %v692_v48  ;;  %v6155_v6 = vpop.permute.xlu1 %1580 }
 0x1a9   :  { %v5134_v24 = vpop.f32.mrf.mxu1  ;;  %vm1585_vm14 = vcmp.eq.s32.totalorder %v6155_v6, 1 }
 0x1ab   :  { %v813_v9 = vpop.f32.mrf.mxu1  ;;  %v5148_v63 = vpop.f32.mrf.mxu0 }
 0x1ac   :  { %v1036_v43 = vadd.f32 %v5148_v63, %v833_v31  ;;  %v482_v63 = vadd.f32 %v5094_v61, %v6135_v26  ;;  %v836_v44 = vadd.f32 %v813_v9, %v694_v35 }
 0x1ad   :  { %v996_v57 = vpop.f32.mrf.mxu0  ;;  %v5137_v56 = vpop.f32.mrf.mxu1 }
 0x1ae   :  { %v1035_v47 = vadd.f32 %v996_v57, %v832_v20 }
 0x1af   :  { %v5151_v54 = vpop.f32.mrf.mxu0  ;;  %v823_v51 = vpop.f32.mrf.mxu1 }
 0x1b0   :  { %v1038_v20 = vadd.f32 %v5151_v54, %v835_v21  ;;  %v838_v7 = vadd.f32 %v823_v51, %v696_v28 }
 0x1b1   :  { %v1006_v53 = vpop.f32.mrf.mxu0 }
 0x1b2   :  { %v1037_v16 = vadd.f32 %v1006_v53, %v834_v32 }
 0x1b3   :  { %v6141_v50 = vpop.f32.mrf.mxu0  ;;  %v5168_v34 = vpop.f32.mrf.mxu1 }
 0x1b4   :  { %v1239_v14 = vadd.f32 %v5168_v34, %v1036_v43  ;;  %v4649_v43 = vld [vmem:[%s7343_s2] ss:$0 sm:$0xff]  ;;  %v695_v34 = vadd.f32 %v5114_v8, %v482_v63 }
 0x1b5   :  { %v1016_v60 = vpop.f32.mrf.mxu0  ;;  %v1199_v2 = vpop.f32.mrf.mxu1 }
 0x1b6   :  { %v1238_v33 = vadd.f32 %v1199_v2, %v1035_v47  ;;  %v697_v47 = vadd.f32 %v5117_v15, %v492_v5  ;;  %v1039_v30 = vadd.f32 %v1016_v60, %v836_v44  ;;  %v837_v22 = vadd.f32 %v5134_v24, %v695_v34 }
 0x1b7   :  { %v5157_v59 = vpop.f32.mrf.mxu0 }
 0x1b8   :  { %v839_v26 = vadd.f32 %v5137_v56, %v697_v47 }
 0x1b9   :  { %v1026_v52 = vpop.f32.mrf.mxu0 }
 0x1ba   :  { %v1042_v10 = vadd.f32 %v5157_v59, %v839_v26  ;;  %v1041_v15 = vadd.f32 %v1026_v52, %v838_v7 }
 0x1bb   :  { %v5171_v49 = vpop.f32.mrf.mxu1  ;;  %v5188_v40 = vpop.f32.mrf.mxu0 }
 0x1bc   :  { %v1442_v31 = vadd.f32 %v5188_v40, %v1239_v14  ;;  %v1241_v55 = vadd.f32 %v5171_v49, %v1038_v20  ;;  %v1040_v49 = vadd.f32 %v6141_v50, %v837_v22  ;;  %v6166_v50 = vpop.permute.xlu0 %1509  ;;  %v6169_v14 = vpop.permute.xlu1 %1512 }
 0x1bd   :  { %v1209_v37 = vpop.f32.mrf.mxu1  ;;  %v1402_v39 = vpop.f32.mrf.mxu0  ;;  %vm1521_vm15 = vcmp.eq.s32.totalorder %v6169_v14, 1  ;;  %vm1520_vm7 = vcmp.eq.s32.totalorder %v6166_v50, 1 }
 0x1be   :  { %v1441_v57 = vadd.f32 %v1402_v39, %v1238_v33  ;;  %v1240_v2 = vadd.f32 %v1209_v37, %v1037_v16  ;;  %v1457_v61 = vadd.f32 %v4649_v43, %v1442_v31 }
 0x1bf   :  { %v5174_v27 = vpop.f32.mrf.mxu1  ;;  %v5191_v48 = vpop.f32.mrf.mxu0 }
 0x1c0   :  { %v1456_v54 = vadd.f32 %v4649_v43, %v1441_v57  ;;  %v1444_v1 = vadd.f32 %v5191_v48, %v1241_v55  ;;  %v6160_v17 = vmax.f32 %v1457_v61, 0.0  ;;  %v1243_v19 = vadd.f32 %v5174_v27, %v1040_v49  ;;  %v6195_v55 = vpop.permute.xlu0 %1515  ;;  %v1519_v7 = vpop.permute.xlu1 %1518 }
 0x1c1   :  { %v1219_v53 = vpop.f32.mrf.mxu1  ;;  %v1412_v58 = vpop.f32.mrf.mxu0  ;;  %vm1522_vm6 = vcmp.eq.s32.totalorder %v6195_v55, 1  ;;  %vm1523_vm2 = vcmp.eq.s32.totalorder %v1519_v7, 1 }
 0x1c2   :  { %v1443_v40 = vadd.f32 %v1412_v58, %v1240_v2  ;;  %v1242_v8 = vadd.f32 %v1219_v53, %v1039_v30  ;;  %v6158_v56 = vmax.f32 %v1456_v54, 0.0  ;;  %v1459_v24 = vadd.f32 %v4649_v43, %v1444_v1 }
 0x1c3   :  { %v5177_v9 = vpop.f32.mrf.mxu1  ;;  %v5194_v4 = vpop.f32.mrf.mxu0  ;;  %v1534_v57 = vrot.slane %v6160_v17, 4  ;;  %v1473_v48 = vrot.slane %v6160_v17, 3  ;;  %v1856_v55 = vrot.slane %v6160_v17, 5 }
 0x1c4   :  { %v1458_v11 = vadd.f32 %v4649_v43, %v1443_v40  ;;  %v1245_v60 = vadd.f32 %v5177_v9, %v1042_v10  ;;  %v1446_v52 = vadd.f32 %v5194_v4, %v1243_v19  ;;  %v1533_v5 = vrot.slane %v6158_v56, 4 }
 0x1c5   :  { %v1229_v12 = vpop.f32.mrf.mxu1  ;;  %v1422_v13 = vpop.f32.mrf.mxu0  ;;  %v1472_v35 = vrot.slane %v6158_v56, 3  ;;  %v6173_v16 = vmax.f32 %v1459_v24, 0.0 }
 0x1c6   :  { %v1445_v18 = vadd.f32 %v1422_v13, %v1242_v8  ;;  %v6162_v29 = vmax.f32 %v1458_v11, 0.0  ;;  %v1244_v51 = vadd.f32 %v1229_v12, %v1041_v15  ;;  %v1461_v47 = vadd.f32 %v4649_v43, %v1446_v52  ;;  %v6260_v15 = vld [vmem:[%s7344_s3 + $0x20] sm:$0xff] }
 0x1c7   :  { %v5197_v32 = vpop.f32.mrf.mxu0  ;;  %v6189_v34 = vsel %vm1541_vm13, %v1533_v5, %v1534_v57  ;;  %v6193_v28 = vsel %vm1254_vm8, %v1472_v35, %v1473_v48  ;;  %v1536_v26 = vrot.slane %v6173_v16, 4  ;;  %v1475_v4 = vrot.slane %v6173_v16, 3 }
 0x1c8   :  { %v1460_v59 = vadd.f32 %v4649_v43, %v1445_v18  ;;  %v1448_v33 = vadd.f32 %v5197_v32, %v1245_v60  ;;  %v1535_v63 = vrot.slane %v6162_v29, 4  ;;  %v1474_v62 = vrot.slane %v6162_v29, 3  ;;  %v6265_v60 = vld [vmem:[%s7344_s3 + $0x28] sm:$0xff] }
 0x1c9   :  { %v1432_v21 = vpop.f32.mrf.mxu0  ;;  %v6222_v61 = vmax.f32 %v1461_v47, 0.0  ;;  %v1587_v10 = vsel %vm1583_vm11, %v6189_v34, 0.0  ;;  %v1525_v8 = vsel %vm1521_vm15, %v6193_v28, 0.0 }
 0x1ca   :  { %v1463_v37 = vadd.f32 %v4649_v43, %v1448_v33  ;;  %v1447_v39 = vadd.f32 %v1432_v21, %v1244_v51  ;;  %v6178_v20 = vmax.f32 %v1460_v59, 0.0  ;;  %v6205_v58 = vsel %vm1254_vm8, %v1473_v48, %v1474_v62 }
 0x1cb   :  { %v1526_v49 = vsel %vm1522_vm6, %v6205_v58, 0.0  ;;  %v6251_v12 = vsel %vm1541_vm13, %v1535_v63, %v1536_v26  ;;  %v6255_v13 = vsel %vm1254_vm8, %v1474_v62, %v1475_v4  ;;  %v1477_v51 = vrot.slane %v6222_v61, 3 }
 0x1cc   :  { %v6180_v31 = vmax.f32 %v1463_v37, 0.0  ;;  %v1462_v27 = vadd.f32 %v4649_v43, %v1447_v39  ;;  %v6201_v43 = vsel %vm1541_vm13, %v1534_v57, %v1535_v63  ;;  %v1537_v40 = vrot.slane %v6178_v20, 4 }
 0x1cd   :  { %v1476_v22 = vrot.slane %v6178_v20, 3  ;;  %v1588_v11 = vsel %vm1584_vm4, %v6201_v43, 0.0  ;;  %v1589_v59 = vsel %vm1585_vm14, %v6251_v12, 0.0  ;;  %v1527_v33 = vsel %vm1523_vm2, %v6255_v13, 0.0 }
 0x1ce   :  { %v1540_v44 = vrot.slane %v6180_v31, 4  ;;  %v1479_v2 = vrot.slane %v6180_v31, 3  ;;  %v6197_v53 = vmax.f32 %v1462_v27, 0.0  ;;  %v6271_v18 = vsel %vm1541_vm13, %v1536_v26, %v1537_v40 }
 0x1cf   :  { %v6275_v19 = vsel %vm1254_vm8, %v1475_v4, %v1476_v22  ;;  %v1590_v52 = vsel %vm1582_vm5, %v6271_v18, 0.0  ;;  %v6305_v37 = vsel %vm1254_vm8, %v1476_v22, %v1477_v51  ;;  %v1862_v39 = vrot.slane %v6180_v31, 5 }
 0x1d0   :  { %v6212_v30 = vsel %vm1541_vm13, %v1540_v44, %v1533_v5  ;;  %v6218_v54 = vsel %vm1254_vm8, %v1479_v2, %v1472_v35  ;;  %v1539_v24 = vrot.slane %v6197_v53, 4  ;;  %v1478_v32 = vrot.slane %v6197_v53, 3 }
 0x1d1   :  { %v1586_v1 = vsel %vm1582_vm5, %v6212_v30, 0.0  ;;  %v1524_v9 = vsel %vm1520_vm7, %v6218_v54, 0.0  ;;  %v2025_v5 = vrot.slane %v6180_v31, 6  ;;  %v1529_v57 = vsel %vm1521_vm15, %v6305_v37, 0.0 }
 0x1d2   :  { %5200 = vmatprep.mubr.msk.f32.mxu1 %vm1596_vm9, %v1586_v1  ;;  %5214 = vmatprep.mubr.msk.f32.mxu0 %vm1596_vm9, %v1524_v9  ;;  %v6315_v50 = vsel %vm1254_vm8, %v1477_v51, %v1478_v32  ;;  %v1855_v63 = vrot.slane %v6158_v56, 5  ;;  %v2018_v62 = vrot.slane %v6158_v56, 6  ;;  %v6339_v14 = vsel %vm1541_vm13, %v1539_v24, %v1540_v44  ;;  %v7490_v51 = vld [vmem:[#allocation13_spill] sm:$0xff] }
 0x1d3   :  { %5201 = vmatmul.mubr.msk.f32.vlgmr.msra.gmra.mxu1 %vm1596_vm9, %v1587_v10  ;;  %5215 = vmatmul.mubr.msk.f32.vlgmr.msra.gmra.mxu0 %vm1596_vm9, %v1525_v8  ;;  %v1530_v0 = vsel %vm1522_vm6, %v6315_v50, 0.0  ;;  %v6345_v48 = vsel %vm1254_vm8, %v1478_v32, %v1479_v2  ;;  %v1857_v44 = vrot.slane %v6162_v29, 5  ;;  %v2020_v2 = vrot.slane %v6162_v29, 6 }
 0x1d4   :  { %5227 = vmatpush3.msra.mxu1 %v6126_v41  ;;  %5203 = vmatprep.mubr.msk.f32.mxu1 %vm1596_vm9, %v1588_v11  ;;  %v1538_v41 = vrot.slane %v6222_v61, 4  ;;  %v6353_v23 = vsel %vm113_vm0, %v1862_v39, %v1855_v63  ;;  %v2033_v47 = vsel %vm178_vm10, %v2025_v5, %v2018_v62  ;;  %v2019_v26 = vrot.slane %v6160_v17, 6 }
 0x1d5   :  { %5217 = vmatprep.mubr.msk.f32.mxu0 %vm1596_vm9, %v1526_v49  ;;  %5241 = vmatpush3.msra.mxu0 %v6132_v25  ;;  %v1528_v25 = vsel %vm1520_vm7, %v6275_v19, 0.0  ;;  %v1531_v22 = vsel %vm1523_vm2, %v6345_v48, 0.0  ;;  %v1871_v1 = vsel %vm154_vm1, %v6353_v23, 0.0  ;;  %v2034_v9 = vsel %vm219_vm12, %v2033_v47, 0.0 }
 0x1d6   :  { %5254 = vmatprep.subr.mxu1 %v6260_v15  ;;  %5268 = vmatprep.subr.mxu0 %v6265_v60  ;;  %v6301_v21 = vsel %vm1541_vm13, %v1537_v40, %v1538_v41  ;;  %v6311_v46 = vsel %vm1541_vm13, %v1538_v41, %v1539_v24  ;;  %v1593_v40 = vsel %vm1585_vm14, %v6339_v14, 0.0  ;;  %v6377_v4 = vsel %vm113_vm0, %v1855_v63, %v1856_v55  ;;  %v6417_v63 = vld [vmem:[%s7344_s3 + $0x38] sm:$0xff] }
 0x1d7   :  { %5204 = vmatmul.mubr.msk.f32.gmra.mxu1 %vm1596_vm9, %v1589_v59  ;;  %5218 = vmatmul.mubr.msk.f32.gmra.mxu0 %vm1596_vm9, %v1527_v33  ;;  %v1591_v35 = vsel %vm1583_vm11, %v6301_v21, 0.0  ;;  %v1592_v27 = vsel %vm1584_vm4, %v6311_v46, 0.0  ;;  %v2032_v6 = vsel %vm178_vm10, %v2018_v62, %v2019_v26  ;;  %v6385_v7 = vsel %vm113_vm0, %v1856_v55, %v1857_v44  ;;  %v7492_v33 = vld [vmem:[#allocation8_spill] sm:$0xff] }
 0x1d8   :  { %5206 = vmatprep.mubr.msk.f32.mxu1 %vm1596_vm9, %v1590_v52  ;;  %5220 = vmatprep.mubr.msk.f32.mxu0 %vm1596_vm9, %v1528_v25  ;;  %v2031_v10 = vsel %vm178_vm10, %v2019_v26, %v2020_v2  ;;  %v1859_v8 = vrot.slane %v6178_v20, 5  ;;  %v2022_v11 = vrot.slane %v6178_v20, 6  ;;  %v1858_v49 = vrot.slane %v6173_v16, 5  ;;  %v7496_v26 = vld [vmem:[#allocation10_spill] sm:$0xff] }
 0x1d9   :  { %v2021_v24 = vrot.slane %v6173_v16, 6  ;;  %v1872_v32 = vsel %vm155_vm3, %v6377_v4, 0.0  ;;  %vm7489_vm11 = vcmp.eq.s32.totalorder %v5623_v36, 1  ;;  %vm7491_vm13 = vcmp.eq.s32.totalorder %v7490_v51, 1 }
 0x1da   :  { %v2035_v41 = vsel %vm7489_vm11, %v2032_v6, 0.0  ;;  %v1873_v59 = vsel %vm7491_vm13, %v6385_v7, 0.0  ;;  %vm7493_vm14 = vcmp.eq.s32.totalorder %v7492_v33, 1  ;;  %v6407_v25 = vsel %vm113_vm0, %v1857_v44, %v1858_v49  ;;  %vm7498_vm4 = vmmov %vm7489_vm11 }
 0x1db   :  { %5207 = vmatmul.mubr.msk.f32.gmra.mxu1 %vm1596_vm9, %v1591_v35  ;;  %5221 = vmatmul.mubr.msk.f32.gmra.mxu0 %vm1596_vm9, %v1529_v57  ;;  %v2036_v52 = vsel %vm7493_vm14, %v2031_v10, 0.0  ;;  %v2030_v35 = vsel %vm178_vm10, %v2020_v2, %v2021_v24  ;;  %v4703_v57 = vld [vmem:[%s7344_s3 + $0x30] sm:$0xff]  ;;  %v6423_v62 = vsel %vm113_vm0, %v1858_v49, %v1859_v8  ;;  %v2024_v47 = vrot.slane %v6197_v53, 6  ;;  %vm7499_vm5 = vmmov %vm7491_vm13 }
 0x1dc   :  { %5209 = vmatprep.mubr.msk.f32.mxu1 %vm1596_vm9, %v1592_v27  ;;  %5223 = vmatprep.mubr.msk.f32.mxu0 %vm1596_vm9, %v1530_v0  ;;  %v2029_v27 = vsel %vm178_vm10, %v2021_v24, %v2022_v11  ;;  %v1861_v0 = vrot.slane %v6197_v53, 5  ;;  %v1860_v44 = vrot.slane %v6222_v61, 5  ;;  %v2023_v2 = vrot.slane %v6222_v61, 6  ;;  %vm7500_vm6 = vmmov %vm7493_vm14 }
 0x1dd   :  { %vm7497_vm2 = vcmp.eq.s32.totalorder %v7496_v26, 1  ;;  %v2188_v49 = vrot.slane %v6180_v31, 7  ;;  %v2181_v24 = vrot.slane %v6158_v56, 7  ;;  %vm7501_vm7 = vcmp.lt.s32.totalorder %v5537_v3, 1 }
 0x1de   :  { %v6456_v6 = vsel %vm113_vm0, %v1860_v44, %v1861_v0  ;;  %v2027_v10 = vsel %vm178_vm10, %v2023_v2, %v2024_v47  ;;  %vm7503_vm13 = vmmov %vm7497_vm2 }
 0x1df   :  { %5210 = vmatmul.mubr.msk.f32.gmra.mxu1 %vm1596_vm9, %v1593_v40  ;;  %5224 = vmatmul.mubr.msk.f32.gmra.mxu0 %vm1596_vm9, %v1531_v22  ;;  %v2037_v40 = vsel %vm7497_vm2, %v2030_v35, 0.0  ;;  %v1875_v22 = vsel %vm154_vm1, %v6423_v62, 0.0  ;;  %v2196_v35 = vsel %vm7501_vm7, %v2188_v49, %v2181_v24  ;;  %vm7507_vm2 = vmmov %vm7501_vm7 }
 0x1e0   :  { %5228 = vmatprep.mubr.msk.f32.mxu1 %vm1596_vm9, %v1871_v1  ;;  %5242 = vmatprep.mubr.msk.f32.mxu0 %vm1596_vm9, %v2034_v9  ;;  %v6448_v1 = vsel %vm113_vm0, %v1859_v8, %v1860_v44  ;;  %v2028_v9 = vsel %vm178_vm10, %v2022_v11, %v2023_v2  ;;  %v2182_v44 = vrot.slane %v6160_v17, 7 }
 0x1e1   :  { %v1876_v8 = vsel %vm155_vm3, %v6448_v1, 0.0  ;;  %v2039_v11 = vsel %vm7498_vm4, %v2028_v9, 0.0 }
 0x1e3   :  { %5229 = vmatmul.mubr.msk.f32.vlgmr.msra.gmra.mxu1 %vm1596_vm9, %v1872_v32  ;;  %5243 = vmatmul.mubr.msk.f32.vlgmr.msra.gmra.mxu0 %vm1596_vm9, %v2035_v41  ;;  %v1877_v32 = vsel %vm7499_vm5, %v6456_v6, 0.0  ;;  %v2040_v41 = vsel %vm7500_vm6, %v2027_v10, 0.0  ;;  %v7510_v10 = vld [vmem:[#allocation15_spill] sm:$0xff]  ;;  %vm7512_vm6 = vmmov %vm7507_vm2 }
 0x1e4   :  { %5255 = vmatpush3.msra.mxu1 %v6260_v15  ;;  %5231 = vmatprep.mubr.msk.f32.mxu1 %vm1596_vm9, %v1873_v59  ;;  %v7494_v15 = vld [vmem:[#allocation16_spill] sm:$0xff]  ;;  %v6478_v59 = vsel %vm113_vm0, %v1861_v0, %v1862_v39  ;;  %vm7511_vm5 = vcmp.eq.s32.totalorder %v7510_v10, 1  ;;  %v2490_v10 = vrot.slane %v6180_v31, 1 }
 0x1e5   :  { %5245 = vmatprep.mubr.msk.f32.mxu0 %vm1596_vm9, %v2036_v52  ;;  %5269 = vmatpush3.msra.mxu0 %v6265_v60  ;;  %vm7495_vm15 = vcmp.eq.s32.totalorder %v7494_v15, 1  ;;  %v2038_v60 = vsel %vm219_vm12, %v2029_v27, 0.0  ;;  %v2026_v52 = vsel %vm178_vm10, %v2024_v47, %v2025_v5  ;;  %v2183_v27 = vrot.slane %v6162_v29, 7  ;;  %v7504_v5 = vld [vmem:[#allocation11_spill] sm:$0xff] }
 0x1e6   :  { %v1874_v55 = vsel %vm7495_vm15, %v6407_v25, 0.0  ;;  %5282 = vmatprep.subr.mxu1 %v4703_v57  ;;  %5296 = vmatprep.subr.mxu0 %v6417_v63  ;;  %vm7502_vm11 = vmmov %vm7495_vm15  ;;  %v2041_v0 = vsel %vm7503_vm13, %v2026_v52, 0.0  ;;  %vm7505_vm14 = vcmp.eq.s32.totalorder %v7504_v5, 1  ;;  %v2186_v52 = vrot.slane %v6222_v61, 7 }
 0x1e7   :  { %5232 = vmatmul.mubr.msk.f32.gmra.mxu1 %vm1596_vm9, %v1874_v55  ;;  %5246 = vmatmul.mubr.msk.f32.gmra.mxu0 %vm1596_vm9, %v2037_v40  ;;  %v1878_v39 = vsel %vm7502_vm11, %v6478_v59, 0.0  ;;  %v2197_v47 = vsel %vm7505_vm14, %v2196_v35, 0.0  ;;  %vm7506_vm15 = vmmov %vm7501_vm7  ;;  %v2194_v55 = vsel %vm7507_vm2, %v2182_v44, %v2183_v27  ;;  %v2185_v40 = vrot.slane %v6178_v20, 7 }
 0x1e8   :  { %5234 = vmatprep.mubr.msk.f32.mxu1 %vm1596_vm9, %v1875_v22  ;;  %5248 = vmatprep.mubr.msk.f32.mxu0 %vm1596_vm9, %v2038_v60  ;;  %v2195_v2 = vsel %vm7506_vm15, %v2181_v24, %v2182_v44  ;;  %v2184_v22 = vrot.slane %v6173_v16, 7  ;;  %v7508_v60 = vld [vmem:[#allocation14_spill] sm:$0xff]  ;;  %v4721_v24 = vld [vmem:[%s7344_s3 + $0x40] sm:$0xff]  ;;  %vm7513_vm7 = vmmov %vm7507_vm2  ;;  %v2187_v35 = vrot.slane %v6197_v53, 7 }
 0x1e9   :  { %vm7509_vm4 = vcmp.eq.s32.totalorder %v7508_v60, 1  ;;  %vm7516_vm13 = vmmov %vm7507_vm2 }
 0x1ea   :  { %v2198_v9 = vsel %vm7509_vm4, %v2195_v2, 0.0  ;;  %vm7517_vm15 = vmmov %vm7507_vm2 }
 0x1eb   :  { %5235 = vmatmul.mubr.msk.f32.gmra.mxu1 %vm1596_vm9, %v1876_v8  ;;  %5249 = vmatmul.mubr.msk.f32.gmra.mxu0 %vm1596_vm9, %v2039_v11  ;;  %v2199_v8 = vsel %vm7511_vm5, %v2194_v55, 0.0  ;;  %v2193_v11 = vsel %vm7512_vm6, %v2183_v27, %v2184_v22  ;;  %v7514_v27 = vld [vmem:[#allocation19_spill] sm:$0xff]  ;;  %vm7518_vm2 = vmmov %vm7509_vm4 }
 0x1ec   :  { %5237 = vmatprep.mubr.msk.f32.mxu1 %vm1596_vm9, %v1877_v32  ;;  %5251 = vmatprep.mubr.msk.f32.mxu0 %vm1596_vm9, %v2040_v41  ;;  %v6523_v32 = vld [vmem:[%s7344_s3 + $0x48] sm:$0xff]  ;;  %v2192_v41 = vsel %vm7513_vm7, %v2184_v22, %v2185_v40  ;;  %vm7515_vm11 = vcmp.eq.s32.totalorder %v7514_v27, 1  ;;  %vm7519_vm4 = vmmov %vm7512_vm6  ;;  %v2647_v22 = vrot.slane %v6160_v17, 2  ;;  %vm7520_vm6 = vcmp.lt.s32.totalorder %v5537_v3, 7 }
 0x1ed   :  { %v2200_v44 = vsel %vm7515_vm11, %v2193_v11, 0.0  ;;  %v2189_v55 = vsel %vm7519_vm4, %v2187_v35, %v2188_v49  ;;  %v2648_v11 = vrot.slane %v6162_v29, 2  ;;  %vm7521_vm7 = vcmp.lt.s32.totalorder %v5537_v3, 6  ;;  %vm7528_vm4 = vmmov %vm7520_vm6 }
 0x1ef   :  { %5238 = vmatmul.mubr.msk.f32.gmra.mxu1 %vm1596_vm9, %v1878_v39  ;;  %5252 = vmatmul.mubr.msk.f32.gmra.mxu0 %vm1596_vm9, %v2041_v0  ;;  %v2201_v39 = vsel %vm7505_vm14, %v2192_v41, 0.0  ;;  %v7423_v0 = vrot.slane %v6158_v56, 1  ;;  %v2204_v41 = vsel %vm7515_vm11, %v2189_v55, 0.0 }
 0x1f0   :  { %5256 = vmatprep.mubr.msk.f32.mxu1 %vm1596_vm9, %v2197_v47  ;;  %5270 = vmatprep.mubr.msk.f32.mxu0 %vm1596_vm9, %v6158_v56  ;;  %v7422_v47 = vrot.slane %v6158_v56, 2 }
 0x1f2   :  { %v2660_v49 = vsel %vm7521_vm7, %v7422_v47, %v2647_v22 }
 0x1f3   :  { %5257 = vmatmul.mubr.msk.f32.vlgmr.msra.gmra.mxu1 %vm1596_vm9, %v2198_v9  ;;  %5271 = vmatmul.mubr.msk.f32.vlgmr.msra.gmra.mxu0 %vm1596_vm9, %v6160_v17  ;;  %v2485_v9 = vrot.slane %v6162_v29, 1 }
 0x1f4   :  { %5283 = vmatpush3.msra.mxu1 %v4703_v57  ;;  %5259 = vmatprep.mubr.msk.f32.mxu1 %vm1596_vm9, %v2199_v8  ;;  %v2191_v57 = vsel %vm7516_vm13, %v2185_v40, %v2186_v52  ;;  %v2484_v40 = vrot.slane %v6160_v17, 1  ;;  %vm7522_vm13 = vmmov %vm7520_vm6 }
 0x1f5   :  { %5273 = vmatprep.mubr.msk.f32.mxu0 %vm1596_vm9, %v6162_v29  ;;  %5297 = vmatpush3.msra.mxu0 %v6417_v63  ;;  %v2190_v63 = vsel %vm7517_vm15, %v2186_v52, %v2187_v35  ;;  %v2202_v2 = vsel %vm7518_vm2, %v2191_v57, 0.0  ;;  %v2486_v29 = vrot.slane %v6173_v16, 1  ;;  %v2649_v35 = vrot.slane %v6173_v16, 2  ;;  %vm7527_vm2 = vmmov %vm7521_vm7 }
 0x1f6   :  { %5310 = vmatprep.subr.mxu1 %v4721_v24  ;;  %5324 = vmatprep.subr.mxu0 %v6523_v32  ;;  %v2203_v8 = vsel %vm7511_vm5, %v2190_v63, 0.0  ;;  %v2497_v17 = vsel %vm7520_vm6, %v7423_v0, %v2484_v40  ;;  %v2496_v52 = vsel %vm7522_vm13, %v2484_v40, %v2485_v9  ;;  %v2650_v57 = vrot.slane %v6178_v20, 2  ;;  %vm7531_vm6 = vmmov %vm7527_vm2 }
 0x1f7   :  { %5260 = vmatmul.mubr.msk.f32.gmra.mxu1 %vm1596_vm9, %v2200_v44  ;;  %5274 = vmatmul.mubr.msk.f32.gmra.mxu0 %vm1596_vm9, %v6173_v16  ;;  %v2487_v44 = vrot.slane %v6178_v20, 1  ;;  %v2659_v40 = vsel %vm7527_vm2, %v2647_v22, %v2648_v11  ;;  %v2495_v16 = vsel %vm7528_vm4, %v2485_v9, %v2486_v29  ;;  %v2488_v22 = vrot.slane %v6222_v61, 1  ;;  %vm7536_vm13 = vmmov %vm7528_vm4 }
 0x1f8   :  { %5262 = vmatprep.mubr.msk.f32.mxu1 %vm1596_vm9, %v2201_v39  ;;  %5276 = vmatprep.mubr.msk.f32.mxu0 %vm1596_vm9, %v6178_v20  ;;  %v7523_v39 = vld [vmem:[#allocation27_spill] sm:$0xff]  ;;  %v7529_v20 = vld [vmem:[#allocation26_spill] sm:$0xff]  ;;  %v2651_v9 = vrot.slane %v6222_v61, 2 }
 0x1f9   :  { %vm7524_vm14 = vcmp.eq.s32.totalorder %v7523_v39, 1  ;;  %vm7530_vm5 = vcmp.eq.s32.totalorder %v7529_v20, 1 }
 0x1fa   :  { %v2499_v63 = vsel %vm7524_vm14, %v2497_v17, 0.0  ;;  %v7532_v17 = vld [vmem:[#allocation30_spill] sm:$0xff]  ;;  %vm7537_vm14 = vmmov %vm7527_vm2 }
 0x1fb   :  { %5263 = vmatmul.mubr.msk.f32.gmra.mxu1 %vm1596_vm9, %v2202_v2  ;;  %5277 = vmatmul.mubr.msk.f32.gmra.mxu0 %vm1596_vm9, %v6222_v61  ;;  %v7525_v2 = vld [vmem:[#allocation31_spill] sm:$0xff]  ;;  %vm7533_vm7 = vcmp.eq.s32.totalorder %v7532_v17, 1  ;;  %vm7540_vm2 = vmmov %vm7528_vm4 }
 0x1fc   :  { %5265 = vmatprep.mubr.msk.f32.mxu1 %vm1596_vm9, %v2203_v8  ;;  %5279 = vmatprep.mubr.msk.f32.mxu0 %vm1596_vm9, %v6197_v53  ;;  %vm7526_vm15 = vcmp.eq.s32.totalorder %v7525_v2, 1  ;;  %v2500_v8 = vsel %vm7530_vm5, %v2496_v52, 0.0  ;;  %v2663_v47 = vsel %vm7533_vm7, %v2659_v40, 0.0  ;;  %v2494_v52 = vsel %vm7536_vm13, %v2486_v29, %v2487_v44  ;;  %v4739_v40 = vld [vmem:[%s7344_s3 + $0x50] sm:$0xff]  ;;  %vm7541_vm4 = vmmov %vm7531_vm6 }
 0x1fd   :  { %v2662_v55 = vsel %vm7526_vm15, %v2660_v49, 0.0  ;;  %v7534_v49 = vld [vmem:[#allocation29_spill] sm:$0xff]  ;;  %v7538_v61 = vld [vmem:[#allocation35_spill] sm:$0xff]  ;;  %v2493_v29 = vsel %vm7540_vm2, %v2487_v44, %v2488_v22  ;;  %vm7546_vm7 = vcmp.eq.s32.totalorder %v7523_v39, 1  ;;  %vm7548_vm13 = vmmov %vm7540_vm2 }
 0x1fe   :  { %vm7535_vm11 = vcmp.eq.s32.totalorder %v7534_v49, 1  ;;  %vm7539_vm15 = vcmp.eq.s32.totalorder %v7538_v61, 1  ;;  %v2503_v44 = vsel %vm7546_vm7, %v2493_v29, 0.0  ;;  %vm7555_vm7 = vcmp.eq.s32.totalorder %v7538_v61, 1 }
 0x1ff   :  { %5266 = vmatmul.mubr.msk.f32.gmra.mxu1 %vm1596_vm9, %v2204_v41  ;;  %5280 = vmatmul.mubr.msk.f32.gmra.mxu0 %vm1596_vm9, %v6180_v31  ;;  %v2658_v41 = vsel %vm7531_vm6, %v2648_v11, %v2649_v35  ;;  %v2501_v0 = vsel %vm7535_vm11, %v2495_v16, 0.0  ;;  %v2657_v11 = vsel %vm7537_vm14, %v2649_v35, %v2650_v57  ;;  %v6616_v16 = vpop.permute.xlu0 %2977  ;;  %v2656_v35 = vsel %vm7541_vm4, %v2650_v57, %v2651_v9  ;;  %vm7549_vm14 = vmmov %vm7541_vm4 }
 0x200   :  { %5284 = vmatprep.mubr.msk.f32.mxu1 %vm1596_vm9, %v2499_v63  ;;  %5298 = vmatprep.mubr.msk.f32.mxu0 %vm1596_vm9, %v2662_v55  ;;  %v2489_v63 = vrot.slane %v6197_v53, 1  ;;  %v2652_v55 = vrot.slane %v6197_v53, 2  ;;  %v2981_v53 = vpop.permute.xlu1 %2980  ;;  %vm7547_vm11 = vcmp.eq.s32.totalorder %v7525_v2, 1 }
 0x202   :  { %v2492_v57 = vsel %vm7548_vm13, %v2488_v22, %v2489_v63 }
 0x203   :  { %5285 = vmatmul.mubr.msk.f32.vlgmr.msra.gmra.mxu1 %vm1596_vm9, %v2500_v8  ;;  %5299 = vmatmul.mubr.msk.f32.vlgmr.msra.gmra.mxu0 %vm1596_vm9, %v2663_v47  ;;  %v2664_v47 = vsel %vm7539_vm15, %v2658_v41, 0.0  ;;  %v7542_v8 = vld [vmem:[#allocation28_spill] sm:$0xff]  ;;  %v2653_v41 = vrot.slane %v6180_v31, 2  ;;  %vm7550_vm15 = vmmov %vm7540_vm2 }
 0x204   :  { %5311 = vmatpush3.msra.mxu1 %v4721_v24  ;;  %5287 = vmatprep.mubr.msk.f32.mxu1 %vm1596_vm9, %v2501_v0  ;;  %vm7543_vm5 = vcmp.eq.s32.totalorder %v7542_v8, 1  ;;  %v7544_v24 = vld [vmem:[#allocation34_spill] sm:$0xff]  ;;  %v2491_v31 = vsel %vm7550_vm15, %v2489_v63, %v2490_v10  ;;  %vm7551_vm2 = vmmov %vm7541_vm4  ;;  %vm7552_vm4 = vcmp.eq.s32.totalorder %v7529_v20, 1  ;;  %vm7560_vm15 = vcmp.eq.s32.totalorder %v7542_v8, 1 }
 0x205   :  { %5301 = vmatprep.mubr.msk.f32.mxu0 %vm1596_vm9, %v2664_v47  ;;  %5325 = vmatpush3.msra.mxu0 %v6523_v32  ;;  %v2502_v27 = vsel %vm7543_vm5, %v2494_v52, 0.0  ;;  %vm7545_vm6 = vcmp.eq.s32.totalorder %v7544_v24, 1  ;;  %v2666_v32 = vsel %vm7547_vm11, %v2656_v35, 0.0  ;;  %v2655_v52 = vsel %vm7549_vm14, %v2651_v9, %v2652_v55  ;;  %vm7557_vm11 = vmmov %vm7548_vm13 }
 0x206   :  { %v2665_v0 = vsel %vm7545_vm6, %v2657_v11, 0.0  ;;  %5338 = vmatprep.subr.mxu1 %v4739_v40  ;;  %v6649_v11 = vpop.permute.xlu0 %3160  ;;  %v2504_v47 = vsel %vm7552_vm4, %v2492_v57, 0.0  ;;  %vm7553_vm5 = vcmp.eq.s32.totalorder %v7532_v17, 1  ;;  %vm7554_vm6 = vcmp.eq.s32.totalorder %v7534_v49, 1  ;;  %vm7559_vm13 = vmmov %vm7551_vm2 }
 0x207   :  { %5288 = vmatmul.mubr.msk.f32.gmra.mxu1 %vm1596_vm9, %v2502_v27  ;;  %5302 = vmatmul.mubr.msk.f32.gmra.mxu0 %vm1596_vm9, %v2665_v0  ;;  %v2654_v27 = vsel %vm7551_vm2, %v2652_v55, %v2653_v41  ;;  %v2667_v22 = vsel %vm7553_vm5, %v2655_v52, 0.0  ;;  %v2505_v9 = vsel %vm7554_vm6, %v2491_v31, 0.0  ;;  %v7556_v55 = vrot.slane %v6158_v56, 1 }
 0x208   :  { %5290 = vmatprep.mubr.msk.f32.mxu1 %vm1596_vm9, %v2503_v44  ;;  %5304 = vmatprep.mubr.msk.f32.mxu0 %vm1596_vm9, %v2666_v32  ;;  %v2668_v63 = vsel %vm7555_vm7, %v2654_v27, 0.0  ;;  %v7558_v35 = vrot.slane %v6158_v56, 2  ;;  %v6669_v44 = vpop.permute.xlu1 %3163  ;;  %vm2988_vm14 = vcmp.eq.s32.totalorder %v6616_v16, 1  ;;  %vm7561_vm2 = vcmp.eq.s32.totalorder %v7544_v24, 1  ;;  %v7562_v56 = vld [vmem:[#allocation33_spill] sm:$0xff] }
 0x209   :  { %v2498_v29 = vsel %vm7557_vm11, %v2490_v10, %v7556_v55  ;;  %vm7563_vm4 = vcmp.eq.s32.totalorder %v7562_v56, 1  ;;  %vm2989_vm5 = vcmp.eq.s32.totalorder %v2981_v53, 1 }
 0x20a   :  { %v2661_v0 = vsel %vm7559_vm13, %v2653_v41, %v7558_v35  ;;  %v2506_v32 = vsel %vm7560_vm15, %v2498_v29, 0.0  ;;  %v2809_v10 = vsel %vm7563_vm4, %v6193_v28, 0.0  ;;  %v2992_v41 = vsel %vm2988_vm14, %v6189_v34, 0.0  ;;  %v2984_v52 = vpop.permute.xlu0 %2983  ;;  %v7566_v34 = vld [vmem:[#allocation37_spill] sm:$0xff] }
 0x20b   :  { %5291 = vmatmul.mubr.msk.f32.gmra.mxu1 %vm1596_vm9, %v2504_v47  ;;  %5305 = vmatmul.mubr.msk.f32.gmra.mxu0 %vm1596_vm9, %v2667_v22  ;;  %v2669_v57 = vsel %vm7561_vm2, %v2661_v0, 0.0  ;;  %v2993_v27 = vsel %vm2989_vm5, %v6201_v43, 0.0  ;;  %v7564_v47 = vld [vmem:[#allocation32_spill] sm:$0xff]  ;;  %vm2990_vm7 = vcmp.eq.s32.totalorder %v2984_v52, 1  ;;  %vm7567_vm11 = vcmp.eq.s32.totalorder %v7566_v34, 1  ;;  %vm7570_vm2 = vmmov %vm7563_vm4 }
 0x20c   :  { %5293 = vmatprep.mubr.msk.f32.mxu1 %vm1596_vm9, %v2505_v9  ;;  %5307 = vmatprep.mubr.msk.f32.mxu0 %vm1596_vm9, %v2668_v63  ;;  %v2987_v31 = vpop.permute.xlu1 %2986  ;;  %vm7565_vm6 = vcmp.eq.s32.totalorder %v7564_v47, 1  ;;  %v2811_v28 = vsel %vm7567_vm11, %v6255_v13, 0.0  ;;  %v2994_v9 = vsel %vm2990_vm7, %v6251_v12, 0.0  ;;  %v7568_v43 = vld [vmem:[#allocation36_spill] sm:$0xff]  ;;  %v2813_v13 = vsel %vm7570_vm2, %v6305_v37, 0.0 }
 0x20d   :  { %v2810_v22 = vsel %vm7565_vm6, %v6205_v58, 0.0  ;;  %vm2991_vm13 = vcmp.eq.s32.totalorder %v2987_v31, 1  ;;  %vm7569_vm15 = vcmp.eq.s32.totalorder %v7568_v43, 1  ;;  %v2996_v12 = vsel %vm2988_vm14, %v6301_v21, 0.0  ;;  %vm7571_vm4 = vmmov %vm7565_vm6 }
 0x20e   :  { %v2812_v58 = vsel %vm7569_vm15, %v6275_v19, 0.0  ;;  %v2995_v63 = vsel %vm2991_vm13, %v6271_v18, 0.0  ;;  %v2814_v18 = vsel %vm7571_vm4, %v6315_v50, 0.0  ;;  %v2997_v19 = vsel %vm2989_vm5, %v6311_v46, 0.0  ;;  %vm7572_vm6 = vmmov %vm7567_vm11 }
 0x20f   :  { %5294 = vmatmul.mubr.msk.f32.gmra.mxu1 %vm1596_vm9, %v2506_v32  ;;  %5308 = vmatmul.mubr.msk.f32.gmra.mxu0 %vm1596_vm9, %v2669_v57  ;;  %v2815_v37 = vsel %vm7572_vm6, %v6345_v48, 0.0  ;;  %v2998_v21 = vsel %vm2990_vm7, %v6339_v14, 0.0  ;;  %vm3171_vm14 = vcmp.eq.s32.totalorder %v6649_v11, 1  ;;  %vm7573_vm5 = vmmov %vm7569_vm15  ;;  %v2999_v50 = vsel %vm2991_vm13, %v6212_v30, 0.0 }
 0x210   :  { %5312 = vmatprep.mubr.msk.f32.mxu1 %vm1596_vm9, %v2809_v10  ;;  %5326 = vmatprep.mubr.msk.f32.mxu0 %vm1596_vm9, %v2992_v41  ;;  %v2816_v46 = vsel %vm7573_vm5, %v6218_v54, 0.0  ;;  %v3175_v14 = vsel %vm3171_vm14, %v6377_v4, 0.0  ;;  %vm3172_vm7 = vcmp.eq.s32.totalorder %v6669_v44, 1  ;;  %v3170_v48 = vpop.permute.xlu1 %3169  ;;  %v3179_v4 = vsel %vm3171_vm14, %v6448_v1, 0.0  ;;  %v3369_v1 = vld [vmem:[%s7346_s5] sm:$0xff] }
 0x211   :  { %v3176_v54 = vsel %vm3172_vm7, %v6385_v7, 0.0  ;;  %vm3174_vm13 = vcmp.eq.s32.totalorder %v3170_v48, 1  ;;  %v3180_v53 = vsel %vm3172_vm7, %v6456_v6, 0.0  ;;  %v6769_v6 = vld [vmem:[%s7346_s5 + $0x10] sm:$0xff] }
 0x212   :  { %v3178_v16 = vsel %vm3174_vm13, %v6423_v62, 0.0  ;;  %v4749_v62 = vld [vmem:[%s7346_s5 + $0x8] sm:$0xff]  ;;  %7574 = vst [vmem:[#allocation38_spill] sm:$0xff] %v6769_v6 }
 0x213   :  { %5313 = vmatmul.mubr.msk.f32.vlgmr.msra.gmra.mxu1 %vm1596_vm9, %v2810_v22  ;;  %5327 = vmatmul.mubr.msk.f32.vlgmr.msra.gmra.mxu0 %vm1596_vm9, %v2993_v27 }
 0x214   :  { %5339 = vmatpush3.msra.mxu1 %v4739_v40  ;;  %5315 = vmatprep.mubr.msk.f32.mxu1 %vm1596_vm9, %v2811_v28  ;;  %v3167_v40 = vpop.permute.xlu0 %3166 }
 0x215   :  { %5329 = vmatprep.mubr.msk.f32.mxu0 %vm1596_vm9, %v2994_v9  ;;  %vm3173_vm11 = vcmp.eq.s32.totalorder %v3167_v40, 1  ;;  %5352 = vmatprep.subr.mxu0 %v4749_v62 }
 0x216   :  { %v3177_v30 = vsel %vm3173_vm11, %v6407_v25, 0.0  ;;  %v3181_v7 = vsel %vm3173_vm11, %v6478_v59, 0.0  ;;  %v3182_v25 = vsel %vm3174_vm13, %v6353_v23, 0.0  ;;  %5353 = vmatpush3.msra.mxu0 %v4749_v62  ;;  %5366 = vmatprep.subr.mxu1 %v3369_v1  ;;  %v6775_v23 = vld [vmem:[%s7346_s5 + $0x18] sm:$0xff] }
 0x217   :  { %5316 = vmatmul.mubr.msk.f32.gmra.mxu1 %vm1596_vm9, %v2812_v58  ;;  %5330 = vmatmul.mubr.msk.f32.gmra.mxu0 %vm1596_vm9, %v2995_v63  ;;  %7575 = vst [vmem:[#allocation39_spill] sm:$0xff] %v6775_v23 }
 0x218   :  { %5318 = vmatprep.mubr.msk.f32.mxu1 %vm1596_vm9, %v2813_v13  ;;  %5332 = vmatprep.mubr.msk.f32.mxu0 %vm1596_vm9, %v2996_v12 }
 0x219   :  { %5380 = vmatprep.subr.mxu0 %v6769_v6 }
 0x21b   :  { %5319 = vmatmul.mubr.msk.f32.gmra.mxu1 %vm1596_vm9, %v2814_v18  ;;  %5333 = vmatmul.mubr.msk.f32.gmra.mxu0 %vm1596_vm9, %v2997_v19 }
 0x21c   :  { %5321 = vmatprep.mubr.msk.f32.mxu1 %vm1596_vm9, %v2815_v37  ;;  %5335 = vmatprep.mubr.msk.f32.mxu0 %vm1596_vm9, %v2998_v21 }
 0x21f   :  { %5322 = vmatmul.mubr.msk.f32.gmra.mxu1 %vm1596_vm9, %v2816_v46  ;;  %5336 = vmatmul.mubr.msk.f32.gmra.mxu0 %vm1596_vm9, %v2999_v50 }
 0x220   :  { %5340 = vmatprep.mubr.msk.f32.mxu1 %vm1596_vm9, %v3175_v14 }
 0x223   :  { %5341 = vmatmul.mubr.msk.f32.vlgmr.msra.gmra.mxu1 %vm1596_vm9, %v3176_v54 }
 0x224   :  { %5343 = vmatprep.mubr.msk.f32.mxu1 %vm1596_vm9, %v3177_v30  ;;  %5367 = vmatpush3.msra.mxu1 %v3369_v1 }
 0x225   :  { %5394 = vmatprep.subr.mxu1 %v6775_v23 }
 0x227   :  { %5344 = vmatmul.mubr.msk.f32.gmra.mxu1 %vm1596_vm9, %v3178_v16 }
 0x228   :  { %5346 = vmatprep.mubr.msk.f32.mxu1 %vm1596_vm9, %v3179_v4 }
 0x22b   :  { %5347 = vmatmul.mubr.msk.f32.gmra.mxu1 %vm1596_vm9, %v3180_v53 }
 0x22c   :  { %5349 = vmatprep.mubr.msk.f32.mxu1 %vm1596_vm9, %v3181_v7 }
 0x22f   :  { %5350 = vmatmul.mubr.msk.f32.gmra.mxu1 %vm1596_vm9, %v3182_v25 }
 0x293   :  { %v5202_v59 = vpop.f32.mrf.mxu1  ;;  %v5216_v11 = vpop.f32.mrf.mxu0 }
 0x294   :  { %v1822_v51 = vadd.f32 %v5216_v11, %v5202_v59 }
 0x295   :  { %v1687_v55 = vpop.f32.mrf.mxu1  ;;  %v1816_v29 = vpop.f32.mrf.mxu0 }
 0x296   :  { %v1817_v45 = vadd.f32 %v1816_v29, %v1687_v55 }
 0x297   :  { %v5205_v35 = vpop.f32.mrf.mxu1  ;;  %v5219_v0 = vpop.f32.mrf.mxu0 }
 0x298   :  { %v1832_v3 = vadd.f32 %v5219_v0, %v5205_v35 }
 0x299   :  { %v1697_v44 = vpop.f32.mrf.mxu1  ;;  %v1826_v32 = vpop.f32.mrf.mxu0 }
 0x29b   :  { %v6778_v57 = vpop.f32.mrf.mxu1  ;;  %v6780_v10 = vpop.f32.mrf.mxu0 }
 0x29d   :  { %v6782_v41 = vpop.f32.mrf.mxu1  ;;  %v6784_v52 = vpop.f32.mrf.mxu0 }
 0x29f   :  { %v6786_v31 = vpop.f32.mrf.mxu1  ;;  %v6788_v27 = vpop.f32.mrf.mxu0 }
 0x2a1   :  { %v6790_v22 = vpop.f32.mrf.mxu1  ;;  %v6792_v28 = vpop.f32.mrf.mxu0 }
 0x2a3   :  { %v5230_v9 = vpop.f32.mrf.mxu1  ;;  %v5244_v58 = vpop.f32.mrf.mxu0 }
 0x2a4   :  { %v2011_v36 = vadd.f32 %v5230_v9, %v1822_v51  ;;  %v1842_v51 = vadd.f32 %v6780_v10, %v6778_v57 }
 0x2a5   :  { %v1971_v63 = vpop.f32.mrf.mxu1  ;;  %v2134_v13 = vpop.f32.mrf.mxu0 }
 0x2a7   :  { %v5233_v12 = vpop.f32.mrf.mxu1  ;;  %v5247_v18 = vpop.f32.mrf.mxu0 }
 0x2a9   :  { %v1981_v19 = vpop.f32.mrf.mxu1  ;;  %v2144_v37 = vpop.f32.mrf.mxu0 }
 0x2ab   :  { %v5236_v21 = vpop.f32.mrf.mxu1  ;;  %v6794_v46 = vpop.f32.mrf.mxu0 }
 0x2ad   :  { %v1991_v50 = vpop.f32.mrf.mxu1  ;;  %v6796_v40 = vpop.f32.mrf.mxu0 }
 0x2af   :  { %v5239_v14 = vpop.f32.mrf.mxu1  ;;  %v6798_v48 = vpop.f32.mrf.mxu0 }
 0x2b1   :  { %v6800_v54 = vpop.f32.mrf.mxu1  ;;  %v6802_v30 = vpop.f32.mrf.mxu0 }
 0x2b3   :  { %v5258_v16 = vpop.f32.mrf.mxu1  ;;  %v5272_v4 = vpop.f32.mrf.mxu0 }
 0x2b5   :  { %v2297_v53 = vpop.f32.mrf.mxu1  ;;  %v2436_v7 = vpop.f32.mrf.mxu0 }
 0x2b7   :  { %v5261_v25 = vpop.f32.mrf.mxu1  ;;  %v5275_v62 = vpop.f32.mrf.mxu0 }
 0x2b9   :  { %v2307_v1 = vpop.f32.mrf.mxu1  ;;  %v6804_v43 = vpop.f32.mrf.mxu0 }
 0x2bb   :  { %v5264_v34 = vpop.f32.mrf.mxu1  ;;  %v6806_v47 = vpop.f32.mrf.mxu0 }
 0x2bd   :  { %v2317_v56 = vpop.f32.mrf.mxu1  ;;  %v6808_v24 = vpop.f32.mrf.mxu0 }
 0x2be   :  { %7576 = vst [vmem:[#allocation40_spill] sm:$0xff] %v6808_v24  ;;  %v2174_v24 = vadd.f32 %v5244_v58, %v2011_v36 }
 0x2bf   :  { %v6810_v8 = vpop.f32.mrf.mxu1  ;;  %v6812_v61 = vpop.f32.mrf.mxu0 }
 0x2c0   :  { %7577 = vst [vmem:[#allocation41_spill] sm:$0xff] %v6812_v61  ;;  %v2337_v9 = vadd.f32 %v5258_v16, %v2174_v24 }
 0x2c1   :  { %v6814_v49 = vpop.f32.mrf.mxu1  ;;  %v6816_v17 = vpop.f32.mrf.mxu0 }
 0x2c2   :  { %7578 = vst [vmem:[#allocation42_spill] sm:$0xff] %v6814_v49  ;;  %7579 = vst [vmem:[#allocation43_spill] sm:$0xff] %v6816_v17  ;;  %v2010_v17 = vadd.f32 %v1971_v63, %v1817_v45  ;;  %v1837_v45 = vadd.f32 %v6784_v52, %v6782_v41 }
 0x2c3   :  { %v5286_v20 = vpop.f32.mrf.mxu1  ;;  %v5300_v2 = vpop.f32.mrf.mxu0 }
 0x2c4   :  { %v2173_v55 = vadd.f32 %v2134_v13, %v2010_v17  ;;  %v2014_v36 = vadd.f32 %v1991_v50, %v1837_v45  ;;  %v1847_v17 = vadd.f32 %v6792_v28, %v6790_v22 }
 0x2c5   :  { %v2599_v39 = vpop.f32.mrf.mxu1  ;;  %v2762_v60 = vpop.f32.mrf.mxu0 }
 0x2c6   :  { %v2177_v13 = vadd.f32 %v6796_v40, %v2014_v36 }
 0x2c7   :  { %v5289_v5 = vpop.f32.mrf.mxu1  ;;  %v6818_v23 = vpop.f32.mrf.mxu0 }
 0x2c8   :  { %7580 = vst [vmem:[#allocation44_spill] sm:$0xff] %v6818_v23  ;;  %v1827_v23 = vadd.f32 %v1826_v32, %v1697_v44  ;;  %v2336_v44 = vadd.f32 %v2297_v53, %v2173_v55  ;;  %v2340_v16 = vadd.f32 %v2317_v56, %v2177_v13 }
 0x2c9   :  { %v2609_v15 = vpop.f32.mrf.mxu1  ;;  %v6820_v26 = vpop.f32.mrf.mxu0 }
 0x2ca   :  { %7581 = vst [vmem:[#allocation45_spill] sm:$0xff] %v6820_v26  ;;  %v2013_v26 = vadd.f32 %v5233_v12, %v1832_v3  ;;  %v2012_v29 = vadd.f32 %v1981_v19, %v1827_v23  ;;  %v1852_v3 = vadd.f32 %v6788_v27, %v6786_v31  ;;  %v2476_v12 = vadd.f32 %v5272_v4, %v2337_v9  ;;  %v7589_v9 = vld [vmem:[#allocation43_spill] sm:$0xff] }
 0x2cb   :  { %v6822_v6 = vpop.f32.mrf.mxu1  ;;  %v6824_v33 = vpop.f32.mrf.mxu0  ;;  %v2475_v41 = vadd.f32 %v2436_v7, %v2336_v44  ;;  %v2016_v31 = vadd.f32 %v6800_v54, %v1847_v17  ;;  %v7584_v7 = vld [vmem:[#allocation40_spill] sm:$0xff] }
 0x2cc   :  { %v2176_v63 = vadd.f32 %v5247_v18, %v2013_v26  ;;  %v2175_v58 = vadd.f32 %v2144_v37, %v2012_v29  ;;  %v2017_v24 = vadd.f32 %v5239_v14, %v1852_v3  ;;  %v2639_v52 = vadd.f32 %v5286_v20, %v2476_v12 }
 0x2cd   :  { %v6826_v42 = vpop.f32.mrf.mxu1  ;;  %v6828_v38 = vpop.f32.mrf.mxu0  ;;  %v2638_v37 = vadd.f32 %v2599_v39, %v2475_v41 }
 0x2ce   :  { %v2338_v26 = vadd.f32 %v2307_v1, %v2175_v58  ;;  %v2180_v50 = vadd.f32 %v6798_v48, %v2017_v24  ;;  %v2802_v14 = vadd.f32 %v5300_v2, %v2639_v52  ;;  %v7585_v48 = vld [vmem:[#allocation42_spill] sm:$0xff] }
 0x2cf   :  { %v6830_v61 = vpop.f32.mrf.mxu1  ;;  %v6832_v49 = vpop.f32.mrf.mxu0  ;;  %v2801_v4 = vadd.f32 %v2762_v60, %v2638_v37  ;;  %v7586_v1 = vld [vmem:[#allocation44_spill] sm:$0xff] }
 0x2d0   :  { %7582 = vst [vmem:[#allocation46_spill] sm:$0xff] %v6832_v49  ;;  %v2015_v49 = vadd.f32 %v5236_v21, %v1842_v51  ;;  %v2477_v28 = vadd.f32 %v6804_v43, %v2338_v26  ;;  %v2343_v20 = vadd.f32 %v6810_v8, %v2180_v50 }
 0x2d1   :  { %v6834_v59 = vpop.f32.mrf.mxu1  ;;  %v6836_v11 = vpop.f32.mrf.mxu0 }
 0x2d2   :  { %7583 = vst [vmem:[#allocation47_spill] sm:$0xff] %v6836_v11  ;;  %v2339_v11 = vadd.f32 %v5261_v25, %v2176_v63  ;;  %v2178_v10 = vadd.f32 %v6794_v46, %v2015_v49  ;;  %v2179_v46 = vadd.f32 %v6802_v30, %v2016_v31  ;;  %v2640_v53 = vadd.f32 %v2609_v15, %v2477_v28  ;;  %v7587_v30 = vld [vmem:[#allocation41_spill] sm:$0xff] }
 0x2d3   :  { %v5314_v35 = vpop.f32.mrf.mxu1  ;;  %v5328_v0 = vpop.f32.mrf.mxu0  ;;  %v2479_v25 = vadd.f32 %v7584_v7, %v2340_v16 }
 0x2d4   :  { %v2478_v18 = vadd.f32 %v5275_v62, %v2339_v11  ;;  %v2341_v19 = vadd.f32 %v5264_v34, %v2178_v10  ;;  %v2949_v34 = vadd.f32 %v5314_v35, %v2802_v14  ;;  %v2342_v56 = vadd.f32 %v7585_v48, %v2179_v46 }
 0x2d5   :  { %v2909_v32 = vpop.f32.mrf.mxu1  ;;  %v3092_v57 = vpop.f32.mrf.mxu0  ;;  %v2482_v11 = vadd.f32 %v7587_v30, %v2343_v20  ;;  %v2642_v8 = vadd.f32 %v6826_v42, %v2479_v25 }
 0x2d6   :  { %v2641_v49 = vadd.f32 %v5289_v5, %v2478_v18  ;;  %v2480_v54 = vadd.f32 %v6806_v47, %v2341_v19  ;;  %v2948_v2 = vadd.f32 %v2909_v32, %v2801_v4  ;;  %v7588_v47 = vld [vmem:[#allocation45_spill] sm:$0xff]  ;;  %v3132_v15 = vadd.f32 %v5328_v0, %v2949_v34 }
 0x2d7   :  { %v5317_v23 = vpop.f32.mrf.mxu1  ;;  %v5331_v21 = vpop.f32.mrf.mxu0  ;;  %v2803_v60 = vadd.f32 %v7588_v47, %v2640_v53  ;;  %v2481_v45 = vadd.f32 %v7589_v9, %v2342_v56  ;;  %v2645_v35 = vadd.f32 %v6830_v61, %v2482_v11  ;;  %v2805_v32 = vadd.f32 %v6828_v38, %v2642_v8  ;;  %v7590_v10 = vld [vmem:[#allocation46_spill] sm:$0xff] }
 0x2d8   :  { %v2804_v43 = vadd.f32 %v7586_v1, %v2641_v49  ;;  %v2643_v5 = vadd.f32 %v6822_v6, %v2480_v54  ;;  %v6866_v6 = vld [vmem:[%s7345_s4] ss:$0 sm:$0xff]  ;;  %v3131_v3 = vadd.f32 %v3092_v57, %v2948_v2 }
 0x2d9   :  { %v2919_v27 = vpop.f32.mrf.mxu1  ;;  %v3102_v39 = vpop.f32.mrf.mxu0  ;;  %v2644_v0 = vadd.f32 %v6834_v59, %v2481_v45  ;;  %v2808_v41 = vadd.f32 %v7590_v10, %v2645_v35  ;;  %v7591_v38 = vld [vmem:[#allocation47_spill] sm:$0xff]  ;;  %v7592_v1 = vld [vmem:[#allocation5_spill] sm:$0xff] }
 0x2da   :  { %v2951_v55 = vadd.f32 %v5317_v23, %v2804_v43  ;;  %v2806_v44 = vadd.f32 %v6824_v33, %v2643_v5  ;;  %v2950_v42 = vadd.f32 %v2919_v27, %v2803_v60  ;;  %vm7593_vm15 = vcmp.lt.s32.totalorder %v7592_v1, 1 }
 0x2db   :  { %v5320_v22 = vpop.f32.mrf.mxu1  ;;  %v5334_v29 = vpop.f32.mrf.mxu0  ;;  %v2807_v27 = vadd.f32 %v7591_v38, %v2644_v0  ;;  %vm7601_vm6 = vmmov %vm7593_vm15  ;;  %vm7612_vm13 = vcmp.lt.s32.totalorder %v7592_v1, 6 }
 0x2dc   :  { %v3134_v12 = vadd.f32 %v5331_v21, %v2951_v55  ;;  %v2953_v17 = vadd.f32 %v5320_v22, %v2806_v44  ;;  %v3133_v13 = vadd.f32 %v3102_v39, %v2950_v42  ;;  %vm7610_vm11 = vmmov %vm7601_vm6 }
 0x2dd   :  { %v2929_v40 = vpop.f32.mrf.mxu1  ;;  %v3112_v24 = vpop.f32.mrf.mxu0 }
 0x2de   :  { %v2952_v26 = vadd.f32 %v2929_v40, %v2805_v32  ;;  %v3136_v19 = vadd.f32 %v5334_v29, %v2953_v17 }
 0x2df   :  { %v5323_v62 = vpop.f32.mrf.mxu1  ;;  %v5337_v37 = vpop.f32.mrf.mxu0 }
 0x2e0   :  { %v2955_v59 = vadd.f32 %v5323_v62, %v2808_v41  ;;  %v3135_v22 = vadd.f32 %v3112_v24, %v2952_v26 }
 0x2e1   :  { %v2939_v51 = vpop.f32.mrf.mxu1  ;;  %v3122_v25 = vpop.f32.mrf.mxu0 }
 0x2e2   :  { %v2954_v28 = vadd.f32 %v2939_v51, %v2807_v27  ;;  %v3138_v4 = vadd.f32 %v5337_v37, %v2955_v59  ;;  %v7596_v37 = vld [vmem:[#allocation6_spill] sm:$0xff] }
 0x2e3   :  { %v5342_v63 = vpop.f32.mrf.mxu1  ;;  %vm7597_vm2 = vcmp.eq.s32.totalorder %v7596_v37, 1 }
 0x2e4   :  { %v3315_v36 = vadd.f32 %v5342_v63, %v3132_v15  ;;  %v3137_v5 = vadd.f32 %v3122_v25, %v2954_v28  ;;  %v7603_v25 = vld [vmem:[#allocation13_spill] sm:$0xff] }
 0x2e5   :  { %v3275_v58 = vpop.f32.mrf.mxu1  ;;  %vm7604_vm14 = vcmp.eq.s32.totalorder %v7603_v25, 1 }
 0x2e6   :  { %v3330_v61 = vadd.f32 %v6866_v6, %v3315_v36  ;;  %v3314_v23 = vadd.f32 %v3275_v58, %v3131_v3 }
 0x2e7   :  { %v5345_v52 = vpop.f32.mrf.mxu1 }
 0x2e8   :  { %v6873_v33 = vmax.f32 %v3330_v61, 0.0  ;;  %v3329_v57 = vadd.f32 %v6866_v6, %v3314_v23  ;;  %v3317_v31 = vadd.f32 %v5345_v52, %v3134_v12 }
 0x2e9   :  { %v3285_v18 = vpop.f32.mrf.mxu1 }
 0x2ea   :  { %v6877_v21 = vmax.f32 %v3329_v57, 0.0  ;;  %v3332_v50 = vadd.f32 %v6866_v6, %v3317_v31  ;;  %v3316_v16 = vadd.f32 %v3285_v18, %v3133_v13  ;;  %v3371_v49 = vrot.slane %v6873_v33, 6 }
 0x2eb   :  { %v5348_v14 = vpop.f32.mrf.mxu1  ;;  %v3346_v39 = vrot.slane %v6873_v33, 5  ;;  %v3655_v11 = vrot.slane %v6873_v33, 7 }
 0x2ec   :  { %v6881_v46 = vmax.f32 %v3332_v50, 0.0  ;;  %v3331_v20 = vadd.f32 %v6866_v6, %v3316_v16  ;;  %v3319_v40 = vadd.f32 %v5348_v14, %v3136_v19  ;;  %v3370_v54 = vrot.slane %v6877_v21, 6 }
 0x2ed   :  { %v3295_v53 = vpop.f32.mrf.mxu1  ;;  %v3345_v34 = vrot.slane %v6877_v21, 5  ;;  %v3654_v7 = vrot.slane %v6877_v21, 7 }
 0x2ee   :  { %v6888_v48 = vmax.f32 %v3331_v20, 0.0  ;;  %v3334_v56 = vadd.f32 %v6866_v6, %v3319_v40  ;;  %v3318_v62 = vadd.f32 %v3295_v53, %v3135_v22  ;;  %v3384_v43 = vsel %vm178_vm10, %v3370_v54, %v3371_v49  ;;  %v6963_v40 = vld [vmem:[%s7346_s5 + $0x20] sm:$0xff]  ;;  %v6973_v53 = vld [vmem:[%s7346_s5 + $0x28] sm:$0xff] }
 0x2ef   :  { %v5351_v2 = vpop.f32.mrf.mxu1  ;;  %v3359_v30 = vsel %vm113_vm0, %v3345_v34, %v3346_v39  ;;  %v3373_v47 = vrot.slane %v6881_v46, 6  ;;  %v3348_v60 = vrot.slane %v6881_v46, 5  ;;  %v6907_v45 = vsel %vm7593_vm15, %v3654_v7, %v3655_v11  ;;  %vm7614_vm15 = vmmov %vm7601_vm6 }
 0x2f0   :  { %v3333_v8 = vadd.f32 %v6866_v6, %v3318_v62  ;;  %v3321_v51 = vadd.f32 %v5351_v2, %v3138_v4  ;;  %v6899_v15 = vmax.f32 %v3334_v56, 0.0  ;;  %v3372_v29 = vrot.slane %v6888_v48, 6  ;;  %v7605_v2 = vld [vmem:[#allocation10_spill] sm:$0xff] }
 0x2f1   :  { %v3305_v55 = vpop.f32.mrf.mxu1  ;;  %v3347_v9 = vrot.slane %v6888_v48, 5  ;;  %v3656_v41 = vrot.slane %v6888_v48, 7  ;;  %v3387_v50 = vsel %vm7597_vm2, %v3384_v43, 0.0  ;;  %v3362_v22 = vsel %vm155_vm3, %v3359_v30, 0.0 }
 0x2f2   :  { %v6909_v35 = vmax.f32 %v3333_v8, 0.0  ;;  %v3336_v63 = vadd.f32 %v6866_v6, %v3321_v51  ;;  %v3320_v44 = vadd.f32 %v3305_v55, %v3137_v5  ;;  %v3383_v3 = vsel %vm178_vm10, %v3371_v49, %v3372_v29  ;;  %v7599_v49 = vld [vmem:[#allocation8_spill] sm:$0xff]  ;;  %v7609_v51 = vld [vmem:[#allocation39_spill] sm:$0xff] }
 0x2f3   :  { %v3358_v42 = vsel %vm113_vm0, %v3346_v39, %v3347_v9  ;;  %v3382_v36 = vsel %vm178_vm10, %v3372_v29, %v3373_v47  ;;  %v3357_v32 = vsel %vm113_vm0, %v3347_v9, %v3348_v60  ;;  %v3375_v24 = vrot.slane %v6899_v15, 6  ;;  %v7602_v39 = vld [vmem:[#allocation38_spill] sm:$0xff] }
 0x2f4   :  { %v6920_v0 = vmax.f32 %v3336_v63, 0.0  ;;  %v3335_v58 = vadd.f32 %v6866_v6, %v3320_v44  ;;  %v3374_v12 = vrot.slane %v6909_v35, 6  ;;  %v3349_v17 = vrot.slane %v6909_v35, 5 }
 0x2f5   :  { %v3350_v13 = vrot.slane %v6899_v15, 5  ;;  %vm7600_vm4 = vcmp.eq.s32.totalorder %v7599_v49, 1  ;;  %v3956_v4 = vrot.slane %v6877_v21, 1  ;;  %v3363_v56 = vsel %vm7604_vm14, %v3358_v42, 0.0 }
 0x2f6   :  { %v6926_v61 = vmax.f32 %v3335_v58, 0.0  ;;  %v3377_v23 = vrot.slane %v6920_v0, 6  ;;  %v3352_v10 = vrot.slane %v6920_v0, 5  ;;  %v3381_v26 = vsel %vm178_vm10, %v3373_v47, %v3374_v12 }
 0x2f7   :  { %v3356_v6 = vsel %vm113_vm0, %v3348_v60, %v3349_v17  ;;  %v3380_v52 = vsel %vm178_vm10, %v3374_v12, %v3375_v24  ;;  %v3355_v19 = vsel %vm113_vm0, %v3349_v17, %v3350_v13  ;;  %v3388_v20 = vsel %vm7600_vm4, %v3383_v3, 0.0 }
 0x2f8   :  { %v3385_v57 = vsel %vm178_vm10, %v3377_v23, %v3370_v54  ;;  %v3360_v31 = vsel %vm113_vm0, %v3352_v10, %v3345_v34  ;;  %v3376_v28 = vrot.slane %v6926_v61, 6  ;;  %v3351_v14 = vrot.slane %v6926_v61, 5 }
 0x2f9   :  { %v3386_v27 = vsel %vm219_vm12, %v3385_v57, 0.0  ;;  %v3361_v18 = vsel %vm154_vm1, %v3360_v31, 0.0  ;;  %v6967_v54 = vsel %vm7601_vm6, %v3655_v11, %v3656_v41  ;;  %v4119_v34 = vrot.slane %v6877_v21, 2  ;;  %v7607_v11 = vld [vmem:[#allocation16_spill] sm:$0xff] }
 0x2fa   :  { %5354 = vmatprep.mubr.msk.f32.mxu0 %vm1596_vm9, %v3386_v27  ;;  %5368 = vmatprep.mubr.msk.f32.mxu1 %vm1596_vm9, %v3361_v18  ;;  %v3379_v62 = vsel %vm178_vm10, %v3375_v24, %v3376_v28  ;;  %v3354_v43 = vsel %vm113_vm0, %v3350_v13, %v3351_v14  ;;  %v3657_v5 = vrot.slane %v6881_v46, 7  ;;  %vm7606_vm5 = vcmp.eq.s32.totalorder %v7605_v2, 1 }
 0x2fb   :  { %5355 = vmatmul.mubr.msk.f32.vlgmr.msra.gmra.mxu0 %vm1596_vm9, %v3387_v50  ;;  %5369 = vmatmul.mubr.msk.f32.vlgmr.msra.gmra.mxu1 %vm1596_vm9, %v3362_v22  ;;  %v3389_v30 = vsel %vm7606_vm5, %v3382_v36, 0.0  ;;  %vm7608_vm7 = vcmp.eq.s32.totalorder %v7607_v11, 1  ;;  %v3957_v47 = vrot.slane %v6873_v33, 1  ;;  %v4120_v60 = vrot.slane %v6873_v33, 2 }
 0x2fc   :  { %5381 = vmatpush3.msra.mxu0 %v7602_v39  ;;  %5357 = vmatprep.mubr.msk.f32.mxu0 %vm1596_vm9, %v3388_v20  ;;  %v3364_v8 = vsel %vm7608_vm7, %v3357_v32, 0.0  ;;  %v3390_v55 = vsel %vm219_vm12, %v3381_v26, 0.0  ;;  %v6998_v29 = vsel %vm7610_vm11, %v3656_v41, %v3657_v5  ;;  %v3658_v9 = vrot.slane %v6909_v35, 7  ;;  %v7626_v20 = vld [vmem:[#allocation11_spill] sm:$0xff] }
 0x2fd   :  { %5371 = vmatprep.mubr.msk.f32.mxu1 %vm1596_vm9, %v3363_v56  ;;  %5395 = vmatpush3.msra.mxu1 %v7609_v51  ;;  %v3659_v63 = vrot.slane %v6899_v15, 7  ;;  %v3365_v44 = vsel %vm154_vm1, %v3356_v6, 0.0  ;;  %v3660_v3 = vrot.slane %v6926_v61, 7  ;;  %vm7611_vm12 = vcmp.lt.s32.totalorder %v7592_v1, 7  ;;  %vm7613_vm1 = vmmov %vm7597_vm2 }
 0x2fe   :  { %5408 = vmatprep.subr.mxu0 %v6963_v40  ;;  %5422 = vmatprep.subr.mxu1 %v6973_v53  ;;  %v7012_v42 = vsel %vm7611_vm12, %v3956_v4, %v3957_v47  ;;  %v7018_v36 = vsel %vm7612_vm13, %v4119_v34, %v4120_v60  ;;  %v3391_v32 = vsel %vm7613_vm1, %v3380_v52, 0.0  ;;  %v3661_v58 = vrot.slane %v6920_v0, 7  ;;  %vm7615_vm2 = vmmov %vm7601_vm6 }
 0x2ff   :  { %5358 = vmatmul.mubr.msk.f32.gmra.mxu0 %vm1596_vm9, %v3389_v30  ;;  %5372 = vmatmul.mubr.msk.f32.gmra.mxu1 %vm1596_vm9, %v3364_v8  ;;  %v3665_v12 = vsel %vm7614_vm15, %v3657_v5, %v3658_v9  ;;  %v7029_v17 = vsel %vm7615_vm2, %v3658_v9, %v3659_v63  ;;  %v3366_v24 = vsel %vm155_vm3, %v3355_v19, 0.0  ;;  %v3392_v41 = vsel %vm7600_vm4, %v3379_v62, 0.0  ;;  %vm7616_vm6 = vmmov %vm7615_vm2 }
 0x300   :  { %5360 = vmatprep.mubr.msk.f32.mxu0 %vm1596_vm9, %v3390_v55  ;;  %5374 = vmatprep.mubr.msk.f32.mxu1 %vm1596_vm9, %v3365_v44  ;;  %v3378_v26 = vsel %vm178_vm10, %v3376_v28, %v3377_v23  ;;  %v7041_v6 = vsel %vm7616_vm6, %v3659_v63, %v3660_v3  ;;  %v3367_v52 = vsel %vm7604_vm14, %v3354_v43, 0.0  ;;  %v3353_v13 = vsel %vm113_vm0, %v3351_v14, %v3352_v10  ;;  %vm7617_vm10 = vmmov %vm7615_vm2 }
 0x301   :  { %v3958_v57 = vrot.slane %v6888_v48, 1  ;;  %v4121_v31 = vrot.slane %v6888_v48, 2  ;;  %v3959_v23 = vrot.slane %v6881_v46, 1  ;;  %v4122_v38 = vrot.slane %v6881_v46, 2  ;;  %vm7618_vm0 = vmmov %vm7611_vm12 }
 0x302   :  { %v3960_v27 = vrot.slane %v6909_v35, 1  ;;  %v4123_v59 = vrot.slane %v6909_v35, 2  ;;  %v3669_v10 = vsel %vm7617_vm10, %v3661_v58, %v3654_v7  ;;  %vm7619_vm3 = vmmov %vm7612_vm13  ;;  %v3961_v16 = vrot.slane %v6899_v15, 1 }
 0x303   :  { %5361 = vmatmul.mubr.msk.f32.gmra.mxu0 %vm1596_vm9, %v3391_v32  ;;  %5375 = vmatmul.mubr.msk.f32.gmra.mxu1 %vm1596_vm9, %v3366_v24  ;;  %v7065_v18 = vsel %vm7618_vm0, %v3957_v47, %v3958_v57  ;;  %v7069_v19 = vsel %vm7619_vm3, %v4120_v60, %v4121_v31  ;;  %vm7620_vm5 = vmmov %vm7618_vm0  ;;  %v4124_v7 = vrot.slane %v6899_v15, 2  ;;  %vm7622_vm11 = vcmp.eq.s32.totalorder %v7605_v2, 1  ;;  %v7630_v2 = vld [vmem:[#allocation14_spill] sm:$0xff]  ;;  %v4802_v60 = vld [vmem:[%s7346_s5 + $0x30] sm:$0xff] }
 0x304   :  { %5363 = vmatprep.mubr.msk.f32.mxu0 %vm1596_vm9, %v3392_v41  ;;  %5377 = vmatprep.mubr.msk.f32.mxu1 %vm1596_vm9, %v3367_v52  ;;  %v7073_v37 = vsel %vm7620_vm5, %v3958_v57, %v3959_v23  ;;  %vm7621_vm7 = vmmov %vm7619_vm3  ;;  %v3393_v22 = vsel %vm7622_vm11, %v3378_v26, 0.0  ;;  %vm7623_vm12 = vcmp.eq.s32.totalorder %v7607_v11, 1  ;;  %vm7627_vm15 = vcmp.eq.s32.totalorder %v7626_v20, 1  ;;  %v7645_v52 = vld [vmem:[#allocation31_spill] sm:$0xff]  ;;  %v7649_v57 = vld [vmem:[#allocation30_spill] sm:$0xff] }
 0x305   :  { %v7077_v50 = vsel %vm7621_vm7, %v4121_v31, %v4122_v38  ;;  %v3368_v28 = vsel %vm7623_vm12, %v3353_v13, 0.0  ;;  %vm7624_vm13 = vmmov %vm7618_vm0  ;;  %v3670_v39 = vsel %vm7627_vm15, %v3669_v10, 0.0  ;;  %v3962_v62 = vrot.slane %v6926_v61, 1  ;;  %v7657_v10 = vld [vmem:[#allocation34_spill] sm:$0xff] }
 0x306   :  { %v7087_v14 = vsel %vm7624_vm13, %v3959_v23, %v3960_v27  ;;  %vm7625_vm1 = vmmov %vm7619_vm3  ;;  %v4125_v43 = vrot.slane %v6926_v61, 2  ;;  %v4282_v5 = vrot.slane %v6877_v21, 3  ;;  %vm7631_vm6 = vcmp.eq.s32.totalorder %v7630_v2, 1  ;;  %v7653_v23 = vld [vmem:[#allocation35_spill] sm:$0xff] }
 0x307   :  { %v7091_v49 = vsel %vm7625_vm1, %v4122_v38, %v4123_v59  ;;  %5364 = vmatmul.mubr.msk.f32.gmra.mxu0 %vm1596_vm9, %v3393_v22  ;;  %5378 = vmatmul.mubr.msk.f32.gmra.mxu1 %vm1596_vm9, %v3368_v28  ;;  %vm7628_vm2 = vmmov %vm7618_vm0  ;;  %v3671_v30 = vsel %vm7631_vm6, %v6907_v45, 0.0  ;;  %v4284_v51 = vrot.slane %v6888_v48, 3  ;;  %v7634_v45 = vld [vmem:[#allocation15_spill] sm:$0xff]  ;;  %v4283_v55 = vrot.slane %v6873_v33, 3 }
 0x308   :  { %v7099_v25 = vsel %vm7628_vm2, %v3960_v27, %v3961_v16  ;;  %vm7629_vm4 = vmmov %vm7625_vm1  ;;  %5382 = vmatprep.mubr.msk.f32.mxu0 %vm1596_vm9, %v3670_v39  ;;  %5396 = vmatprep.mubr.msk.f32.mxu1 %vm1596_vm9, %v6877_v21  ;;  %v4285_v9 = vrot.slane %v6881_v46, 3  ;;  %v4287_v32 = vrot.slane %v6899_v15, 3  ;;  %v4288_v24 = vrot.slane %v6926_v61, 3  ;;  %v7655_v27 = vld [vmem:[#allocation28_spill] sm:$0xff] }
 0x309   :  { %v7103_v56 = vsel %vm7629_vm4, %v4123_v59, %v4124_v7  ;;  %vm7632_vm14 = vmmov %vm7618_vm0  ;;  %vm7635_vm0 = vcmp.eq.s32.totalorder %v7634_v45, 1  ;;  %vm7641_vm12 = vcmp.lt.s32.totalorder %v7592_v1, 1  ;;  %vm7650_vm4 = vcmp.eq.s32.totalorder %v7649_v57, 1 }
 0x30a   :  { %v7118_v11 = vsel %vm7632_vm14, %v3961_v16, %v3962_v62  ;;  %vm7633_vm10 = vmmov %vm7625_vm1  ;;  %v3672_v47 = vsel %vm7635_vm0, %v6967_v54, 0.0  ;;  %v7147_v54 = vsel %vm1254_vm8, %v4282_v5, %v4283_v55  ;;  %v3662_v26 = vsel %vm7641_vm12, %v3660_v3, %v3661_v58  ;;  %v7647_v58 = vld [vmem:[#allocation26_spill] sm:$0xff] }
 0x30b   :  { %v7124_v8 = vsel %vm7633_vm10, %v4124_v7, %v4125_v43  ;;  %5383 = vmatmul.mubr.msk.f32.vlgmr.msra.gmra.mxu0 %vm1596_vm9, %v3671_v30  ;;  %5397 = vmatmul.mubr.msk.f32.vlgmr.msra.gmra.mxu1 %vm1596_vm9, %v6873_v33  ;;  %v7151_v33 = vsel %vm1254_vm8, %v4283_v55, %v4284_v51  ;;  %vm7638_vm5 = vmmov %vm7627_vm15  ;;  %vm7646_vm15 = vcmp.eq.s32.totalorder %v7645_v52, 1  ;;  %vm7648_vm2 = vcmp.eq.s32.totalorder %v7647_v58, 1  ;;  %v7675_v30 = vld [vmem:[#allocation37_spill] sm:$0xff] }
 0x30c   :  { %5409 = vmatpush3.msra.mxu0 %v6963_v40  ;;  %5385 = vmatprep.mubr.msk.f32.mxu0 %vm1596_vm9, %v3672_v47  ;;  %v7636_v40 = vld [vmem:[#allocation19_spill] sm:$0xff]  ;;  %v3674_v44 = vsel %vm7638_vm5, %v3665_v12, 0.0  ;;  %vm7639_vm7 = vmmov %vm7631_vm6  ;;  %v4135_v3 = vsel %vm7646_vm15, %v7018_v36, 0.0  ;;  %v3973_v13 = vsel %vm7648_vm2, %v7065_v18, 0.0  ;;  %v4136_v31 = vsel %vm7650_vm4, %v7069_v19, 0.0 }
 0x30d   :  { %5399 = vmatprep.mubr.msk.f32.mxu1 %vm1596_vm9, %v6888_v48  ;;  %5423 = vmatpush3.msra.mxu1 %v6973_v53  ;;  %vm7637_vm3 = vcmp.eq.s32.totalorder %v7636_v40, 1  ;;  %v7158_v48 = vsel %vm1254_vm8, %v4284_v51, %v4285_v9  ;;  %v4286_v53 = vrot.slane %v6909_v35, 3  ;;  %v3675_v12 = vsel %vm7639_vm7, %v7029_v17, 0.0  ;;  %vm7640_vm11 = vmmov %vm7635_vm0 }
 0x30e   :  { %v3673_v63 = vsel %vm7637_vm3, %v6998_v29, 0.0  ;;  %5436 = vmatprep.subr.mxu0 %v4802_v60  ;;  %vm7642_vm13 = vmmov %vm7637_vm3  ;;  %vm7654_vm14 = vcmp.eq.s32.totalorder %v7653_v23, 1  ;;  %vm7656_vm10 = vcmp.eq.s32.totalorder %v7655_v27, 1  ;;  %vm7658_vm0 = vcmp.eq.s32.totalorder %v7657_v10, 1 }
 0x30f   :  { %5386 = vmatmul.mubr.msk.f32.gmra.mxu0 %vm1596_vm9, %v3673_v63  ;;  %5400 = vmatmul.mubr.msk.f32.gmra.mxu1 %vm1596_vm9, %v6881_v46  ;;  %v4293_v29 = vsel %vm1254_vm8, %v4285_v9, %v4286_v53  ;;  %v4292_v41 = vsel %vm1254_vm8, %v4286_v53, %v4287_v32  ;;  %v7179_v46 = vsel %vm1254_vm8, %v4287_v32, %v4288_v24  ;;  %v3677_v17 = vsel %vm7642_vm13, %v3662_v26, 0.0  ;;  %vm7660_vm5 = vmmov %vm7646_vm15 }
 0x310   :  { %5388 = vmatprep.mubr.msk.f32.mxu0 %vm1596_vm9, %v3674_v44  ;;  %5402 = vmatprep.mubr.msk.f32.mxu1 %vm1596_vm9, %v6909_v35  ;;  %v3676_v35 = vsel %vm7640_vm11, %v7041_v6, 0.0  ;;  %v4137_v38 = vsel %vm7654_vm14, %v7077_v50, 0.0  ;;  %v3975_v59 = vsel %vm7656_vm10, %v7087_v14, 0.0  ;;  %v4138_v18 = vsel %vm7658_vm0, %v7091_v49, 0.0  ;;  %vm7663_vm12 = vmmov %vm7648_vm2 }
 0x311   :  { %v3963_v19 = vrot.slane %v6920_v0, 1  ;;  %v4139_v16 = vsel %vm7660_vm5, %v7103_v56, 0.0  ;;  %vm7661_vm7 = vcmp.lt.s32.totalorder %v7592_v1, 7  ;;  %vm7662_vm11 = vcmp.lt.s32.totalorder %v7592_v1, 6  ;;  %vm7664_vm13 = vmmov %vm7650_vm4 }
 0x312   :  { %v3977_v28 = vsel %vm7663_vm12, %v7118_v11, 0.0  ;;  %v4140_v14 = vsel %vm7664_vm13, %v7124_v8, 0.0  ;;  %vm7666_vm15 = vmmov %vm7654_vm14  ;;  %v7677_v8 = vld [vmem:[#allocation36_spill] sm:$0xff]  ;;  %v4289_v45 = vrot.slane %v6920_v0, 3 }
 0x313   :  { %5389 = vmatmul.mubr.msk.f32.gmra.mxu0 %vm1596_vm9, %v3675_v12  ;;  %5403 = vmatmul.mubr.msk.f32.gmra.mxu1 %vm1596_vm9, %v6899_v15  ;;  %v7643_v15 = vld [vmem:[#allocation27_spill] sm:$0xff]  ;;  %v3964_v7 = vsel %vm7661_vm7, %v3962_v62, %v3963_v19  ;;  %vm7667_vm2 = vmmov %vm7661_vm7  ;;  %vm7678_vm5 = vcmp.eq.s32.totalorder %v7677_v8, 1 }
 0x314   :  { %5391 = vmatprep.mubr.msk.f32.mxu0 %vm1596_vm9, %v3676_v35  ;;  %5405 = vmatprep.mubr.msk.f32.mxu1 %vm1596_vm9, %v6926_v61  ;;  %vm7644_vm1 = vcmp.eq.s32.totalorder %v7643_v15, 1  ;;  %v3971_v39 = vsel %vm7667_vm2, %v3963_v19, %v3956_v4  ;;  %vm7668_vm4 = vmmov %vm7662_vm11  ;;  %v7671_v4 = vld [vmem:[#allocation33_spill] sm:$0xff]  ;;  %v4301_v51 = vsel %vm7678_vm5, %v4293_v29, 0.0  ;;  %v4297_v9 = vsel %vm1254_vm8, %v4289_v45, %v4282_v5 }
 0x315   :  { %v3972_v6 = vsel %vm7644_vm1, %v7012_v42, 0.0  ;;  %v7651_v42 = vld [vmem:[#allocation29_spill] sm:$0xff]  ;;  %vm7659_vm3 = vmmov %vm7644_vm1 }
 0x316   :  { %vm7652_vm6 = vcmp.eq.s32.totalorder %v7651_v42, 1  ;;  %v3976_v50 = vsel %vm7659_vm3, %v7099_v25, 0.0  ;;  %vm7670_vm14 = vmmov %vm7658_vm0  ;;  %vm7676_vm3 = vcmp.eq.s32.totalorder %v7675_v30, 1 }
 0x317   :  { %5392 = vmatmul.mubr.msk.f32.gmra.mxu0 %vm1596_vm9, %v3677_v17  ;;  %5406 = vmatmul.mubr.msk.f32.gmra.mxu1 %vm1596_vm9, %v6920_v0  ;;  %v3974_v36 = vsel %vm7652_vm6, %v7073_v37, 0.0  ;;  %v4126_v37 = vrot.slane %v6920_v0, 2  ;;  %vm7665_vm1 = vmmov %vm7652_vm6  ;;  %v4300_v11 = vsel %vm7676_vm3, %v7158_v48, 0.0 }
 0x318   :  { %5410 = vmatprep.mubr.msk.f32.mxu0 %vm1596_vm9, %v3972_v6  ;;  %5424 = vmatprep.mubr.msk.f32.mxu1 %vm1596_vm9, %v4135_v3  ;;  %v3978_v49 = vsel %vm7665_vm1, %v3964_v7, 0.0  ;;  %vm7669_vm6 = vmmov %vm7656_vm10  ;;  %vm7672_vm10 = vcmp.eq.s32.totalorder %v7671_v4, 1 }
 0x319   :  { %v4127_v22 = vsel %vm7662_vm11, %v4125_v43, %v4126_v37  ;;  %v4134_v25 = vsel %vm7668_vm4, %v4126_v37, %v4119_v34  ;;  %v3979_v56 = vsel %vm7669_vm6, %v3971_v39, 0.0  ;;  %v4298_v43 = vsel %vm7672_vm10, %v7147_v54, 0.0  ;;  %v7673_v34 = vld [vmem:[#allocation32_spill] sm:$0xff]  ;;  %vm7679_vm7 = vmmov %vm7672_vm10 }
 0x31a   :  { %v4141_v20 = vsel %vm7666_vm15, %v4127_v22, 0.0  ;;  %v4142_v62 = vsel %vm7670_vm14, %v4134_v25, 0.0  ;;  %vm7674_vm0 = vcmp.eq.s32.totalorder %v7673_v34, 1  ;;  %v4302_v47 = vsel %vm7679_vm7, %v4292_v41, 0.0  ;;  %vm7681_vm12 = vmmov %vm7676_vm3 }
 0x31b   :  { %5411 = vmatmul.mubr.msk.f32.vlgmr.msra.gmra.mxu0 %vm1596_vm9, %v3973_v13  ;;  %5425 = vmatmul.mubr.msk.f32.vlgmr.msra.gmra.mxu1 %vm1596_vm9, %v4136_v31  ;;  %v4299_v2 = vsel %vm7674_vm0, %v7151_v33, 0.0  ;;  %vm7680_vm11 = vmmov %vm7674_vm0 }
 0x31c   :  { %5437 = vmatpush3.msra.mxu0 %v4802_v60  ;;  %5413 = vmatprep.mubr.msk.f32.mxu0 %vm1596_vm9, %v3974_v36  ;;  %v4290_v60 = vsel %vm1254_vm8, %v4288_v24, %v4289_v45  ;;  %v4303_v55 = vsel %vm7680_vm11, %v7179_v46, 0.0  ;;  %vm7682_vm13 = vmmov %vm7678_vm5  ;;  %vm7691_vm8 = vcmask 261120  }
 0x31d   :  { %5427 = vmatprep.mubr.msk.f32.mxu1 %vm1596_vm9, %v4137_v38  ;;  %v4304_v0 = vsel %vm7681_vm12, %v4290_v60, 0.0  ;;  %v4305_v61 = vsel %vm7682_vm13, %v4297_v9, 0.0  ;;  %vm7693_vm1 = vmmov %vm7691_vm8 }
 0x31e   :  { %vm7694_vm15 = vmmov %vm7693_vm1 }
 0x31f   :  { %5414 = vmatmul.mubr.msk.f32.gmra.mxu0 %vm1596_vm9, %v3975_v59  ;;  %5428 = vmatmul.mubr.msk.f32.gmra.mxu1 %vm1596_vm9, %v4138_v18  ;;  %vm7695_vm2 = vmmov %vm7693_vm1 }
 0x320   :  { %5416 = vmatprep.mubr.msk.f32.mxu0 %vm1596_vm9, %v3976_v50  ;;  %5430 = vmatprep.mubr.msk.f32.mxu1 %vm1596_vm9, %v4139_v16  ;;  %vm7696_vm4 = vmmov %vm7693_vm1 }
 0x321   :  { %vm7697_vm6 = vmmov %vm7693_vm1 }
 0x322   :  { %vm7698_vm14 = vmmov %vm7693_vm1 }
 0x323   :  { %5417 = vmatmul.mubr.msk.f32.gmra.mxu0 %vm1596_vm9, %v3977_v28  ;;  %5431 = vmatmul.mubr.msk.f32.gmra.mxu1 %vm1596_vm9, %v4140_v14 }
 0x324   :  { %5419 = vmatprep.mubr.msk.f32.mxu0 %vm1596_vm9, %v3978_v49  ;;  %5433 = vmatprep.mubr.msk.f32.mxu1 %vm1596_vm9, %v4141_v20 }
 0x327   :  { %5420 = vmatmul.mubr.msk.f32.gmra.mxu0 %vm1596_vm9, %v3979_v56  ;;  %5434 = vmatmul.mubr.msk.f32.gmra.mxu1 %vm1596_vm9, %v4142_v62 }
 0x328   :  { %5438 = vmatprep.mubr.msk.f32.mxu0 %vm1596_vm9, %v4298_v43 }
 0x32b   :  { %5439 = vmatmul.mubr.msk.f32.vlgmr.msra.gmra.mxu0 %vm1596_vm9, %v4299_v2 }
 0x32c   :  { %5441 = vmatprep.mubr.msk.f32.mxu0 %vm1596_vm9, %v4300_v11 }
 0x32f   :  { %5442 = vmatmul.mubr.msk.f32.gmra.mxu0 %vm1596_vm9, %v4301_v51 }
 0x330   :  { %5444 = vmatprep.mubr.msk.f32.mxu0 %vm1596_vm9, %v4302_v47 }
 0x333   :  { %5445 = vmatmul.mubr.msk.f32.gmra.mxu0 %vm1596_vm9, %v4303_v55 }
 0x334   :  { %5447 = vmatprep.mubr.msk.f32.mxu0 %vm1596_vm9, %v4304_v0 }
 0x337   :  { %5448 = vmatmul.mubr.msk.f32.gmra.mxu0 %vm1596_vm9, %v4305_v61  ;;  %vm7692_vm9 = vmmov %vm7691_vm8 }
 0x3bb   :  { %v5356_v54 = vpop.f32.mrf.mxu0  ;;  %v5370_v33 = vpop.f32.mrf.mxu1 }
 0x3bc   :  { %v3621_v19 = vadd.f32 %v5370_v33, %v5356_v54 }
 0x3bd   :  { %v3486_v40 = vpop.f32.mrf.mxu0  ;;  %v3615_v63 = vpop.f32.mrf.mxu1 }
 0x3be   :  { %v3616_v16 = vadd.f32 %v3615_v63, %v3486_v40 }
 0x3bf   :  { %v5359_v48 = vpop.f32.mrf.mxu0  ;;  %v5373_v53 = vpop.f32.mrf.mxu1 }
 0x3c0   :  { %v3631_v25 = vadd.f32 %v5373_v53, %v5359_v48 }
 0x3c1   :  { %v3496_v44 = vpop.f32.mrf.mxu0  ;;  %v3625_v32 = vpop.f32.mrf.mxu1 }
 0x3c2   :  { %v3626_v20 = vadd.f32 %v3625_v32, %v3496_v44 }
 0x3c3   :  { %v5362_v24 = vpop.f32.mrf.mxu0  ;;  %v5376_v21 = vpop.f32.mrf.mxu1 }
 0x3c4   :  { %v3641_v62 = vadd.f32 %v5376_v21, %v5362_v24 }
 0x3c5   :  { %v3506_v29 = vpop.f32.mrf.mxu0  ;;  %v3635_v1 = vpop.f32.mrf.mxu1 }
 0x3c6   :  { %v3636_v2 = vadd.f32 %v3635_v1, %v3506_v29  ;;  %v4811_v29 = vld [vmem:[%s7347_s6] ss:$0 sm:$0xff]  ;;  %s5490_s6 = smov [#allocation2]  }
 0x3c7   :  { %v5365_v5 = vpop.f32.mrf.mxu0  ;;  %v5379_v41 = vpop.f32.mrf.mxu1  ;;  %s4554_s12 = sshll.u32 %s5490_s6, 4  ;;  %s4555_s12 = int_to_ptr.vmem [resolvable:$true] %s4554_s12 }
 0x3c8   :  { %v3651_v44 = vadd.f32 %v5379_v41, %v5365_v5  ;;  %s5466_s13 = scalar_lea.vmem %s4555_s12, 1024  ;;  %p5471_p1 = scmp.lt.s32.totalorder %s4555_s12, %s4555_s12 }
 0x3c9   :  { %v3516_v46 = vpop.f32.mrf.mxu0  ;;  %v3645_v12 = vpop.f32.mrf.mxu1  ;;  %p5467_p0 = scmp.ne.s32.totalorder %s4555_s12, %s5466_s13  ;;  %p5472_p2 = scmp.lt.s32.totalorder %s5466_s13, %s5466_s13 }
 0x3ca   :  { %v3646_v9 = vadd.f32 %v3645_v12, %v3516_v46 }
 0x3cb   :  { %v5384_v35 = vpop.f32.mrf.mxu0  ;;  %v5398_v26 = vpop.f32.mrf.mxu1  ;;  %p5473_p3 = por %p5472_p2, %p5471_p1 }
 0x3cc   :  { %v3810_v7 = vadd.f32 %v5384_v35, %v3621_v19 }
 0x3cd   :  { %v3770_v17 = vpop.f32.mrf.mxu0  ;;  %v3909_v15 = vpop.f32.mrf.mxu1  ;;  %p5474_p4 = pnand %p5473_p3, %p5467_p0 }
 0x3ce   :  { %v3809_v28 = vadd.f32 %v3770_v17, %v3616_v16  ;;  %v3949_v39 = vadd.f32 %v5398_v26, %v3810_v7 }
 0x3cf   :  { %v5387_v6 = vpop.f32.mrf.mxu0  ;;  %v5401_v52 = vpop.f32.mrf.mxu1 }
 0x3d0   :  { %v3948_v4 = vadd.f32 %v3909_v15, %v3809_v28  ;;  %v3812_v30 = vadd.f32 %v5387_v6, %v3631_v25 }
 0x3d1   :  { %v3780_v3 = vpop.f32.mrf.mxu0  ;;  %v3919_v58 = vpop.f32.mrf.mxu1 }
 0x3d2   :  { %v3811_v43 = vadd.f32 %v3780_v3, %v3626_v20  ;;  %v3951_v61 = vadd.f32 %v5401_v52, %v3812_v30  ;;  %v7686_v30 = vld [vmem:[#allocation21_spill] sm:$0xff] }
 0x3d3   :  { %v5390_v13 = vpop.f32.mrf.mxu0  ;;  %v5404_v57 = vpop.f32.mrf.mxu1 }
 0x3d4   :  { %v3814_v51 = vadd.f32 %v5390_v13, %v3641_v62  ;;  %v3950_v55 = vadd.f32 %v3919_v58, %v3811_v43 }
 0x3d5   :  { %v3790_v31 = vpop.f32.mrf.mxu0  ;;  %v3929_v42 = vpop.f32.mrf.mxu1 }
 0x3d6   :  { %v3813_v47 = vadd.f32 %v3790_v31, %v3636_v2  ;;  %v3953_v40 = vadd.f32 %v5404_v57, %v3814_v51  ;;  %v7683_v57 = vld [vmem:[#allocation17_spill] sm:$0xff] }
 0x3d7   :  { %v5393_v36 = vpop.f32.mrf.mxu0  ;;  %v5407_v23 = vpop.f32.mrf.mxu1 }
 0x3d8   :  { %v3952_v32 = vadd.f32 %v3929_v42, %v3813_v47  ;;  %v3816_v17 = vadd.f32 %v5393_v36, %v3651_v44  ;;  %v7684_v36 = vld [vmem:[#allocation18_spill] sm:$0xff] }
 0x3d9   :  { %v3800_v38 = vpop.f32.mrf.mxu0  ;;  %v3939_v27 = vpop.f32.mrf.mxu1 }
 0x3da   :  { %v3815_v24 = vadd.f32 %v3800_v38, %v3646_v9  ;;  %v3955_v38 = vadd.f32 %v5407_v23, %v3816_v17 }
 0x3db   :  { %v5412_v59 = vpop.f32.mrf.mxu0  ;;  %v5426_v10 = vpop.f32.mrf.mxu1 }
 0x3dc   :  { %v4112_v34 = vadd.f32 %v5412_v59, %v3949_v39  ;;  %v3954_v58 = vadd.f32 %v3939_v27, %v3815_v24  ;;  %v7685_v39 = vld [vmem:[#allocation20_spill] sm:$0xff] }
 0x3dd   :  { %v4072_v18 = vpop.f32.mrf.mxu0  ;;  %v4235_v37 = vpop.f32.mrf.mxu1 }
 0x3de   :  { %v4111_v45 = vadd.f32 %v4072_v18, %v3948_v4  ;;  %v4275_v0 = vadd.f32 %v5426_v10, %v4112_v34 }
 0x3df   :  { %v5415_v50 = vpop.f32.mrf.mxu0  ;;  %v5429_v14 = vpop.f32.mrf.mxu1 }
 0x3e0   :  { %v4274_v63 = vadd.f32 %v4235_v37, %v4111_v45  ;;  %v4114_v21 = vadd.f32 %v5415_v50, %v3951_v61  ;;  %v7687_v45 = vld [vmem:[#allocation22_spill] sm:$0xff] }
 0x3e1   :  { %v4082_v22 = vpop.f32.mrf.mxu0  ;;  %v4245_v11 = vpop.f32.mrf.mxu1 }
 0x3e2   :  { %v4113_v48 = vadd.f32 %v4082_v22, %v3950_v55  ;;  %v4277_v13 = vadd.f32 %v5429_v14, %v4114_v21 }
 0x3e3   :  { %v5418_v49 = vpop.f32.mrf.mxu0  ;;  %v5432_v54 = vpop.f32.mrf.mxu1 }
 0x3e4   :  { %v4116_v35 = vadd.f32 %v5418_v49, %v3953_v40  ;;  %v4276_v6 = vadd.f32 %v4245_v11, %v4113_v48 }
 0x3e5   :  { %v4092_v56 = vpop.f32.mrf.mxu0  ;;  %v4255_v12 = vpop.f32.mrf.mxu1 }
 0x3e6   :  { %v4115_v46 = vadd.f32 %v4092_v56, %v3952_v32  ;;  %v4279_v41 = vadd.f32 %v5432_v54, %v4116_v35 }
 0x3e7   :  { %v5421_v8 = vpop.f32.mrf.mxu0  ;;  %v5435_v10 = vpop.f32.mrf.mxu1 }
 0x3e8   :  { %v4278_v59 = vadd.f32 %v4255_v12, %v4115_v46  ;;  %v4118_v49 = vadd.f32 %v5421_v8, %v3955_v38 }
 0x3e9   :  { %v4102_v60 = vpop.f32.mrf.mxu0  ;;  %v4265_v14 = vpop.f32.mrf.mxu1 }
 0x3ea   :  { %v4117_v18 = vadd.f32 %v4102_v60, %v3954_v58  ;;  %v4281_v2 = vadd.f32 %v5435_v10, %v4118_v49  ;;  %v7688_v60 = vld [vmem:[#allocation23_spill] sm:$0xff] }
 0x3eb   :  { %v5440_v33 = vpop.f32.mrf.mxu0 }
 0x3ec   :  { %v4438_v53 = vadd.f32 %v5440_v33, %v4275_v0  ;;  %v4280_v23 = vadd.f32 %v4265_v14, %v4117_v18 }
 0x3ed   :  { %v4398_v1 = vpop.f32.mrf.mxu0 }
 0x3ee   :  { %v4437_v26 = vadd.f32 %v4398_v1, %v4274_v63  ;;  %v4453_v52 = vadd.f32 %v4811_v29, %v4438_v53  ;;  %v7689_v63 = vld [vmem:[#allocation24_spill] sm:$0xff]  ;;  %v7690_v53 = vld [vmem:[#allocation25_spill] sm:$0xff] }
 0x3ef   :  { %v5443_v15 = vpop.f32.mrf.mxu0 }
 0x3f0   :  { %v4452_v3 = vadd.f32 %v4811_v29, %v4437_v26  ;;  %v4440_v19 = vadd.f32 %v5443_v15, %v4277_v13  ;;  %v4461_v50 = vadd.f32 %v4453_v52, %v7684_v36 }
 0x3f1   :  { %v4408_v5 = vpop.f32.mrf.mxu0 }
 0x3f2   :  { %v4460_v31 = vadd.f32 %v4452_v3, %v7683_v57  ;;  %v4439_v42 = vadd.f32 %v4408_v5, %v4276_v6  ;;  %v4455_v20 = vadd.f32 %v4811_v29, %v4440_v19  ;;  %v4469_v62 = vmax.f32 %v4461_v50, 0.0 }
 0x3f3   :  { %v5446_v37 = vpop.f32.mrf.mxu0 }
 0x3f4   :  { %v4468_v16 = vmax.f32 %v4460_v31, 0.0  ;;  %v4454_v7 = vadd.f32 %v4811_v29, %v4439_v42  ;;  %v4442_v22 = vadd.f32 %v5446_v37, %v4279_v41  ;;  %v4463_v47 = vadd.f32 %v4455_v20, %v7687_v45 }
 0x3f5   :  { %v4418_v28 = vpop.f32.mrf.mxu0 }
 0x3f6   :  { %v4441_v27 = vadd.f32 %v4418_v28, %v4278_v59  ;;  %4476 = vxpose.xlu0.b32.start [1/4] (short) (narrow) %v4468_v16, 32  ;;  %v4462_v25 = vadd.f32 %v4454_v7, %v7685_v39  ;;  %v4457_v4 = vadd.f32 %v4811_v29, %v4442_v22  ;;  %v4471_v54 = vmax.f32 %v4463_v47, 0.0 }
 0x3f7   :  { %v5449_v56 = vpop.f32.mrf.mxu0 }
 0x3f8   :  { %v4456_v43 = vadd.f32 %v4811_v29, %v4441_v27  ;;  %v4470_v8 = vmax.f32 %v4462_v25, 0.0  ;;  %v4465_v55 = vadd.f32 %v4457_v4, %v7688_v60  ;;  %v4444_v9 = vadd.f32 %v5449_v56, %v4281_v2 }
 0x3f9   :  { %v4428_v34 = vpop.f32.mrf.mxu0 }
 0x3fa   :  { %v4464_v11 = vadd.f32 %v4456_v43, %v7686_v30  ;;  %v4443_v51 = vadd.f32 %v4428_v34, %v4280_v23  ;;  %4477 = vxpose.xlu0.b32.cont [2/4] (short) (narrow) %v4469_v62, 32  ;;  %v4473_v33 = vmax.f32 %v4465_v55, 0.0  ;;  %v4459_v40 = vadd.f32 %v4811_v29, %v4444_v9 }
 0x3fc   :  { %v4472_v0 = vmax.f32 %v4464_v11, 0.0  ;;  %v4458_v61 = vadd.f32 %v4811_v29, %v4443_v51  ;;  %v4467_v44 = vadd.f32 %v4459_v40, %v7690_v53 }
 0x3fe   :  { %4478 = vxpose.xlu0.b32.cont [3/4] (short) (narrow) %v4470_v8, 32  ;;  %4512 = vxpose.xlu1.b32.start [1/4] (short) (narrow) %v4472_v0, 32  ;;  %v4466_v48 = vadd.f32 %v4458_v61, %v7689_v63  ;;  %v4475_v24 = vmax.f32 %v4467_v44, 0.0 }
 0x400   :  { %v4474_v32 = vmax.f32 %v4466_v48, 0.0 }
 0x402   :  { %4479 = vxpose.xlu0.b32.end [4/4] (short) (narrow) %v4471_v54, 32  ;;  %4513 = vxpose.xlu1.b32.cont [2/4] (short) (narrow) %v4473_v33, 32 }
 0x406   :  { %4514 = vxpose.xlu1.b32.cont [3/4] (short) (narrow) %v4474_v32, 32 }
 0x40a   :  { %4515 = vxpose.xlu1.b32.end [4/4] (short) (narrow) %v4475_v24, 32 }
 0x472   :  { %v4492_v21 = vpop.trf.xlu0 }
 0x473   :  { %4508 = vst.msk [vmem:[#allocation2] sm:$0xff] %vm7691_vm8, %v4492_v21 }
 0x476   :  { %v4493_v1 = vpop.trf.xlu0 }
 0x477   :  { %4509 = vst.msk [vmem:[#allocation2 + $0x8] sm:$0xff] %vm7692_vm9, %v4493_v1 }
 0x47a   :  { %v4528_v35 = vpop.trf.xlu1  ;;  %v4494_v26 = vpop.trf.xlu0 }
 0x47b   :  { %4545 = vst.msk [vmem:[#allocation2 + $0x20] sm:$0xff] %vm7693_vm1, %v4528_v35 }
 0x47c   :  { %4510 = vst.msk [vmem:[#allocation2 + $0x10] sm:$0xff] %vm7694_vm15, %v4494_v26 }
 0x47e   :  { %v4529_v29 = vpop.trf.xlu1  ;;  %v4495_v17 = vpop.trf.xlu0 }
 0x47f   :  { %4546 = vst.msk [vmem:[#allocation2 + $0x28] sm:$0xff] %vm7695_vm2, %v4529_v29 }
 0x480   :  { %4511 = vst.msk [vmem:[#allocation2 + $0x18] sm:$0xff] %vm7696_vm4, %v4495_v17 }
 0x482   :  { %v4530_v46 = vpop.trf.xlu1 }
 0x483   :  { %4547 = vst.msk [vmem:[#allocation2 + $0x30] sm:$0xff] %vm7697_vm6, %v4530_v46 }
 0x486   :  { %v4531_v12 = vpop.trf.xlu1 }
 0x487   :  { %4548 = vst.msk [vmem:[#allocation2 + $0x38] sm:$0xff] %vm7698_vm14, %v4531_v12 }
 0x488   :  { %5477 = shalt.err (!%p5474_p4)
}
 0x489   :  { %s5491_s14 = smov 128   ;;  %s5492_s15 = smov 8  }
 0x48a   :  { %4560 = dma.vmem_to_hbm [thread:$0]  %s4555_s12, 1024, %s7348_s7, [#allocation3], %s5491_s14, %s5491_s14, %s5492_s15  }
 0x48b   :  { %5486 = dma.done.wait [#allocation3], 1024  }
 0x48c   :  { %5487 = vsyncadd [#allocation3], 4294966272 }
 0x48d   :  { %4564 = vsyncpa [#allocation3], 1 }

</bundles_post_ra>
